<compile_context>
chip_gen: v6e
topology: v6e:2x2x1
jax: 0.10.0
libtpu: 0.0.40
codegen_flags: <defaults>
</compile_context>

<pallas_src>
import math
import functools

import jax
import jax.numpy as jnp
from jax.experimental import pallas as pl
from jax.experimental.pallas import tpu as pltpu


NEG_INF = -1e9          # plain Python float -> becomes a literal, never a captured array
LN_EPS = 1e-5


def _default_vmem_limit():
    cap = 64 * 1024 * 1024
    try:
        info = pltpu.get_tpu_info()
        cap = int(getattr(info, "vmem_capacity_bytes", cap))
    except Exception:
        pass
    return int(cap * 3 // 4)


_VMEM_LIMIT = _default_vmem_limit()


def _row_tile(m, cap=1024):
    """Largest multiple-of-8 divisor of m that is <= cap, else m (full dim)."""
    t = min(m, cap)
    for cand in range(t, 7, -1):
        if m % cand == 0 and cand % 8 == 0:
            return cand
    return m


def _col_tile(n, cap=2048):
    """Largest multiple-of-128 divisor of n that is <= cap, else n (full dim)."""
    t = min(n, cap)
    start = t - (t % 128)
    for cand in range(start, 127, -128):
        if cand > 0 and n % cand == 0:
            return cand
    return n


def _bf16(x):
    return x.astype(jnp.bfloat16)


def _layer_norm(y, g, b):
    mu = jnp.mean(y, axis=-1, keepdims=True)
    var = jnp.mean(jnp.square(y - mu), axis=-1, keepdims=True)
    return (y - mu) * jax.lax.rsqrt(var + LN_EPS) * g + b


# ----------------------------------------------------------------------------
# Multi-head attention core: head-major pre-split weights, per-head 2D matmuls,
# output projection accumulated per head (no lane slices, no concat).
# ----------------------------------------------------------------------------

def _mha(x_q, x_kv, mask2d, wq_ref, bq_ref, q0, wkv_ref, bkv_ref, k0, v0,
         wo_ref, bo_row, *, num_heads, scale):
    # x_q: (Sq, D) f32, x_kv: (Sk, D) f32, mask2d: (Sq, Sk) bool
    # wq_ref/wkv_ref: (*, D, dh) head-major stacks; wo_ref: (H, dh, D)
    Sq, D = x_q.shape
    xq16 = _bf16(x_q)
    xk16 = _bf16(x_kv)
    acc = jnp.zeros((Sq, D), jnp.float32)
    for h in range(num_heads):                              # static unroll
        q = (jnp.dot(xq16, _bf16(wq_ref[q0 + h]),
                     preferred_element_type=jnp.float32) + bq_ref[q0 + h])
        k = (jnp.dot(xk16, _bf16(wkv_ref[k0 + h]),
                     preferred_element_type=jnp.float32) + bkv_ref[k0 + h])
        v = (jnp.dot(xk16, _bf16(wkv_ref[v0 + h]),
                     preferred_element_type=jnp.float32) + bkv_ref[v0 + h])
        s = jax.lax.dot_general(_bf16(q), _bf16(k), (((1,), (1,)), ((), ())),
                                preferred_element_type=jnp.float32) * scale
        s = jnp.where(mask2d, s, NEG_INF)                   # masked_fill semantics
        s = s - jnp.max(s, axis=-1, keepdims=True)
        p = jnp.exp(s)
        p = p / jnp.sum(p, axis=-1, keepdims=True)          # exact normalization
        o = jnp.dot(_bf16(p), _bf16(v), preferred_element_type=jnp.float32)
        acc = acc + jnp.dot(_bf16(o), _bf16(wo_ref[h]),
                            preferred_element_type=jnp.float32)
    return acc + bo_row


def _ffn(y, w1_ref, b1_ref, w2_ref, b2_ref):
    h = (jnp.dot(_bf16(y), _bf16(w1_ref[...]),
                 preferred_element_type=jnp.float32) + b1_ref[...])
    h = jnp.maximum(h, 0.0)
    return (jnp.dot(_bf16(h), _bf16(w2_ref[...]),
                    preferred_element_type=jnp.float32) + b2_ref[...])


# ----------------------------------------------------------------------------
# Fused encoder layer: self-attn + add&LN + FFN + add&LN   (one pallas_call)
# ----------------------------------------------------------------------------

def _enc_layer_kernel(x_ref, kq_ref, kk_ref,
                      wqkv_ref, bqkv_ref, wo_ref, bo_ref, g1_ref, be1_ref,
                      w1_ref, bf1_ref, w2_ref, bf2_ref, g2_ref, be2_ref,
                      o_ref, *, num_heads, scale):
    x = x_ref[0]                                             # (S, D)
    # src_mask[q, k] = keep_src[q] & keep_src[k]   (reference get_src_mask)
    mask2d = (kq_ref[0] * kk_ref[0]) > 0.0                   # (S, S)
    attn = _mha(x, x, mask2d,
                wqkv_ref, bqkv_ref, 0, wqkv_ref, bqkv_ref,
                num_heads, 2 * num_heads, wo_ref, bo_ref[...],
                num_heads=num_heads, scale=scale)
    y = _layer_norm(attn + x, g1_ref[...], be1_ref[...])
    f = _ffn(y, w1_ref, bf1_ref, w2_ref, bf2_ref)
    o_ref[0] = _layer_norm(f + y, g2_ref[...], be2_ref[...])


def encoder_layer(x, keep_q, keep_k, lp, *, num_heads):
    B, S, D = x.shape
    H = num_heads
    dh = D // H
    F = lp["w1"].shape[1]
    scale = 1.0 / math.sqrt(dh)
    kernel = functools.partial(_enc_layer_kernel, num_heads=H, scale=scale)
    xmap = lambda b: (b, 0, 0)
    c2 = lambda b: (0, 0)
    c3 = lambda b: (0, 0, 0)
    flops = B * (8 * S * D * D + 4 * S * S * D + 4 * S * D * F)
    cost = pl.CostEstimate(
        flops=int(flops), transcendentals=int(B * H * S * S),
        bytes_accessed=int(4 * (2 * B * S * D + 4 * D * D + 2 * D * F + 8 * D + F)))
    return pl.pallas_call(
        kernel,
        out_shape=jax.ShapeDtypeStruct((B, S, D), jnp.float32),
        grid=(B,),
        in_specs=[
            pl.BlockSpec((1, S, D), xmap),                   # x
            pl.BlockSpec((1, S, 1), xmap),                   # src keep (rows)
            pl.BlockSpec((1, 1, S), xmap),                   # src keep (cols)
            pl.BlockSpec((3 * H, D, dh), c3),                # wqkv head-major
            pl.BlockSpec((3 * H, 1, dh), c3),                # bqkv head-major
            pl.BlockSpec((H, dh, D), c3),                    # wo head-major
            pl.BlockSpec((1, D), c2),                        # bo
            pl.BlockSpec((1, D), c2),                        # ln1 gamma
            pl.BlockSpec((1, D), c2),                        # ln1 beta
            pl.BlockSpec((D, F), c2),                        # w1
            pl.BlockSpec((1, F), c2),                        # b1
            pl.BlockSpec((F, D), c2),                        # w2
            pl.BlockSpec((1, D), c2),                        # b2
            pl.BlockSpec((1, D), c2),                        # ln2 gamma
            pl.BlockSpec((1, D), c2),                        # ln2 beta
        ],
        out_specs=pl.BlockSpec((1, S, D), xmap),
        compiler_params=pltpu.CompilerParams(
            dimension_semantics=("parallel",),
            vmem_limit_bytes=_VMEM_LIMIT),
        cost_estimate=cost,
    )(x, keep_q, keep_k,
      lp["wqkv_h"], lp["bqkv_h"], lp["wo_h"], lp["bo"],
      lp["ln1_g"], lp["ln1_b"],
      lp["w1"], lp["b1"], lp["w2"], lp["b2"], lp["ln2_g"], lp["ln2_b"])


# ----------------------------------------------------------------------------
# Fused decoder layer:
#   masked self-attn + add&LN + cross-attn + add&LN + FFN + add&LN
# ----------------------------------------------------------------------------

def _dec_layer_kernel(y_ref, enc_ref, tkk_ref, skq_ref, skk_ref,
                      wqkv_ref, bqkv_ref, wo_ref, bo_ref, g1_ref, be1_ref,
                      xwq_ref, xbq_ref, xwkv_ref, xbkv_ref, xwo_ref, xbo_ref,
                      g3_ref, be3_ref,
                      w1_ref, bf1_ref, w2_ref, bf2_ref, g2_ref, be2_ref,
                      o_ref, *, num_heads, scale):
    y = y_ref[0]                                             # (St, D)
    enc = enc_ref[0]                                         # (Ss, D)
    St = y.shape[0]
    # trg_mask[q, k] = keep_trg[k] & (k <= q)     (reference get_trg_mask)
    qi = jax.lax.broadcasted_iota(jnp.int32, (St, St), 0)
    ki = jax.lax.broadcasted_iota(jnp.int32, (St, St), 1)
    trg_mask = (tkk_ref[0] > 0.0) & (ki <= qi)               # (St, St)
    # src_mask[q, k] = keep_src[q] & keep_src[k]  (reference get_src_mask;
    # TODO(synk): like the reference, this implicitly assumes S_trg == S_src)
    src_mask = (skq_ref[0] * skk_ref[0]) > 0.0               # (Ss, Ss)

    a1 = _mha(y, y, trg_mask,
              wqkv_ref, bqkv_ref, 0, wqkv_ref, bqkv_ref,
              num_heads, 2 * num_heads, wo_ref, bo_ref[...],
              num_heads=num_heads, scale=scale)
    y1 = _layer_norm(a1 + y, g1_ref[...], be1_ref[...])

    a2 = _mha(y1, enc, src_mask,
              xwq_ref, xbq_ref, 0, xwkv_ref, xbkv_ref,
              0, num_heads, xwo_ref, xbo_ref[...],
              num_heads=num_heads, scale=scale)
    y2 = _layer_norm(a2 + y1, g3_ref[...], be3_ref[...])

    f = _ffn(y2, w1_ref, bf1_ref, w2_ref, bf2_ref)
    o_ref[0] = _layer_norm(f + y2, g2_ref[...], be2_ref[...])


def decoder_layer(y, enc, trg_keep_k, src_keep_q, src_keep_k, lp, *, num_heads):
    B, St, D = y.shape
    Ss = enc.shape[1]
    H = num_heads
    dh = D // H
    F = lp["w1"].shape[1]
    scale = 1.0 / math.sqrt(dh)
    kernel = functools.partial(_dec_layer_kernel, num_heads=H, scale=scale)
    ymap = lambda b: (b, 0, 0)
    c2 = lambda b: (0, 0)
    c3 = lambda b: (0, 0, 0)
    flops = B * (8 * St * D * D + 4 * St * St * D
                 + 4 * St * D * D + 4 * Ss * D * D + 4 * St * Ss * D
                 + 4 * St * D * F)
    cost = pl.CostEstimate(
        flops=int(flops),
        transcendentals=int(B * H * (St * St + St * Ss)),
        bytes_accessed=int(4 * (2 * B * St * D + B * Ss * D
                                + 8 * D * D + 2 * D * F + 12 * D + F)))
    return pl.pallas_call(
        kernel,
        out_shape=jax.ShapeDtypeStruct((B, St, D), jnp.float32),
        grid=(B,),
        in_specs=[
            pl.BlockSpec((1, St, D), ymap),                  # y (decoder act)
            pl.BlockSpec((1, Ss, D), ymap),                  # encoder output
            pl.BlockSpec((1, 1, St), ymap),                  # trg keep (cols)
            pl.BlockSpec((1, Ss, 1), ymap),                  # src keep (rows)
            pl.BlockSpec((1, 1, Ss), ymap),                  # src keep (cols)
            pl.BlockSpec((3 * H, D, dh), c3),                # self wqkv
            pl.BlockSpec((3 * H, 1, dh), c3),                # self bqkv
            pl.BlockSpec((H, dh, D), c3),                    # self wo
            pl.BlockSpec((1, D), c2),                        # self bo
            pl.BlockSpec((1, D), c2),                        # ln1 gamma
            pl.BlockSpec((1, D), c2),                        # ln1 beta
            pl.BlockSpec((H, D, dh), c3),                    # cross wq
            pl.BlockSpec((H, 1, dh), c3),                    # cross bq
            pl.BlockSpec((2 * H, D, dh), c3),                # cross wkv
            pl.BlockSpec((2 * H, 1, dh), c3),                # cross bkv
            pl.BlockSpec((H, dh, D), c3),                    # cross wo
            pl.BlockSpec((1, D), c2),                        # cross bo
            pl.BlockSpec((1, D), c2),                        # ln3 gamma
            pl.BlockSpec((1, D), c2),                        # ln3 beta
            pl.BlockSpec((D, F), c2),                        # w1
            pl.BlockSpec((1, F), c2),                        # b1
            pl.BlockSpec((F, D), c2),                        # w2
            pl.BlockSpec((1, D), c2),                        # b2
            pl.BlockSpec((1, D), c2),                        # ln2 gamma
            pl.BlockSpec((1, D), c2),                        # ln2 beta
        ],
        out_specs=pl.BlockSpec((1, St, D), ymap),
        compiler_params=pltpu.CompilerParams(
            dimension_semantics=("parallel",),
            vmem_limit_bytes=_VMEM_LIMIT),
        cost_estimate=cost,
    )(y, enc, trg_keep_k, src_keep_q, src_keep_k,
      lp["wqkv_h"], lp["bqkv_h"], lp["wo_h"], lp["bo"], lp["ln1_g"], lp["ln1_b"],
      lp["xwq_h"], lp["xbq_h"], lp["xwkv_h"], lp["xbkv_h"], lp["xwo_h"],
      lp["xbo"], lp["ln3_g"], lp["ln3_b"],
      lp["w1"], lp["b1"], lp["w2"], lp["b2"], lp["ln2_g"], lp["ln2_b"])


# ----------------------------------------------------------------------------
# Final vocabulary projection: tiled over rows AND vocab columns
# ----------------------------------------------------------------------------

def _linear_kernel(x_ref, w_ref, b_ref, o_ref):
    o_ref[...] = (jnp.dot(_bf16(x_ref[...]), _bf16(w_ref[...]),
                          preferred_element_type=jnp.float32) + b_ref[...])


def linear_project(x2d, w, b):
    M, K = x2d.shape
    N = w.shape[1]
    TM = _row_tile(M)
    TN = _col_tile(N)
    cost = pl.CostEstimate(
        flops=int(2 * M * K * N), transcendentals=0,
        bytes_accessed=int(4 * (M * K * max(1, N // TN) + K * N + N + M * N)))
    return pl.pallas_call(
        _linear_kernel,
        out_shape=jax.ShapeDtypeStruct((M, N), jnp.float32),
        grid=(M // TM, N // TN),
        in_specs=[pl.BlockSpec((TM, K), lambda i, j: (i, 0)),
                  pl.BlockSpec((K, TN), lambda i, j: (0, j)),
                  pl.BlockSpec((1, TN), lambda i, j: (0, j))],
        out_specs=pl.BlockSpec((TM, TN), lambda i, j: (i, j)),
        compiler_params=pltpu.CompilerParams(
            dimension_semantics=("parallel", "parallel"),
            vmem_limit_bytes=_VMEM_LIMIT),
        cost_estimate=cost,
    )(x2d, w, b.reshape(1, N))


# ----------------------------------------------------------------------------
# Parameter init (deterministic, synthetic) — attention weights pre-split into
# head-major stacks so the kernels never lane-slice activations or weights.
# ----------------------------------------------------------------------------

def _rand(key, shape, scale=0.02):
    return jax.random.normal(key, shape, jnp.float32) * scale


def _layer_params(key, d_model, d_ff, num_heads, cross_attn):
    H = num_heads
    dh = d_model // H
    ks = jax.random.split(key, 7)
    wqkv = _rand(ks[0], (d_model, 3 * d_model))
    wo = _rand(ks[1], (d_model, d_model))
    p = {
        "wqkv_h": wqkv.reshape(d_model, 3, H, dh).transpose(1, 2, 0, 3)
                      .reshape(3 * H, d_model, dh),
        "bqkv_h": jnp.zeros((3 * H, 1, dh), jnp.float32),
        "wo_h": wo.reshape(H, dh, d_model),
        "bo": jnp.zeros((1, d_model), jnp.float32),
        "ln1_g": jnp.ones((1, d_model), jnp.float32),
        "ln1_b": jnp.zeros((1, d_model), jnp.float32),
        "w1": _rand(ks[2], (d_model, d_ff)),
        "b1": jnp.zeros((1, d_ff), jnp.float32),
        "w2": _rand(ks[3], (d_ff, d_model)),
        "b2": jnp.zeros((1, d_model), jnp.float32),
        "ln2_g": jnp.ones((1, d_model), jnp.float32),
        "ln2_b": jnp.zeros((1, d_model), jnp.float32),
    }
    if cross_attn:
        xwq = _rand(ks[4], (d_model, d_model))
        xwkv = _rand(ks[5], (d_model, 2 * d_model))
        xwo = _rand(ks[6], (d_model, d_model))
        p.update({
            "xwq_h": xwq.reshape(d_model, H, dh).transpose(1, 0, 2),
            "xbq_h": jnp.zeros((H, 1, dh), jnp.float32),
            "xwkv_h": xwkv.reshape(d_model, 2, H, dh).transpose(1, 2, 0, 3)
                          .reshape(2 * H, d_model, dh),
            "xbkv_h": jnp.zeros((2 * H, 1, dh), jnp.float32),
            "xwo_h": xwo.reshape(H, dh, d_model),
            "xbo": jnp.zeros((1, d_model), jnp.float32),
            "ln3_g": jnp.ones((1, d_model), jnp.float32),
            "ln3_b": jnp.zeros((1, d_model), jnp.float32),
        })
    return p


def _positional_encoding(max_len, d_model):
    pos = jnp.arange(max_len, dtype=jnp.float32)[:, None]
    i = jnp.arange(0, d_model, 2, dtype=jnp.float32)
    angles = pos / jnp.power(10000.0, i / d_model)
    pe = jnp.zeros((max_len, d_model), jnp.float32)
    pe = pe.at[:, 0::2].set(jnp.sin(angles))
    pe = pe.at[:, 1::2].set(jnp.cos(angles))
    return pe


def init_transformer_params(key, vocab_enc, vocab_dec, d_model, d_ff,
                            max_seq_len, num_layers, num_heads):
    assert d_model % num_heads == 0
    keys = jax.random.split(key, 3 + 2 * num_layers)
    return {
        "enc_emb": _rand(keys[0], (vocab_enc, d_model)),
        "dec_emb": _rand(keys[1], (vocab_dec, d_model)),
        "pe": _positional_encoding(max_seq_len, d_model),
        "enc_layers": [
            _layer_params(keys[3 + l], d_model, d_ff, num_heads, cross_attn=False)
            for l in range(num_layers)],
        "dec_layers": [
            _layer_params(keys[3 + num_layers + l], d_model, d_ff, num_heads,
                          cross_attn=True)
            for l in range(num_layers)],
        "out_w": _rand(keys[2], (d_model, vocab_dec)),
        "out_b": jnp.zeros((vocab_dec,), jnp.float32),
    }


# ----------------------------------------------------------------------------
# Transformer forward (embedding gather in JAX, all hot paths in Pallas)
# ----------------------------------------------------------------------------

def transformer_forward(params, src, trg, *, src_pad, trg_pad,
                        d_model, num_heads):
    B, S_src = src.shape
    _, S_trg = trg.shape

    # Tiny keep vectors only — the (Sq, Sk) masks are rebuilt inside the kernels.
    src_keep = (src != src_pad).astype(jnp.float32)            # (B, S_src)
    trg_keep = (trg != trg_pad).astype(jnp.float32)            # (B, S_trg)
    src_keep_q = src_keep[:, :, None]                          # (B, S_src, 1)
    src_keep_k = src_keep[:, None, :]                          # (B, 1, S_src)
    trg_keep_k = trg_keep[:, None, :]                          # (B, 1, S_trg)

    emb_scale = math.sqrt(d_model)
    pe = params["pe"]

    # --- encoder ---
    x = params["enc_emb"][src] * emb_scale + pe[:S_src]        # (B, S_src, D)
    for lp in params["enc_layers"]:
        x = encoder_layer(x, src_keep_q, src_keep_k, lp, num_heads=num_heads)
    enc = x

    # --- decoder ---
    y = params["dec_emb"][trg] * emb_scale + pe[:S_trg]
    for lp in params["dec_layers"]:
        y = decoder_layer(y, enc, trg_keep_k, src_keep_q, src_keep_k, lp,
                          num_heads=num_heads)

    # --- final projection to target vocabulary (raw logits) ---
    logits2d = linear_project(y.reshape(B * S_trg, d_model),
                              params["out_w"], params["out_b"])
    return logits2d.reshape(B, S_trg, -1)


# ----------------------------------------------------------------------------
# Driver
# ----------------------------------------------------------------------------

if __name__ == "__main__":
    src_pad, trg_pad, trg_sos = 0, 0, 1
    vocab_size_enc, vocab_size_dec = 50, 60
    d_model, d_ff = 32, 64
    max_seq_len = 16
    num_layers, num_heads = 2, 4
    batch, seq = 2, 8

    key = jax.random.PRNGKey(0)
    k_param, k_src, k_trg = jax.random.split(key, 3)

    params = init_transformer_params(
        k_param, vocab_size_enc, vocab_size_dec, d_model, d_ff,
        max_seq_len, num_layers, num_heads)

    src = jax.random.randint(k_src, (batch, seq), 1, vocab_size_enc,
                             dtype=jnp.int32)
    trg = jax.random.randint(k_trg, (batch, seq), 1, vocab_size_dec,
                             dtype=jnp.int32)
    # add some padding tokens so the masks are exercised
    src = src.at[:, -2:].set(src_pad)
    trg = trg.at[:, -1:].set(trg_pad)

    fwd = jax.jit(functools.partial(
        transformer_forward, src_pad=src_pad, trg_pad=trg_pad,
        d_model=d_model, num_heads=num_heads))

    out = fwd(params, src, trg)
    jax.block_until_ready(out)

    assert out.shape == (batch, seq, vocab_size_dec), out.shape
    assert bool(jnp.all(jnp.isfinite(out)))
    print("KERNEL_OK")
</pallas_src>

<mosaic_0001>
module attributes {stable_mosaic.version = 11 : i64} {
  func.func @_enc_layer_kernel(%arg0: i32, %arg1: memref<1x8x32xf32, #tpu.memory_space<vmem>>, %arg2: memref<1x8x1xf32, #tpu.memory_space<vmem>>, %arg3: memref<1x1x8xf32, #tpu.memory_space<vmem>>, %arg4: memref<12x32x8xf32, #tpu.memory_space<vmem>>, %arg5: memref<12x1x8xf32, #tpu.memory_space<vmem>>, %arg6: memref<4x8x32xf32, #tpu.memory_space<vmem>>, %arg7: memref<1x32xf32, #tpu.memory_space<vmem>>, %arg8: memref<1x32xf32, #tpu.memory_space<vmem>>, %arg9: memref<1x32xf32, #tpu.memory_space<vmem>>, %arg10: memref<32x64xf32, #tpu.memory_space<vmem>>, %arg11: memref<1x64xf32, #tpu.memory_space<vmem>>, %arg12: memref<64x32xf32, #tpu.memory_space<vmem>>, %arg13: memref<1x32xf32, #tpu.memory_space<vmem>>, %arg14: memref<1x32xf32, #tpu.memory_space<vmem>>, %arg15: memref<1x32xf32, #tpu.memory_space<vmem>>, %arg16: memref<1x8x32xf32, #tpu.memory_space<vmem>>) attributes {dimension_semantics = [#tpu.dimension_semantics<parallel>], iteration_bounds = array<i64: 2>, scalar_prefetch = 0 : i64, scratch_operands = 0 : i64, tpu.core_type = #tpu.core_type<tc>, window_params = [{transform_indices = @transform_0, window_bounds = array<i64: 1, 8, 32>}, {transform_indices = @transform_1, window_bounds = array<i64: 1, 8, 1>}, {transform_indices = @transform_2, window_bounds = array<i64: 1, 1, 8>}, {pipeline_mode = #tpu.pipeline_mode<synchronous>, transform_indices = @transform_3, window_bounds = array<i64: 12, 32, 8>}, {pipeline_mode = #tpu.pipeline_mode<synchronous>, transform_indices = @transform_4, window_bounds = array<i64: 12, 1, 8>}, {pipeline_mode = #tpu.pipeline_mode<synchronous>, transform_indices = @transform_5, window_bounds = array<i64: 4, 8, 32>}, {pipeline_mode = #tpu.pipeline_mode<synchronous>, transform_indices = @transform_6, window_bounds = array<i64: 1, 32>}, {pipeline_mode = #tpu.pipeline_mode<synchronous>, transform_indices = @transform_7, window_bounds = array<i64: 1, 32>}, {pipeline_mode = #tpu.pipeline_mode<synchronous>, transform_indices = @transform_8, window_bounds = array<i64: 1, 32>}, {pipeline_mode = #tpu.pipeline_mode<synchronous>, transform_indices = @transform_9, window_bounds = array<i64: 32, 64>}, {pipeline_mode = #tpu.pipeline_mode<synchronous>, transform_indices = @transform_10, window_bounds = array<i64: 1, 64>}, {pipeline_mode = #tpu.pipeline_mode<synchronous>, transform_indices = @transform_11, window_bounds = array<i64: 64, 32>}, {pipeline_mode = #tpu.pipeline_mode<synchronous>, transform_indices = @transform_12, window_bounds = array<i64: 1, 32>}, {pipeline_mode = #tpu.pipeline_mode<synchronous>, transform_indices = @transform_13, window_bounds = array<i64: 1, 32>}, {pipeline_mode = #tpu.pipeline_mode<synchronous>, transform_indices = @transform_14, window_bounds = array<i64: 1, 32>}, {transform_indices = @transform_15, window_bounds = array<i64: 1, 8, 32>}]} {
    %c0 = arith.constant 0 : index
    %c0_0 = arith.constant 0 : index
    %c0_1 = arith.constant 0 : index
    %0 = vector.load %arg1[%c0, %c0_0, %c0_1] : memref<1x8x32xf32, #tpu.memory_space<vmem>>, vector<1x8x32xf32>
    %1 = vector.shape_cast %0 : vector<1x8x32xf32> to vector<8x32xf32>
    %c0_2 = arith.constant 0 : index
    %c0_3 = arith.constant 0 : index
    %c0_4 = arith.constant 0 : index
    %2 = vector.load %arg2[%c0_2, %c0_3, %c0_4] : memref<1x8x1xf32, #tpu.memory_space<vmem>>, vector<1x8x1xf32>
    %3 = vector.shape_cast %2 : vector<1x8x1xf32> to vector<8x1xf32>
    %c0_5 = arith.constant 0 : index
    %c0_6 = arith.constant 0 : index
    %c0_7 = arith.constant 0 : index
    %4 = vector.load %arg3[%c0_5, %c0_6, %c0_7] : memref<1x1x8xf32, #tpu.memory_space<vmem>>, vector<1x1x8xf32>
    %5 = vector.shape_cast %4 : vector<1x1x8xf32> to vector<1x8xf32>
    %6 = vector.broadcast %3 : vector<8x1xf32> to vector<8x8xf32>
    %7 = vector.broadcast %5 : vector<1x8xf32> to vector<8x8xf32>
    %8 = arith.mulf %6, %7 : vector<8x8xf32>
    %cst = arith.constant 0.000000e+00 : f32
    %9 = vector.broadcast %cst : f32 to vector<8x8xf32>
    %10 = arith.cmpf ogt, %8, %9 : vector<8x8xf32>
    %c0_8 = arith.constant 0 : index
    %c0_9 = arith.constant 0 : index
    %11 = vector.load %arg7[%c0_8, %c0_9] : memref<1x32xf32, #tpu.memory_space<vmem>>, vector<1x32xf32>
    %12 = arith.truncf %1 : vector<8x32xf32> to vector<8x32xbf16>
    %13 = arith.truncf %1 : vector<8x32xf32> to vector<8x32xbf16>
    %cst_10 = arith.constant 0.000000e+00 : f32
    %14 = vector.broadcast %cst_10 : f32 to vector<8x32xf32>
    %c0_11 = arith.constant 0 : index
    %c0_12 = arith.constant 0 : index
    %c0_13 = arith.constant 0 : index
    %15 = vector.load %arg4[%c0_11, %c0_12, %c0_13] : memref<12x32x8xf32, #tpu.memory_space<vmem>>, vector<1x32x8xf32>
    %16 = vector.shape_cast %15 : vector<1x32x8xf32> to vector<32x8xf32>
    %17 = arith.truncf %16 : vector<32x8xf32> to vector<32x8xbf16>
    %cst_14 = arith.constant dense<0.000000e+00> : vector<8x8xf32>
    %18 = tpu.matmul %12, %17, %cst_14 {dimension_numbers = #tpu.dot_dimension_numbers<[1], [0], [0], [1], [0, 0, 1, 1], [], []>} : vector<8x32xbf16>, vector<32x8xbf16>, vector<8x8xf32> -> vector<8x8xf32>
    %c0_15 = arith.constant 0 : index
    %c0_16 = arith.constant 0 : index
    %c0_17 = arith.constant 0 : index
    %19 = vector.load %arg5[%c0_15, %c0_16, %c0_17] : memref<12x1x8xf32, #tpu.memory_space<vmem>>, vector<1x1x8xf32>
    %20 = vector.shape_cast %19 : vector<1x1x8xf32> to vector<1x8xf32>
    %21 = vector.broadcast %20 : vector<1x8xf32> to vector<8x8xf32>
    %22 = arith.addf %18, %21 : vector<8x8xf32>
    %c4 = arith.constant 4 : index
    %c0_18 = arith.constant 0 : index
    %c0_19 = arith.constant 0 : index
    %23 = vector.load %arg4[%c4, %c0_18, %c0_19] : memref<12x32x8xf32, #tpu.memory_space<vmem>>, vector<1x32x8xf32>
    %24 = vector.shape_cast %23 : vector<1x32x8xf32> to vector<32x8xf32>
    %25 = arith.truncf %24 : vector<32x8xf32> to vector<32x8xbf16>
    %cst_20 = arith.constant dense<0.000000e+00> : vector<8x8xf32>
    %26 = tpu.matmul %13, %25, %cst_20 {dimension_numbers = #tpu.dot_dimension_numbers<[1], [0], [0], [1], [0, 0, 1, 1], [], []>} : vector<8x32xbf16>, vector<32x8xbf16>, vector<8x8xf32> -> vector<8x8xf32>
    %c4_21 = arith.constant 4 : index
    %c0_22 = arith.constant 0 : index
    %c0_23 = arith.constant 0 : index
    %27 = vector.load %arg5[%c4_21, %c0_22, %c0_23] : memref<12x1x8xf32, #tpu.memory_space<vmem>>, vector<1x1x8xf32>
    %28 = vector.shape_cast %27 : vector<1x1x8xf32> to vector<1x8xf32>
    %29 = vector.broadcast %28 : vector<1x8xf32> to vector<8x8xf32>
    %30 = arith.addf %26, %29 : vector<8x8xf32>
    %c8 = arith.constant 8 : index
    %c0_24 = arith.constant 0 : index
    %c0_25 = arith.constant 0 : index
    %31 = vector.load %arg4[%c8, %c0_24, %c0_25] : memref<12x32x8xf32, #tpu.memory_space<vmem>>, vector<1x32x8xf32>
    %32 = vector.shape_cast %31 : vector<1x32x8xf32> to vector<32x8xf32>
    %33 = arith.truncf %32 : vector<32x8xf32> to vector<32x8xbf16>
    %cst_26 = arith.constant dense<0.000000e+00> : vector<8x8xf32>
    %34 = tpu.matmul %13, %33, %cst_26 {dimension_numbers = #tpu.dot_dimension_numbers<[1], [0], [0], [1], [0, 0, 1, 1], [], []>} : vector<8x32xbf16>, vector<32x8xbf16>, vector<8x8xf32> -> vector<8x8xf32>
    %c8_27 = arith.constant 8 : index
    %c0_28 = arith.constant 0 : index
    %c0_29 = arith.constant 0 : index
    %35 = vector.load %arg5[%c8_27, %c0_28, %c0_29] : memref<12x1x8xf32, #tpu.memory_space<vmem>>, vector<1x1x8xf32>
    %36 = vector.shape_cast %35 : vector<1x1x8xf32> to vector<1x8xf32>
    %37 = vector.broadcast %36 : vector<1x8xf32> to vector<8x8xf32>
    %38 = arith.addf %34, %37 : vector<8x8xf32>
    %39 = arith.truncf %22 : vector<8x8xf32> to vector<8x8xbf16>
    %40 = arith.truncf %30 : vector<8x8xf32> to vector<8x8xbf16>
    %cst_30 = arith.constant dense<0.000000e+00> : vector<8x8xf32>
    %41 = tpu.matmul %39, %40, %cst_30 {dimension_numbers = #tpu.dot_dimension_numbers<[1], [1], [0], [0], [0, 0, 1, 0], [], []>} : vector<8x8xbf16>, vector<8x8xbf16>, vector<8x8xf32> -> vector<8x8xf32>
    %cst_31 = arith.constant 0.353553385 : f32
    %42 = vector.broadcast %cst_31 : f32 to vector<8x8xf32>
    %43 = arith.mulf %41, %42 : vector<8x8xf32>
    %cst_32 = arith.constant -1.000000e+09 : f32
    %44 = vector.broadcast %cst_32 : f32 to vector<8x8xf32>
    %45 = arith.select %10, %43, %44 : vector<8x8xi1>, vector<8x8xf32>
    %cst_33 = arith.constant dense<0xFF800000> : vector<8xf32>
    %46 = vector.multi_reduction <maximumf>, %45, %cst_33 [1] : vector<8x8xf32> to vector<8xf32>
    %47 = vector.shape_cast %46 : vector<8xf32> to vector<8x1xf32>
    %48 = vector.broadcast %47 : vector<8x1xf32> to vector<8x8xf32>
    %49 = arith.subf %45, %48 : vector<8x8xf32>
    %50 = math.exp %49 : vector<8x8xf32>
    %cst_34 = arith.constant dense<0.000000e+00> : vector<8xf32>
    %51 = vector.multi_reduction <add>, %50, %cst_34 [1] : vector<8x8xf32> to vector<8xf32>
    %52 = vector.shape_cast %51 : vector<8xf32> to vector<8x1xf32>
    %53 = vector.broadcast %52 : vector<8x1xf32> to vector<8x8xf32>
    %54 = arith.divf %50, %53 : vector<8x8xf32>
    %55 = arith.truncf %54 : vector<8x8xf32> to vector<8x8xbf16>
    %56 = arith.truncf %38 : vector<8x8xf32> to vector<8x8xbf16>
    %cst_35 = arith.constant dense<0.000000e+00> : vector<8x8xf32>
    %57 = tpu.matmul %55, %56, %cst_35 {dimension_numbers = #tpu.dot_dimension_numbers<[1], [0], [0], [1], [0, 0, 1, 1], [], []>} : vector<8x8xbf16>, vector<8x8xbf16>, vector<8x8xf32> -> vector<8x8xf32>
    %58 = arith.truncf %57 : vector<8x8xf32> to vector<8x8xbf16>
    %c0_36 = arith.constant 0 : index
    %c0_37 = arith.constant 0 : index
    %c0_38 = arith.constant 0 : index
    %59 = vector.load %arg6[%c0_36, %c0_37, %c0_38] : memref<4x8x32xf32, #tpu.memory_space<vmem>>, vector<1x8x32xf32>
    %60 = vector.shape_cast %59 : vector<1x8x32xf32> to vector<8x32xf32>
    %61 = arith.truncf %60 : vector<8x32xf32> to vector<8x32xbf16>
    %cst_39 = arith.constant dense<0.000000e+00> : vector<8x32xf32>
    %62 = tpu.matmul %58, %61, %cst_39 {dimension_numbers = #tpu.dot_dimension_numbers<[1], [0], [0], [1], [0, 0, 1, 1], [], []>} : vector<8x8xbf16>, vector<8x32xbf16>, vector<8x32xf32> -> vector<8x32xf32>
    %63 = arith.addf %14, %62 : vector<8x32xf32>
    %c1 = arith.constant 1 : index
    %c0_40 = arith.constant 0 : index
    %c0_41 = arith.constant 0 : index
    %64 = vector.load %arg4[%c1, %c0_40, %c0_41] : memref<12x32x8xf32, #tpu.memory_space<vmem>>, vector<1x32x8xf32>
    %65 = vector.shape_cast %64 : vector<1x32x8xf32> to vector<32x8xf32>
    %66 = arith.truncf %65 : vector<32x8xf32> to vector<32x8xbf16>
    %cst_42 = arith.constant dense<0.000000e+00> : vector<8x8xf32>
    %67 = tpu.matmul %12, %66, %cst_42 {dimension_numbers = #tpu.dot_dimension_numbers<[1], [0], [0], [1], [0, 0, 1, 1], [], []>} : vector<8x32xbf16>, vector<32x8xbf16>, vector<8x8xf32> -> vector<8x8xf32>
    %c1_43 = arith.constant 1 : index
    %c0_44 = arith.constant 0 : index
    %c0_45 = arith.constant 0 : index
    %68 = vector.load %arg5[%c1_43, %c0_44, %c0_45] : memref<12x1x8xf32, #tpu.memory_space<vmem>>, vector<1x1x8xf32>
    %69 = vector.shape_cast %68 : vector<1x1x8xf32> to vector<1x8xf32>
    %70 = vector.broadcast %69 : vector<1x8xf32> to vector<8x8xf32>
    %71 = arith.addf %67, %70 : vector<8x8xf32>
    %c5 = arith.constant 5 : index
    %c0_46 = arith.constant 0 : index
    %c0_47 = arith.constant 0 : index
    %72 = vector.load %arg4[%c5, %c0_46, %c0_47] : memref<12x32x8xf32, #tpu.memory_space<vmem>>, vector<1x32x8xf32>
    %73 = vector.shape_cast %72 : vector<1x32x8xf32> to vector<32x8xf32>
    %74 = arith.truncf %73 : vector<32x8xf32> to vector<32x8xbf16>
    %cst_48 = arith.constant dense<0.000000e+00> : vector<8x8xf32>
    %75 = tpu.matmul %13, %74, %cst_48 {dimension_numbers = #tpu.dot_dimension_numbers<[1], [0], [0], [1], [0, 0, 1, 1], [], []>} : vector<8x32xbf16>, vector<32x8xbf16>, vector<8x8xf32> -> vector<8x8xf32>
    %c5_49 = arith.constant 5 : index
    %c0_50 = arith.constant 0 : index
    %c0_51 = arith.constant 0 : index
    %76 = vector.load %arg5[%c5_49, %c0_50, %c0_51] : memref<12x1x8xf32, #tpu.memory_space<vmem>>, vector<1x1x8xf32>
    %77 = vector.shape_cast %76 : vector<1x1x8xf32> to vector<1x8xf32>
    %78 = vector.broadcast %77 : vector<1x8xf32> to vector<8x8xf32>
    %79 = arith.addf %75, %78 : vector<8x8xf32>
    %c9 = arith.constant 9 : index
    %c0_52 = arith.constant 0 : index
    %c0_53 = arith.constant 0 : index
    %80 = vector.load %arg4[%c9, %c0_52, %c0_53] : memref<12x32x8xf32, #tpu.memory_space<vmem>>, vector<1x32x8xf32>
    %81 = vector.shape_cast %80 : vector<1x32x8xf32> to vector<32x8xf32>
    %82 = arith.truncf %81 : vector<32x8xf32> to vector<32x8xbf16>
    %cst_54 = arith.constant dense<0.000000e+00> : vector<8x8xf32>
    %83 = tpu.matmul %13, %82, %cst_54 {dimension_numbers = #tpu.dot_dimension_numbers<[1], [0], [0], [1], [0, 0, 1, 1], [], []>} : vector<8x32xbf16>, vector<32x8xbf16>, vector<8x8xf32> -> vector<8x8xf32>
    %c9_55 = arith.constant 9 : index
    %c0_56 = arith.constant 0 : index
    %c0_57 = arith.constant 0 : index
    %84 = vector.load %arg5[%c9_55, %c0_56, %c0_57] : memref<12x1x8xf32, #tpu.memory_space<vmem>>, vector<1x1x8xf32>
    %85 = vector.shape_cast %84 : vector<1x1x8xf32> to vector<1x8xf32>
    %86 = vector.broadcast %85 : vector<1x8xf32> to vector<8x8xf32>
    %87 = arith.addf %83, %86 : vector<8x8xf32>
    %88 = arith.truncf %71 : vector<8x8xf32> to vector<8x8xbf16>
    %89 = arith.truncf %79 : vector<8x8xf32> to vector<8x8xbf16>
    %cst_58 = arith.constant dense<0.000000e+00> : vector<8x8xf32>
    %90 = tpu.matmul %88, %89, %cst_58 {dimension_numbers = #tpu.dot_dimension_numbers<[1], [1], [0], [0], [0, 0, 1, 0], [], []>} : vector<8x8xbf16>, vector<8x8xbf16>, vector<8x8xf32> -> vector<8x8xf32>
    %cst_59 = arith.constant 0.353553385 : f32
    %91 = vector.broadcast %cst_59 : f32 to vector<8x8xf32>
    %92 = arith.mulf %90, %91 : vector<8x8xf32>
    %cst_60 = arith.constant -1.000000e+09 : f32
    %93 = vector.broadcast %cst_60 : f32 to vector<8x8xf32>
    %94 = arith.select %10, %92, %93 : vector<8x8xi1>, vector<8x8xf32>
    %cst_61 = arith.constant dense<0xFF800000> : vector<8xf32>
    %95 = vector.multi_reduction <maximumf>, %94, %cst_61 [1] : vector<8x8xf32> to vector<8xf32>
    %96 = vector.shape_cast %95 : vector<8xf32> to vector<8x1xf32>
    %97 = vector.broadcast %96 : vector<8x1xf32> to vector<8x8xf32>
    %98 = arith.subf %94, %97 : vector<8x8xf32>
    %99 = math.exp %98 : vector<8x8xf32>
    %cst_62 = arith.constant dense<0.000000e+00> : vector<8xf32>
    %100 = vector.multi_reduction <add>, %99, %cst_62 [1] : vector<8x8xf32> to vector<8xf32>
    %101 = vector.shape_cast %100 : vector<8xf32> to vector<8x1xf32>
    %102 = vector.broadcast %101 : vector<8x1xf32> to vector<8x8xf32>
    %103 = arith.divf %99, %102 : vector<8x8xf32>
    %104 = arith.truncf %103 : vector<8x8xf32> to vector<8x8xbf16>
    %105 = arith.truncf %87 : vector<8x8xf32> to vector<8x8xbf16>
    %cst_63 = arith.constant dense<0.000000e+00> : vector<8x8xf32>
    %106 = tpu.matmul %104, %105, %cst_63 {dimension_numbers = #tpu.dot_dimension_numbers<[1], [0], [0], [1], [0, 0, 1, 1], [], []>} : vector<8x8xbf16>, vector<8x8xbf16>, vector<8x8xf32> -> vector<8x8xf32>
    %107 = arith.truncf %106 : vector<8x8xf32> to vector<8x8xbf16>
    %c1_64 = arith.constant 1 : index
    %c0_65 = arith.constant 0 : index
    %c0_66 = arith.constant 0 : index
    %108 = vector.load %arg6[%c1_64, %c0_65, %c0_66] : memref<4x8x32xf32, #tpu.memory_space<vmem>>, vector<1x8x32xf32>
    %109 = vector.shape_cast %108 : vector<1x8x32xf32> to vector<8x32xf32>
    %110 = arith.truncf %109 : vector<8x32xf32> to vector<8x32xbf16>
    %cst_67 = arith.constant dense<0.000000e+00> : vector<8x32xf32>
    %111 = tpu.matmul %107, %110, %cst_67 {dimension_numbers = #tpu.dot_dimension_numbers<[1], [0], [0], [1], [0, 0, 1, 1], [], []>} : vector<8x8xbf16>, vector<8x32xbf16>, vector<8x32xf32> -> vector<8x32xf32>
    %112 = arith.addf %63, %111 : vector<8x32xf32>
    %c2 = arith.constant 2 : index
    %c0_68 = arith.constant 0 : index
    %c0_69 = arith.constant 0 : index
    %113 = vector.load %arg4[%c2, %c0_68, %c0_69] : memref<12x32x8xf32, #tpu.memory_space<vmem>>, vector<1x32x8xf32>
    %114 = vector.shape_cast %113 : vector<1x32x8xf32> to vector<32x8xf32>
    %115 = arith.truncf %114 : vector<32x8xf32> to vector<32x8xbf16>
    %cst_70 = arith.constant dense<0.000000e+00> : vector<8x8xf32>
    %116 = tpu.matmul %12, %115, %cst_70 {dimension_numbers = #tpu.dot_dimension_numbers<[1], [0], [0], [1], [0, 0, 1, 1], [], []>} : vector<8x32xbf16>, vector<32x8xbf16>, vector<8x8xf32> -> vector<8x8xf32>
    %c2_71 = arith.constant 2 : index
    %c0_72 = arith.constant 0 : index
    %c0_73 = arith.constant 0 : index
    %117 = vector.load %arg5[%c2_71, %c0_72, %c0_73] : memref<12x1x8xf32, #tpu.memory_space<vmem>>, vector<1x1x8xf32>
    %118 = vector.shape_cast %117 : vector<1x1x8xf32> to vector<1x8xf32>
    %119 = vector.broadcast %118 : vector<1x8xf32> to vector<8x8xf32>
    %120 = arith.addf %116, %119 : vector<8x8xf32>
    %c6 = arith.constant 6 : index
    %c0_74 = arith.constant 0 : index
    %c0_75 = arith.constant 0 : index
    %121 = vector.load %arg4[%c6, %c0_74, %c0_75] : memref<12x32x8xf32, #tpu.memory_space<vmem>>, vector<1x32x8xf32>
    %122 = vector.shape_cast %121 : vector<1x32x8xf32> to vector<32x8xf32>
    %123 = arith.truncf %122 : vector<32x8xf32> to vector<32x8xbf16>
    %cst_76 = arith.constant dense<0.000000e+00> : vector<8x8xf32>
    %124 = tpu.matmul %13, %123, %cst_76 {dimension_numbers = #tpu.dot_dimension_numbers<[1], [0], [0], [1], [0, 0, 1, 1], [], []>} : vector<8x32xbf16>, vector<32x8xbf16>, vector<8x8xf32> -> vector<8x8xf32>
    %c6_77 = arith.constant 6 : index
    %c0_78 = arith.constant 0 : index
    %c0_79 = arith.constant 0 : index
    %125 = vector.load %arg5[%c6_77, %c0_78, %c0_79] : memref<12x1x8xf32, #tpu.memory_space<vmem>>, vector<1x1x8xf32>
    %126 = vector.shape_cast %125 : vector<1x1x8xf32> to vector<1x8xf32>
    %127 = vector.broadcast %126 : vector<1x8xf32> to vector<8x8xf32>
    %128 = arith.addf %124, %127 : vector<8x8xf32>
    %c10 = arith.constant 10 : index
    %c0_80 = arith.constant 0 : index
    %c0_81 = arith.constant 0 : index
    %129 = vector.load %arg4[%c10, %c0_80, %c0_81] : memref<12x32x8xf32, #tpu.memory_space<vmem>>, vector<1x32x8xf32>
    %130 = vector.shape_cast %129 : vector<1x32x8xf32> to vector<32x8xf32>
    %131 = arith.truncf %130 : vector<32x8xf32> to vector<32x8xbf16>
    %cst_82 = arith.constant dense<0.000000e+00> : vector<8x8xf32>
    %132 = tpu.matmul %13, %131, %cst_82 {dimension_numbers = #tpu.dot_dimension_numbers<[1], [0], [0], [1], [0, 0, 1, 1], [], []>} : vector<8x32xbf16>, vector<32x8xbf16>, vector<8x8xf32> -> vector<8x8xf32>
    %c10_83 = arith.constant 10 : index
    %c0_84 = arith.constant 0 : index
    %c0_85 = arith.constant 0 : index
    %133 = vector.load %arg5[%c10_83, %c0_84, %c0_85] : memref<12x1x8xf32, #tpu.memory_space<vmem>>, vector<1x1x8xf32>
    %134 = vector.shape_cast %133 : vector<1x1x8xf32> to vector<1x8xf32>
    %135 = vector.broadcast %134 : vector<1x8xf32> to vector<8x8xf32>
    %136 = arith.addf %132, %135 : vector<8x8xf32>
    %137 = arith.truncf %120 : vector<8x8xf32> to vector<8x8xbf16>
    %138 = arith.truncf %128 : vector<8x8xf32> to vector<8x8xbf16>
    %cst_86 = arith.constant dense<0.000000e+00> : vector<8x8xf32>
    %139 = tpu.matmul %137, %138, %cst_86 {dimension_numbers = #tpu.dot_dimension_numbers<[1], [1], [0], [0], [0, 0, 1, 0], [], []>} : vector<8x8xbf16>, vector<8x8xbf16>, vector<8x8xf32> -> vector<8x8xf32>
    %cst_87 = arith.constant 0.353553385 : f32
    %140 = vector.broadcast %cst_87 : f32 to vector<8x8xf32>
    %141 = arith.mulf %139, %140 : vector<8x8xf32>
    %cst_88 = arith.constant -1.000000e+09 : f32
    %142 = vector.broadcast %cst_88 : f32 to vector<8x8xf32>
    %143 = arith.select %10, %141, %142 : vector<8x8xi1>, vector<8x8xf32>
    %cst_89 = arith.constant dense<0xFF800000> : vector<8xf32>
    %144 = vector.multi_reduction <maximumf>, %143, %cst_89 [1] : vector<8x8xf32> to vector<8xf32>
    %145 = vector.shape_cast %144 : vector<8xf32> to vector<8x1xf32>
    %146 = vector.broadcast %145 : vector<8x1xf32> to vector<8x8xf32>
    %147 = arith.subf %143, %146 : vector<8x8xf32>
    %148 = math.exp %147 : vector<8x8xf32>
    %cst_90 = arith.constant dense<0.000000e+00> : vector<8xf32>
    %149 = vector.multi_reduction <add>, %148, %cst_90 [1] : vector<8x8xf32> to vector<8xf32>
    %150 = vector.shape_cast %149 : vector<8xf32> to vector<8x1xf32>
    %151 = vector.broadcast %150 : vector<8x1xf32> to vector<8x8xf32>
    %152 = arith.divf %148, %151 : vector<8x8xf32>
    %153 = arith.truncf %152 : vector<8x8xf32> to vector<8x8xbf16>
    %154 = arith.truncf %136 : vector<8x8xf32> to vector<8x8xbf16>
    %cst_91 = arith.constant dense<0.000000e+00> : vector<8x8xf32>
    %155 = tpu.matmul %153, %154, %cst_91 {dimension_numbers = #tpu.dot_dimension_numbers<[1], [0], [0], [1], [0, 0, 1, 1], [], []>} : vector<8x8xbf16>, vector<8x8xbf16>, vector<8x8xf32> -> vector<8x8xf32>
    %156 = arith.truncf %155 : vector<8x8xf32> to vector<8x8xbf16>
    %c2_92 = arith.constant 2 : index
    %c0_93 = arith.constant 0 : index
    %c0_94 = arith.constant 0 : index
    %157 = vector.load %arg6[%c2_92, %c0_93, %c0_94] : memref<4x8x32xf32, #tpu.memory_space<vmem>>, vector<1x8x32xf32>
    %158 = vector.shape_cast %157 : vector<1x8x32xf32> to vector<8x32xf32>
    %159 = arith.truncf %158 : vector<8x32xf32> to vector<8x32xbf16>
    %cst_95 = arith.constant dense<0.000000e+00> : vector<8x32xf32>
    %160 = tpu.matmul %156, %159, %cst_95 {dimension_numbers = #tpu.dot_dimension_numbers<[1], [0], [0], [1], [0, 0, 1, 1], [], []>} : vector<8x8xbf16>, vector<8x32xbf16>, vector<8x32xf32> -> vector<8x32xf32>
    %161 = arith.addf %112, %160 : vector<8x32xf32>
    %c3 = arith.constant 3 : index
    %c0_96 = arith.constant 0 : index
    %c0_97 = arith.constant 0 : index
    %162 = vector.load %arg4[%c3, %c0_96, %c0_97] : memref<12x32x8xf32, #tpu.memory_space<vmem>>, vector<1x32x8xf32>
    %163 = vector.shape_cast %162 : vector<1x32x8xf32> to vector<32x8xf32>
    %164 = arith.truncf %163 : vector<32x8xf32> to vector<32x8xbf16>
    %cst_98 = arith.constant dense<0.000000e+00> : vector<8x8xf32>
    %165 = tpu.matmul %12, %164, %cst_98 {dimension_numbers = #tpu.dot_dimension_numbers<[1], [0], [0], [1], [0, 0, 1, 1], [], []>} : vector<8x32xbf16>, vector<32x8xbf16>, vector<8x8xf32> -> vector<8x8xf32>
    %c3_99 = arith.constant 3 : index
    %c0_100 = arith.constant 0 : index
    %c0_101 = arith.constant 0 : index
    %166 = vector.load %arg5[%c3_99, %c0_100, %c0_101] : memref<12x1x8xf32, #tpu.memory_space<vmem>>, vector<1x1x8xf32>
    %167 = vector.shape_cast %166 : vector<1x1x8xf32> to vector<1x8xf32>
    %168 = vector.broadcast %167 : vector<1x8xf32> to vector<8x8xf32>
    %169 = arith.addf %165, %168 : vector<8x8xf32>
    %c7 = arith.constant 7 : index
    %c0_102 = arith.constant 0 : index
    %c0_103 = arith.constant 0 : index
    %170 = vector.load %arg4[%c7, %c0_102, %c0_103] : memref<12x32x8xf32, #tpu.memory_space<vmem>>, vector<1x32x8xf32>
    %171 = vector.shape_cast %170 : vector<1x32x8xf32> to vector<32x8xf32>
    %172 = arith.truncf %171 : vector<32x8xf32> to vector<32x8xbf16>
    %cst_104 = arith.constant dense<0.000000e+00> : vector<8x8xf32>
    %173 = tpu.matmul %13, %172, %cst_104 {dimension_numbers = #tpu.dot_dimension_numbers<[1], [0], [0], [1], [0, 0, 1, 1], [], []>} : vector<8x32xbf16>, vector<32x8xbf16>, vector<8x8xf32> -> vector<8x8xf32>
    %c7_105 = arith.constant 7 : index
    %c0_106 = arith.constant 0 : index
    %c0_107 = arith.constant 0 : index
    %174 = vector.load %arg5[%c7_105, %c0_106, %c0_107] : memref<12x1x8xf32, #tpu.memory_space<vmem>>, vector<1x1x8xf32>
    %175 = vector.shape_cast %174 : vector<1x1x8xf32> to vector<1x8xf32>
    %176 = vector.broadcast %175 : vector<1x8xf32> to vector<8x8xf32>
    %177 = arith.addf %173, %176 : vector<8x8xf32>
    %c11 = arith.constant 11 : index
    %c0_108 = arith.constant 0 : index
    %c0_109 = arith.constant 0 : index
    %178 = vector.load %arg4[%c11, %c0_108, %c0_109] : memref<12x32x8xf32, #tpu.memory_space<vmem>>, vector<1x32x8xf32>
    %179 = vector.shape_cast %178 : vector<1x32x8xf32> to vector<32x8xf32>
    %180 = arith.truncf %179 : vector<32x8xf32> to vector<32x8xbf16>
    %cst_110 = arith.constant dense<0.000000e+00> : vector<8x8xf32>
    %181 = tpu.matmul %13, %180, %cst_110 {dimension_numbers = #tpu.dot_dimension_numbers<[1], [0], [0], [1], [0, 0, 1, 1], [], []>} : vector<8x32xbf16>, vector<32x8xbf16>, vector<8x8xf32> -> vector<8x8xf32>
    %c11_111 = arith.constant 11 : index
    %c0_112 = arith.constant 0 : index
    %c0_113 = arith.constant 0 : index
    %182 = vector.load %arg5[%c11_111, %c0_112, %c0_113] : memref<12x1x8xf32, #tpu.memory_space<vmem>>, vector<1x1x8xf32>
    %183 = vector.shape_cast %182 : vector<1x1x8xf32> to vector<1x8xf32>
    %184 = vector.broadcast %183 : vector<1x8xf32> to vector<8x8xf32>
    %185 = arith.addf %181, %184 : vector<8x8xf32>
    %186 = arith.truncf %169 : vector<8x8xf32> to vector<8x8xbf16>
    %187 = arith.truncf %177 : vector<8x8xf32> to vector<8x8xbf16>
    %cst_114 = arith.constant dense<0.000000e+00> : vector<8x8xf32>
    %188 = tpu.matmul %186, %187, %cst_114 {dimension_numbers = #tpu.dot_dimension_numbers<[1], [1], [0], [0], [0, 0, 1, 0], [], []>} : vector<8x8xbf16>, vector<8x8xbf16>, vector<8x8xf32> -> vector<8x8xf32>
    %cst_115 = arith.constant 0.353553385 : f32
    %189 = vector.broadcast %cst_115 : f32 to vector<8x8xf32>
    %190 = arith.mulf %188, %189 : vector<8x8xf32>
    %cst_116 = arith.constant -1.000000e+09 : f32
    %191 = vector.broadcast %cst_116 : f32 to vector<8x8xf32>
    %192 = arith.select %10, %190, %191 : vector<8x8xi1>, vector<8x8xf32>
    %cst_117 = arith.constant dense<0xFF800000> : vector<8xf32>
    %193 = vector.multi_reduction <maximumf>, %192, %cst_117 [1] : vector<8x8xf32> to vector<8xf32>
    %194 = vector.shape_cast %193 : vector<8xf32> to vector<8x1xf32>
    %195 = vector.broadcast %194 : vector<8x1xf32> to vector<8x8xf32>
    %196 = arith.subf %192, %195 : vector<8x8xf32>
    %197 = math.exp %196 : vector<8x8xf32>
    %cst_118 = arith.constant dense<0.000000e+00> : vector<8xf32>
    %198 = vector.multi_reduction <add>, %197, %cst_118 [1] : vector<8x8xf32> to vector<8xf32>
    %199 = vector.shape_cast %198 : vector<8xf32> to vector<8x1xf32>
    %200 = vector.broadcast %199 : vector<8x1xf32> to vector<8x8xf32>
    %201 = arith.divf %197, %200 : vector<8x8xf32>
    %202 = arith.truncf %201 : vector<8x8xf32> to vector<8x8xbf16>
    %203 = arith.truncf %185 : vector<8x8xf32> to vector<8x8xbf16>
    %cst_119 = arith.constant dense<0.000000e+00> : vector<8x8xf32>
    %204 = tpu.matmul %202, %203, %cst_119 {dimension_numbers = #tpu.dot_dimension_numbers<[1], [0], [0], [1], [0, 0, 1, 1], [], []>} : vector<8x8xbf16>, vector<8x8xbf16>, vector<8x8xf32> -> vector<8x8xf32>
    %205 = arith.truncf %204 : vector<8x8xf32> to vector<8x8xbf16>
    %c3_120 = arith.constant 3 : index
    %c0_121 = arith.constant 0 : index
    %c0_122 = arith.constant 0 : index
    %206 = vector.load %arg6[%c3_120, %c0_121, %c0_122] : memref<4x8x32xf32, #tpu.memory_space<vmem>>, vector<1x8x32xf32>
    %207 = vector.shape_cast %206 : vector<1x8x32xf32> to vector<8x32xf32>
    %208 = arith.truncf %207 : vector<8x32xf32> to vector<8x32xbf16>
    %cst_123 = arith.constant dense<0.000000e+00> : vector<8x32xf32>
    %209 = tpu.matmul %205, %208, %cst_123 {dimension_numbers = #tpu.dot_dimension_numbers<[1], [0], [0], [1], [0, 0, 1, 1], [], []>} : vector<8x8xbf16>, vector<8x32xbf16>, vector<8x32xf32> -> vector<8x32xf32>
    %210 = arith.addf %161, %209 : vector<8x32xf32>
    %211 = vector.broadcast %11 : vector<1x32xf32> to vector<8x32xf32>
    %212 = arith.addf %210, %211 : vector<8x32xf32>
    %213 = arith.addf %212, %1 : vector<8x32xf32>
    %c0_124 = arith.constant 0 : index
    %c0_125 = arith.constant 0 : index
    %214 = vector.load %arg8[%c0_124, %c0_125] : memref<1x32xf32, #tpu.memory_space<vmem>>, vector<1x32xf32>
    %c0_126 = arith.constant 0 : index
    %c0_127 = arith.constant 0 : index
    %215 = vector.load %arg9[%c0_126, %c0_127] : memref<1x32xf32, #tpu.memory_space<vmem>>, vector<1x32xf32>
    %cst_128 = arith.constant dense<0.000000e+00> : vector<8xf32>
    %216 = vector.multi_reduction <add>, %213, %cst_128 [1] : vector<8x32xf32> to vector<8xf32>
    %217 = vector.shape_cast %216 : vector<8xf32> to vector<8x1xf32>
    %cst_129 = arith.constant 3.200000e+01 : f32
    %218 = vector.broadcast %cst_129 : f32 to vector<8x1xf32>
    %219 = arith.divf %217, %218 : vector<8x1xf32>
    %220 = vector.broadcast %219 : vector<8x1xf32> to vector<8x32xf32>
    %221 = arith.subf %213, %220 : vector<8x32xf32>
    %222 = arith.mulf %221, %221 : vector<8x32xf32>
    %cst_130 = arith.constant dense<0.000000e+00> : vector<8xf32>
    %223 = vector.multi_reduction <add>, %222, %cst_130 [1] : vector<8x32xf32> to vector<8xf32>
    %224 = vector.shape_cast %223 : vector<8xf32> to vector<8x1xf32>
    %cst_131 = arith.constant 3.200000e+01 : f32
    %225 = vector.broadcast %cst_131 : f32 to vector<8x1xf32>
    %226 = arith.divf %224, %225 : vector<8x1xf32>
    %227 = vector.broadcast %219 : vector<8x1xf32> to vector<8x32xf32>
    %228 = arith.subf %213, %227 : vector<8x32xf32>
    %cst_132 = arith.constant 9.99999974E-6 : f32
    %229 = vector.broadcast %cst_132 : f32 to vector<8x1xf32>
    %230 = arith.addf %226, %229 : vector<8x1xf32>
    %231 = math.rsqrt %230 : vector<8x1xf32>
    %232 = vector.broadcast %231 : vector<8x1xf32> to vector<8x32xf32>
    %233 = arith.mulf %228, %232 : vector<8x32xf32>
    %234 = vector.broadcast %214 : vector<1x32xf32> to vector<8x32xf32>
    %235 = arith.mulf %233, %234 : vector<8x32xf32>
    %236 = vector.broadcast %215 : vector<1x32xf32> to vector<8x32xf32>
    %237 = arith.addf %235, %236 : vector<8x32xf32>
    %238 = arith.truncf %237 : vector<8x32xf32> to vector<8x32xbf16>
    %c0_133 = arith.constant 0 : index
    %c0_134 = arith.constant 0 : index
    %239 = vector.load %arg10[%c0_133, %c0_134] : memref<32x64xf32, #tpu.memory_space<vmem>>, vector<32x64xf32>
    %240 = arith.truncf %239 : vector<32x64xf32> to vector<32x64xbf16>
    %cst_135 = arith.constant dense<0.000000e+00> : vector<8x64xf32>
    %241 = tpu.matmul %238, %240, %cst_135 {dimension_numbers = #tpu.dot_dimension_numbers<[1], [0], [0], [1], [0, 0, 1, 1], [], []>} : vector<8x32xbf16>, vector<32x64xbf16>, vector<8x64xf32> -> vector<8x64xf32>
    %c0_136 = arith.constant 0 : index
    %c0_137 = arith.constant 0 : index
    %242 = vector.load %arg11[%c0_136, %c0_137] : memref<1x64xf32, #tpu.memory_space<vmem>>, vector<1x64xf32>
    %243 = vector.broadcast %242 : vector<1x64xf32> to vector<8x64xf32>
    %244 = arith.addf %241, %243 : vector<8x64xf32>
    %cst_138 = arith.constant 0.000000e+00 : f32
    %245 = vector.broadcast %cst_138 : f32 to vector<8x64xf32>
    %246 = arith.maximumf %244, %245 : vector<8x64xf32>
    %247 = arith.truncf %246 : vector<8x64xf32> to vector<8x64xbf16>
    %c0_139 = arith.constant 0 : index
    %c0_140 = arith.constant 0 : index
    %248 = vector.load %arg12[%c0_139, %c0_140] : memref<64x32xf32, #tpu.memory_space<vmem>>, vector<64x32xf32>
    %249 = arith.truncf %248 : vector<64x32xf32> to vector<64x32xbf16>
    %cst_141 = arith.constant dense<0.000000e+00> : vector<8x32xf32>
    %250 = tpu.matmul %247, %249, %cst_141 {dimension_numbers = #tpu.dot_dimension_numbers<[1], [0], [0], [1], [0, 0, 1, 1], [], []>} : vector<8x64xbf16>, vector<64x32xbf16>, vector<8x32xf32> -> vector<8x32xf32>
    %c0_142 = arith.constant 0 : index
    %c0_143 = arith.constant 0 : index
    %251 = vector.load %arg13[%c0_142, %c0_143] : memref<1x32xf32, #tpu.memory_space<vmem>>, vector<1x32xf32>
    %252 = vector.broadcast %251 : vector<1x32xf32> to vector<8x32xf32>
    %253 = arith.addf %250, %252 : vector<8x32xf32>
    %254 = arith.addf %253, %237 : vector<8x32xf32>
    %c0_144 = arith.constant 0 : index
    %c0_145 = arith.constant 0 : index
    %255 = vector.load %arg14[%c0_144, %c0_145] : memref<1x32xf32, #tpu.memory_space<vmem>>, vector<1x32xf32>
    %c0_146 = arith.constant 0 : index
    %c0_147 = arith.constant 0 : index
    %256 = vector.load %arg15[%c0_146, %c0_147] : memref<1x32xf32, #tpu.memory_space<vmem>>, vector<1x32xf32>
    %cst_148 = arith.constant dense<0.000000e+00> : vector<8xf32>
    %257 = vector.multi_reduction <add>, %254, %cst_148 [1] : vector<8x32xf32> to vector<8xf32>
    %258 = vector.shape_cast %257 : vector<8xf32> to vector<8x1xf32>
    %cst_149 = arith.constant 3.200000e+01 : f32
    %259 = vector.broadcast %cst_149 : f32 to vector<8x1xf32>
    %260 = arith.divf %258, %259 : vector<8x1xf32>
    %261 = vector.broadcast %260 : vector<8x1xf32> to vector<8x32xf32>
    %262 = arith.subf %254, %261 : vector<8x32xf32>
    %263 = arith.mulf %262, %262 : vector<8x32xf32>
    %cst_150 = arith.constant dense<0.000000e+00> : vector<8xf32>
    %264 = vector.multi_reduction <add>, %263, %cst_150 [1] : vector<8x32xf32> to vector<8xf32>
    %265 = vector.shape_cast %264 : vector<8xf32> to vector<8x1xf32>
    %cst_151 = arith.constant 3.200000e+01 : f32
    %266 = vector.broadcast %cst_151 : f32 to vector<8x1xf32>
    %267 = arith.divf %265, %266 : vector<8x1xf32>
    %268 = vector.broadcast %260 : vector<8x1xf32> to vector<8x32xf32>
    %269 = arith.subf %254, %268 : vector<8x32xf32>
    %cst_152 = arith.constant 9.99999974E-6 : f32
    %270 = vector.broadcast %cst_152 : f32 to vector<8x1xf32>
    %271 = arith.addf %267, %270 : vector<8x1xf32>
    %272 = math.rsqrt %271 : vector<8x1xf32>
    %273 = vector.broadcast %272 : vector<8x1xf32> to vector<8x32xf32>
    %274 = arith.mulf %269, %273 : vector<8x32xf32>
    %275 = vector.broadcast %255 : vector<1x32xf32> to vector<8x32xf32>
    %276 = arith.mulf %274, %275 : vector<8x32xf32>
    %277 = vector.broadcast %256 : vector<1x32xf32> to vector<8x32xf32>
    %278 = arith.addf %276, %277 : vector<8x32xf32>
    %c0_153 = arith.constant 0 : index
    %c0_154 = arith.constant 0 : index
    %c0_155 = arith.constant 0 : index
    %279 = vector.load %arg16[%c0_153, %c0_154, %c0_155] : memref<1x8x32xf32, #tpu.memory_space<vmem>>, vector<1x8x32xf32>
    %280 = vector.shape_cast %279 : vector<1x8x32xf32> to vector<8x32xf32>
    %281 = vector.shape_cast %278 : vector<8x32xf32> to vector<1x8x32xf32>
    tpu.vector_store %arg16[%c0_153, %c0_154, %c0_155], %281 {strides = array<i32>} : memref<1x8x32xf32, #tpu.memory_space<vmem>>, vector<1x8x32xf32>,
    return
  }
  func.func @transform_0(%arg0: i32) -> (i32, i32, i32) {
    %c0_i32 = arith.constant 0 : i32
    %c0_i32_0 = arith.constant 0 : i32
    %c0_i32_1 = arith.constant 0 : i32
    return %arg0, %c0_i32, %c0_i32_0 : i32, i32, i32
  }
  func.func @transform_1(%arg0: i32) -> (i32, i32, i32) {
    %c0_i32 = arith.constant 0 : i32
    %c0_i32_0 = arith.constant 0 : i32
    %c0_i32_1 = arith.constant 0 : i32
    return %arg0, %c0_i32, %c0_i32_0 : i32, i32, i32
  }
  func.func @transform_2(%arg0: i32) -> (i32, i32, i32) {
    %c0_i32 = arith.constant 0 : i32
    %c0_i32_0 = arith.constant 0 : i32
    %c0_i32_1 = arith.constant 0 : i32
    return %arg0, %c0_i32, %c0_i32_0 : i32, i32, i32
  }
  func.func @transform_3(%arg0: i32) -> (i32, i32, i32) {
    %c0_i32 = arith.constant 0 : i32
    %c0_i32_0 = arith.constant 0 : i32
    %c0_i32_1 = arith.constant 0 : i32
    %c0_i32_2 = arith.constant 0 : i32
    return %c0_i32, %c0_i32_0, %c0_i32_1 : i32, i32, i32
  }
  func.func @transform_4(%arg0: i32) -> (i32, i32, i32) {
    %c0_i32 = arith.constant 0 : i32
    %c0_i32_0 = arith.constant 0 : i32
    %c0_i32_1 = arith.constant 0 : i32
    %c0_i32_2 = arith.constant 0 : i32
    return %c0_i32, %c0_i32_0, %c0_i32_1 : i32, i32, i32
  }
  func.func @transform_5(%arg0: i32) -> (i32, i32, i32) {
    %c0_i32 = arith.constant 0 : i32
    %c0_i32_0 = arith.constant 0 : i32
    %c0_i32_1 = arith.constant 0 : i32
    %c0_i32_2 = arith.constant 0 : i32
    return %c0_i32, %c0_i32_0, %c0_i32_1 : i32, i32, i32
  }
  func.func @transform_6(%arg0: i32) -> (i32, i32) {
    %c0_i32 = arith.constant 0 : i32
    %c0_i32_0 = arith.constant 0 : i32
    %c0_i32_1 = arith.constant 0 : i32
    return %c0_i32, %c0_i32_0 : i32, i32
  }
  func.func @transform_7(%arg0: i32) -> (i32, i32) {
    %c0_i32 = arith.constant 0 : i32
    %c0_i32_0 = arith.constant 0 : i32
    %c0_i32_1 = arith.constant 0 : i32
    return %c0_i32, %c0_i32_0 : i32, i32
  }
  func.func @transform_8(%arg0: i32) -> (i32, i32) {
    %c0_i32 = arith.constant 0 : i32
    %c0_i32_0 = arith.constant 0 : i32
    %c0_i32_1 = arith.constant 0 : i32
    return %c0_i32, %c0_i32_0 : i32, i32
  }
  func.func @transform_9(%arg0: i32) -> (i32, i32) {
    %c0_i32 = arith.constant 0 : i32
    %c0_i32_0 = arith.constant 0 : i32
    %c0_i32_1 = arith.constant 0 : i32
    return %c0_i32, %c0_i32_0 : i32, i32
  }
  func.func @transform_10(%arg0: i32) -> (i32, i32) {
    %c0_i32 = arith.constant 0 : i32
    %c0_i32_0 = arith.constant 0 : i32
    %c0_i32_1 = arith.constant 0 : i32
    return %c0_i32, %c0_i32_0 : i32, i32
  }
  func.func @transform_11(%arg0: i32) -> (i32, i32) {
    %c0_i32 = arith.constant 0 : i32
    %c0_i32_0 = arith.constant 0 : i32
    %c0_i32_1 = arith.constant 0 : i32
    return %c0_i32, %c0_i32_0 : i32, i32
  }
  func.func @transform_12(%arg0: i32) -> (i32, i32) {
    %c0_i32 = arith.constant 0 : i32
    %c0_i32_0 = arith.constant 0 : i32
    %c0_i32_1 = arith.constant 0 : i32
    return %c0_i32, %c0_i32_0 : i32, i32
  }
  func.func @transform_13(%arg0: i32) -> (i32, i32) {
    %c0_i32 = arith.constant 0 : i32
    %c0_i32_0 = arith.constant 0 : i32
    %c0_i32_1 = arith.constant 0 : i32
    return %c0_i32, %c0_i32_0 : i32, i32
  }
  func.func @transform_14(%arg0: i32) -> (i32, i32) {
    %c0_i32 = arith.constant 0 : i32
    %c0_i32_0 = arith.constant 0 : i32
    %c0_i32_1 = arith.constant 0 : i32
    return %c0_i32, %c0_i32_0 : i32, i32
  }
  func.func @transform_15(%arg0: i32) -> (i32, i32, i32) {
    %c0_i32 = arith.constant 0 : i32
    %c0_i32_0 = arith.constant 0 : i32
    %c0_i32_1 = arith.constant 0 : i32
    return %arg0, %c0_i32, %c0_i32_0 : i32, i32, i32
  }
}

module attributes {stable_mosaic.version = 11 : i64} {
  func.func @_linear_kernel(%arg0: i32, %arg1: i32, %arg2: memref<16x32xf32, #tpu.memory_space<vmem>>, %arg3: memref<32x60xf32, #tpu.memory_space<vmem>>, %arg4: memref<1x60xf32, #tpu.memory_space<vmem>>, %arg5: memref<16x60xf32, #tpu.memory_space<vmem>>) attributes {dimension_semantics = [#tpu.dimension_semantics<parallel>, #tpu.dimension_semantics<parallel>], iteration_bounds = array<i64: 1, 1>, scalar_prefetch = 0 : i64, scratch_operands = 0 : i64, tpu.core_type = #tpu.core_type<tc>, window_params = [{transform_indices = @transform_0, window_bounds = array<i64: 16, 32>}, {transform_indices = @transform_1, window_bounds = array<i64: 32, 60>}, {transform_indices = @transform_2, window_bounds = array<i64: 1, 60>}, {transform_indices = @transform_3, window_bounds = array<i64: 16, 60>}]} {
    %c0 = arith.constant 0 : index
    %c0_0 = arith.constant 0 : index
    %0 = vector.load %arg2[%c0, %c0_0] : memref<16x32xf32, #tpu.memory_space<vmem>>, vector<16x32xf32>
    %1 = arith.truncf %0 : vector<16x32xf32> to vector<16x32xbf16>
    %c0_1 = arith.constant 0 : index
    %c0_2 = arith.constant 0 : index
    %2 = vector.load %arg3[%c0_1, %c0_2] : memref<32x60xf32, #tpu.memory_space<vmem>>, vector<32x60xf32>
    %3 = arith.truncf %2 : vector<32x60xf32> to vector<32x60xbf16>
    %cst = arith.constant dense<0.000000e+00> : vector<16x60xf32>
    %4 = tpu.matmul %1, %3, %cst {dimension_numbers = #tpu.dot_dimension_numbers<[1], [0], [0], [1], [0, 0, 1, 1], [], []>} : vector<16x32xbf16>, vector<32x60xbf16>, vector<16x60xf32> -> vector<16x60xf32>
    %c0_3 = arith.constant 0 : index
    %c0_4 = arith.constant 0 : index
    %5 = vector.load %arg4[%c0_3, %c0_4] : memref<1x60xf32, #tpu.memory_space<vmem>>, vector<1x60xf32>
    %6 = vector.broadcast %5 : vector<1x60xf32> to vector<16x60xf32>
    %7 = arith.addf %4, %6 : vector<16x60xf32>
    %c0_5 = arith.constant 0 : index
    %c0_6 = arith.constant 0 : index
    %8 = vector.load %arg5[%c0_5, %c0_6] : memref<16x60xf32, #tpu.memory_space<vmem>>, vector<16x60xf32>
    tpu.vector_store %arg5[%c0_5, %c0_6], %7 {strides = array<i32>} : memref<16x60xf32, #tpu.memory_space<vmem>>, vector<16x60xf32>,
    return
  }
  func.func @transform_0(%arg0: i32, %arg1: i32) -> (i32, i32) {
    %c0_i32 = arith.constant 0 : i32
    %c0_i32_0 = arith.constant 0 : i32
    return %arg0, %c0_i32 : i32, i32
  }
  func.func @transform_1(%arg0: i32, %arg1: i32) -> (i32, i32) {
    %c0_i32 = arith.constant 0 : i32
    %c0_i32_0 = arith.constant 0 : i32
    return %c0_i32, %arg1 : i32, i32
  }
  func.func @transform_2(%arg0: i32, %arg1: i32) -> (i32, i32) {
    %c0_i32 = arith.constant 0 : i32
    %c0_i32_0 = arith.constant 0 : i32
    return %c0_i32, %arg1 : i32, i32
  }
  func.func @transform_3(%arg0: i32, %arg1: i32) -> (i32, i32) {
    %c0_i32 = arith.constant 0 : i32
    return %arg0, %arg1 : i32, i32
  }
}

module attributes {stable_mosaic.version = 11 : i64} {
  func.func @_dec_layer_kernel(%arg0: i32, %arg1: memref<1x8x32xf32, #tpu.memory_space<vmem>>, %arg2: memref<1x8x32xf32, #tpu.memory_space<vmem>>, %arg3: memref<1x1x8xf32, #tpu.memory_space<vmem>>, %arg4: memref<1x8x1xf32, #tpu.memory_space<vmem>>, %arg5: memref<1x1x8xf32, #tpu.memory_space<vmem>>, %arg6: memref<12x32x8xf32, #tpu.memory_space<vmem>>, %arg7: memref<12x1x8xf32, #tpu.memory_space<vmem>>, %arg8: memref<4x8x32xf32, #tpu.memory_space<vmem>>, %arg9: memref<1x32xf32, #tpu.memory_space<vmem>>, %arg10: memref<1x32xf32, #tpu.memory_space<vmem>>, %arg11: memref<1x32xf32, #tpu.memory_space<vmem>>, %arg12: memref<4x32x8xf32, #tpu.memory_space<vmem>>, %arg13: memref<4x1x8xf32, #tpu.memory_space<vmem>>, %arg14: memref<8x32x8xf32, #tpu.memory_space<vmem>>, %arg15: memref<8x1x8xf32, #tpu.memory_space<vmem>>, %arg16: memref<4x8x32xf32, #tpu.memory_space<vmem>>, %arg17: memref<1x32xf32, #tpu.memory_space<vmem>>, %arg18: memref<1x32xf32, #tpu.memory_space<vmem>>, %arg19: memref<1x32xf32, #tpu.memory_space<vmem>>, %arg20: memref<32x64xf32, #tpu.memory_space<vmem>>, %arg21: memref<1x64xf32, #tpu.memory_space<vmem>>, %arg22: memref<64x32xf32, #tpu.memory_space<vmem>>, %arg23: memref<1x32xf32, #tpu.memory_space<vmem>>, %arg24: memref<1x32xf32, #tpu.memory_space<vmem>>, %arg25: memref<1x32xf32, #tpu.memory_space<vmem>>, %arg26: memref<1x8x32xf32, #tpu.memory_space<vmem>>) attributes {dimension_semantics = [#tpu.dimension_semantics<parallel>], iteration_bounds = array<i64: 2>, scalar_prefetch = 0 : i64, scratch_operands = 0 : i64, tpu.core_type = #tpu.core_type<tc>, window_params = [{transform_indices = @transform_0, window_bounds = array<i64: 1, 8, 32>}, {transform_indices = @transform_1, window_bounds = array<i64: 1, 8, 32>}, {transform_indices = @transform_2, window_bounds = array<i64: 1, 1, 8>}, {transform_indices = @transform_3, window_bounds = array<i64: 1, 8, 1>}, {transform_indices = @transform_4, window_bounds = array<i64: 1, 1, 8>}, {pipeline_mode = #tpu.pipeline_mode<synchronous>, transform_indices = @transform_5, window_bounds = array<i64: 12, 32, 8>}, {pipeline_mode = #tpu.pipeline_mode<synchronous>, transform_indices = @transform_6, window_bounds = array<i64: 12, 1, 8>}, {pipeline_mode = #tpu.pipeline_mode<synchronous>, transform_indices = @transform_7, window_bounds = array<i64: 4, 8, 32>}, {pipeline_mode = #tpu.pipeline_mode<synchronous>, transform_indices = @transform_8, window_bounds = array<i64: 1, 32>}, {pipeline_mode = #tpu.pipeline_mode<synchronous>, transform_indices = @transform_9, window_bounds = array<i64: 1, 32>}, {pipeline_mode = #tpu.pipeline_mode<synchronous>, transform_indices = @transform_10, window_bounds = array<i64: 1, 32>}, {pipeline_mode = #tpu.pipeline_mode<synchronous>, transform_indices = @transform_11, window_bounds = array<i64: 4, 32, 8>}, {pipeline_mode = #tpu.pipeline_mode<synchronous>, transform_indices = @transform_12, window_bounds = array<i64: 4, 1, 8>}, {pipeline_mode = #tpu.pipeline_mode<synchronous>, transform_indices = @transform_13, window_bounds = array<i64: 8, 32, 8>}, {pipeline_mode = #tpu.pipeline_mode<synchronous>, transform_indices = @transform_14, window_bounds = array<i64: 8, 1, 8>}, {pipeline_mode = #tpu.pipeline_mode<synchronous>, transform_indices = @transform_15, window_bounds = array<i64: 4, 8, 32>}, {pipeline_mode = #tpu.pipeline_mode<synchronous>, transform_indices = @transform_16, window_bounds = array<i64: 1, 32>}, {pipeline_mode = #tpu.pipeline_mode<synchronous>, transform_indices = @transform_17, window_bounds = array<i64: 1, 32>}, {pipeline_mode = #tpu.pipeline_mode<synchronous>, transform_indices = @transform_18, window_bounds = array<i64: 1, 32>}, {pipeline_mode = #tpu.pipeline_mode<synchronous>, transform_indices = @transform_19, window_bounds = array<i64: 32, 64>}, {pipeline_mode = #tpu.pipeline_mode<synchronous>, transform_indices = @transform_20, window_bounds = array<i64: 1, 64>}, {pipeline_mode = #tpu.pipeline_mode<synchronous>, transform_indices = @transform_21, window_bounds = array<i64: 64, 32>}, {pipeline_mode = #tpu.pipeline_mode<synchronous>, transform_indices = @transform_22, window_bounds = array<i64: 1, 32>}, {pipeline_mode = #tpu.pipeline_mode<synchronous>, transform_indices = @transform_23, window_bounds = array<i64: 1, 32>}, {pipeline_mode = #tpu.pipeline_mode<synchronous>, transform_indices = @transform_24, window_bounds = array<i64: 1, 32>}, {transform_indices = @transform_25, window_bounds = array<i64: 1, 8, 32>}]} {
    %c0 = arith.constant 0 : index
    %c0_0 = arith.constant 0 : index
    %c0_1 = arith.constant 0 : index
    %0 = vector.load %arg1[%c0, %c0_0, %c0_1] : memref<1x8x32xf32, #tpu.memory_space<vmem>>, vector<1x8x32xf32>
    %1 = vector.shape_cast %0 : vector<1x8x32xf32> to vector<8x32xf32>
    %c0_2 = arith.constant 0 : index
    %c0_3 = arith.constant 0 : index
    %c0_4 = arith.constant 0 : index
    %2 = vector.load %arg2[%c0_2, %c0_3, %c0_4] : memref<1x8x32xf32, #tpu.memory_space<vmem>>, vector<1x8x32xf32>
    %3 = vector.shape_cast %2 : vector<1x8x32xf32> to vector<8x32xf32>
    %4 = tpu.iota {dimensions = array<i32: 0>} : vector<8x8xi32>
    %5 = tpu.iota {dimensions = array<i32: 1>} : vector<8x8xi32>
    %c0_5 = arith.constant 0 : index
    %c0_6 = arith.constant 0 : index
    %c0_7 = arith.constant 0 : index
    %6 = vector.load %arg3[%c0_5, %c0_6, %c0_7] : memref<1x1x8xf32, #tpu.memory_space<vmem>>, vector<1x1x8xf32>
    %7 = vector.shape_cast %6 : vector<1x1x8xf32> to vector<1x8xf32>
    %cst = arith.constant 0.000000e+00 : f32
    %8 = vector.broadcast %cst : f32 to vector<1x8xf32>
    %9 = arith.cmpf ogt, %7, %8 : vector<1x8xf32>
    %10 = arith.cmpi sle, %5, %4 : vector<8x8xi32>
    %11 = vector.broadcast %9 : vector<1x8xi1> to vector<8x8xi1>
    %12 = arith.andi %11, %10 : vector<8x8xi1>
    %c0_8 = arith.constant 0 : index
    %c0_9 = arith.constant 0 : index
    %c0_10 = arith.constant 0 : index
    %13 = vector.load %arg4[%c0_8, %c0_9, %c0_10] : memref<1x8x1xf32, #tpu.memory_space<vmem>>, vector<1x8x1xf32>
    %14 = vector.shape_cast %13 : vector<1x8x1xf32> to vector<8x1xf32>
    %c0_11 = arith.constant 0 : index
    %c0_12 = arith.constant 0 : index
    %c0_13 = arith.constant 0 : index
    %15 = vector.load %arg5[%c0_11, %c0_12, %c0_13] : memref<1x1x8xf32, #tpu.memory_space<vmem>>, vector<1x1x8xf32>
    %16 = vector.shape_cast %15 : vector<1x1x8xf32> to vector<1x8xf32>
    %17 = vector.broadcast %14 : vector<8x1xf32> to vector<8x8xf32>
    %18 = vector.broadcast %16 : vector<1x8xf32> to vector<8x8xf32>
    %19 = arith.mulf %17, %18 : vector<8x8xf32>
    %cst_14 = arith.constant 0.000000e+00 : f32
    %20 = vector.broadcast %cst_14 : f32 to vector<8x8xf32>
    %21 = arith.cmpf ogt, %19, %20 : vector<8x8xf32>
    %c0_15 = arith.constant 0 : index
    %c0_16 = arith.constant 0 : index
    %22 = vector.load %arg9[%c0_15, %c0_16] : memref<1x32xf32, #tpu.memory_space<vmem>>, vector<1x32xf32>
    %23 = arith.truncf %1 : vector<8x32xf32> to vector<8x32xbf16>
    %24 = arith.truncf %1 : vector<8x32xf32> to vector<8x32xbf16>
    %cst_17 = arith.constant 0.000000e+00 : f32
    %25 = vector.broadcast %cst_17 : f32 to vector<8x32xf32>
    %c0_18 = arith.constant 0 : index
    %c0_19 = arith.constant 0 : index
    %c0_20 = arith.constant 0 : index
    %26 = vector.load %arg6[%c0_18, %c0_19, %c0_20] : memref<12x32x8xf32, #tpu.memory_space<vmem>>, vector<1x32x8xf32>
    %27 = vector.shape_cast %26 : vector<1x32x8xf32> to vector<32x8xf32>
    %28 = arith.truncf %27 : vector<32x8xf32> to vector<32x8xbf16>
    %cst_21 = arith.constant dense<0.000000e+00> : vector<8x8xf32>
    %29 = tpu.matmul %23, %28, %cst_21 {dimension_numbers = #tpu.dot_dimension_numbers<[1], [0], [0], [1], [0, 0, 1, 1], [], []>} : vector<8x32xbf16>, vector<32x8xbf16>, vector<8x8xf32> -> vector<8x8xf32>
    %c0_22 = arith.constant 0 : index
    %c0_23 = arith.constant 0 : index
    %c0_24 = arith.constant 0 : index
    %30 = vector.load %arg7[%c0_22, %c0_23, %c0_24] : memref<12x1x8xf32, #tpu.memory_space<vmem>>, vector<1x1x8xf32>
    %31 = vector.shape_cast %30 : vector<1x1x8xf32> to vector<1x8xf32>
    %32 = vector.broadcast %31 : vector<1x8xf32> to vector<8x8xf32>
    %33 = arith.addf %29, %32 : vector<8x8xf32>
    %c4 = arith.constant 4 : index
    %c0_25 = arith.constant 0 : index
    %c0_26 = arith.constant 0 : index
    %34 = vector.load %arg6[%c4, %c0_25, %c0_26] : memref<12x32x8xf32, #tpu.memory_space<vmem>>, vector<1x32x8xf32>
    %35 = vector.shape_cast %34 : vector<1x32x8xf32> to vector<32x8xf32>
    %36 = arith.truncf %35 : vector<32x8xf32> to vector<32x8xbf16>
    %cst_27 = arith.constant dense<0.000000e+00> : vector<8x8xf32>
    %37 = tpu.matmul %24, %36, %cst_27 {dimension_numbers = #tpu.dot_dimension_numbers<[1], [0], [0], [1], [0, 0, 1, 1], [], []>} : vector<8x32xbf16>, vector<32x8xbf16>, vector<8x8xf32> -> vector<8x8xf32>
    %c4_28 = arith.constant 4 : index
    %c0_29 = arith.constant 0 : index
    %c0_30 = arith.constant 0 : index
    %38 = vector.load %arg7[%c4_28, %c0_29, %c0_30] : memref<12x1x8xf32, #tpu.memory_space<vmem>>, vector<1x1x8xf32>
    %39 = vector.shape_cast %38 : vector<1x1x8xf32> to vector<1x8xf32>
    %40 = vector.broadcast %39 : vector<1x8xf32> to vector<8x8xf32>
    %41 = arith.addf %37, %40 : vector<8x8xf32>
    %c8 = arith.constant 8 : index
    %c0_31 = arith.constant 0 : index
    %c0_32 = arith.constant 0 : index
    %42 = vector.load %arg6[%c8, %c0_31, %c0_32] : memref<12x32x8xf32, #tpu.memory_space<vmem>>, vector<1x32x8xf32>
    %43 = vector.shape_cast %42 : vector<1x32x8xf32> to vector<32x8xf32>
    %44 = arith.truncf %43 : vector<32x8xf32> to vector<32x8xbf16>
    %cst_33 = arith.constant dense<0.000000e+00> : vector<8x8xf32>
    %45 = tpu.matmul %24, %44, %cst_33 {dimension_numbers = #tpu.dot_dimension_numbers<[1], [0], [0], [1], [0, 0, 1, 1], [], []>} : vector<8x32xbf16>, vector<32x8xbf16>, vector<8x8xf32> -> vector<8x8xf32>
    %c8_34 = arith.constant 8 : index
    %c0_35 = arith.constant 0 : index
    %c0_36 = arith.constant 0 : index
    %46 = vector.load %arg7[%c8_34, %c0_35, %c0_36] : memref<12x1x8xf32, #tpu.memory_space<vmem>>, vector<1x1x8xf32>
    %47 = vector.shape_cast %46 : vector<1x1x8xf32> to vector<1x8xf32>
    %48 = vector.broadcast %47 : vector<1x8xf32> to vector<8x8xf32>
    %49 = arith.addf %45, %48 : vector<8x8xf32>
    %50 = arith.truncf %33 : vector<8x8xf32> to vector<8x8xbf16>
    %51 = arith.truncf %41 : vector<8x8xf32> to vector<8x8xbf16>
    %cst_37 = arith.constant dense<0.000000e+00> : vector<8x8xf32>
    %52 = tpu.matmul %50, %51, %cst_37 {dimension_numbers = #tpu.dot_dimension_numbers<[1], [1], [0], [0], [0, 0, 1, 0], [], []>} : vector<8x8xbf16>, vector<8x8xbf16>, vector<8x8xf32> -> vector<8x8xf32>
    %cst_38 = arith.constant 0.353553385 : f32
    %53 = vector.broadcast %cst_38 : f32 to vector<8x8xf32>
    %54 = arith.mulf %52, %53 : vector<8x8xf32>
    %cst_39 = arith.constant -1.000000e+09 : f32
    %55 = vector.broadcast %cst_39 : f32 to vector<8x8xf32>
    %56 = arith.select %12, %54, %55 : vector<8x8xi1>, vector<8x8xf32>
    %cst_40 = arith.constant dense<0xFF800000> : vector<8xf32>
    %57 = vector.multi_reduction <maximumf>, %56, %cst_40 [1] : vector<8x8xf32> to vector<8xf32>
    %58 = vector.shape_cast %57 : vector<8xf32> to vector<8x1xf32>
    %59 = vector.broadcast %58 : vector<8x1xf32> to vector<8x8xf32>
    %60 = arith.subf %56, %59 : vector<8x8xf32>
    %61 = math.exp %60 : vector<8x8xf32>
    %cst_41 = arith.constant dense<0.000000e+00> : vector<8xf32>
    %62 = vector.multi_reduction <add>, %61, %cst_41 [1] : vector<8x8xf32> to vector<8xf32>
    %63 = vector.shape_cast %62 : vector<8xf32> to vector<8x1xf32>
    %64 = vector.broadcast %63 : vector<8x1xf32> to vector<8x8xf32>
    %65 = arith.divf %61, %64 : vector<8x8xf32>
    %66 = arith.truncf %65 : vector<8x8xf32> to vector<8x8xbf16>
    %67 = arith.truncf %49 : vector<8x8xf32> to vector<8x8xbf16>
    %cst_42 = arith.constant dense<0.000000e+00> : vector<8x8xf32>
    %68 = tpu.matmul %66, %67, %cst_42 {dimension_numbers = #tpu.dot_dimension_numbers<[1], [0], [0], [1], [0, 0, 1, 1], [], []>} : vector<8x8xbf16>, vector<8x8xbf16>, vector<8x8xf32> -> vector<8x8xf32>
    %69 = arith.truncf %68 : vector<8x8xf32> to vector<8x8xbf16>
    %c0_43 = arith.constant 0 : index
    %c0_44 = arith.constant 0 : index
    %c0_45 = arith.constant 0 : index
    %70 = vector.load %arg8[%c0_43, %c0_44, %c0_45] : memref<4x8x32xf32, #tpu.memory_space<vmem>>, vector<1x8x32xf32>
    %71 = vector.shape_cast %70 : vector<1x8x32xf32> to vector<8x32xf32>
    %72 = arith.truncf %71 : vector<8x32xf32> to vector<8x32xbf16>
    %cst_46 = arith.constant dense<0.000000e+00> : vector<8x32xf32>
    %73 = tpu.matmul %69, %72, %cst_46 {dimension_numbers = #tpu.dot_dimension_numbers<[1], [0], [0], [1], [0, 0, 1, 1], [], []>} : vector<8x8xbf16>, vector<8x32xbf16>, vector<8x32xf32> -> vector<8x32xf32>
    %74 = arith.addf %25, %73 : vector<8x32xf32>
    %c1 = arith.constant 1 : index
    %c0_47 = arith.constant 0 : index
    %c0_48 = arith.constant 0 : index
    %75 = vector.load %arg6[%c1, %c0_47, %c0_48] : memref<12x32x8xf32, #tpu.memory_space<vmem>>, vector<1x32x8xf32>
    %76 = vector.shape_cast %75 : vector<1x32x8xf32> to vector<32x8xf32>
    %77 = arith.truncf %76 : vector<32x8xf32> to vector<32x8xbf16>
    %cst_49 = arith.constant dense<0.000000e+00> : vector<8x8xf32>
    %78 = tpu.matmul %23, %77, %cst_49 {dimension_numbers = #tpu.dot_dimension_numbers<[1], [0], [0], [1], [0, 0, 1, 1], [], []>} : vector<8x32xbf16>, vector<32x8xbf16>, vector<8x8xf32> -> vector<8x8xf32>
    %c1_50 = arith.constant 1 : index
    %c0_51 = arith.constant 0 : index
    %c0_52 = arith.constant 0 : index
    %79 = vector.load %arg7[%c1_50, %c0_51, %c0_52] : memref<12x1x8xf32, #tpu.memory_space<vmem>>, vector<1x1x8xf32>
    %80 = vector.shape_cast %79 : vector<1x1x8xf32> to vector<1x8xf32>
    %81 = vector.broadcast %80 : vector<1x8xf32> to vector<8x8xf32>
    %82 = arith.addf %78, %81 : vector<8x8xf32>
    %c5 = arith.constant 5 : index
    %c0_53 = arith.constant 0 : index
    %c0_54 = arith.constant 0 : index
    %83 = vector.load %arg6[%c5, %c0_53, %c0_54] : memref<12x32x8xf32, #tpu.memory_space<vmem>>, vector<1x32x8xf32>
    %84 = vector.shape_cast %83 : vector<1x32x8xf32> to vector<32x8xf32>
    %85 = arith.truncf %84 : vector<32x8xf32> to vector<32x8xbf16>
    %cst_55 = arith.constant dense<0.000000e+00> : vector<8x8xf32>
    %86 = tpu.matmul %24, %85, %cst_55 {dimension_numbers = #tpu.dot_dimension_numbers<[1], [0], [0], [1], [0, 0, 1, 1], [], []>} : vector<8x32xbf16>, vector<32x8xbf16>, vector<8x8xf32> -> vector<8x8xf32>
    %c5_56 = arith.constant 5 : index
    %c0_57 = arith.constant 0 : index
    %c0_58 = arith.constant 0 : index
    %87 = vector.load %arg7[%c5_56, %c0_57, %c0_58] : memref<12x1x8xf32, #tpu.memory_space<vmem>>, vector<1x1x8xf32>
    %88 = vector.shape_cast %87 : vector<1x1x8xf32> to vector<1x8xf32>
    %89 = vector.broadcast %88 : vector<1x8xf32> to vector<8x8xf32>
    %90 = arith.addf %86, %89 : vector<8x8xf32>
    %c9 = arith.constant 9 : index
    %c0_59 = arith.constant 0 : index
    %c0_60 = arith.constant 0 : index
    %91 = vector.load %arg6[%c9, %c0_59, %c0_60] : memref<12x32x8xf32, #tpu.memory_space<vmem>>, vector<1x32x8xf32>
    %92 = vector.shape_cast %91 : vector<1x32x8xf32> to vector<32x8xf32>
    %93 = arith.truncf %92 : vector<32x8xf32> to vector<32x8xbf16>
    %cst_61 = arith.constant dense<0.000000e+00> : vector<8x8xf32>
    %94 = tpu.matmul %24, %93, %cst_61 {dimension_numbers = #tpu.dot_dimension_numbers<[1], [0], [0], [1], [0, 0, 1, 1], [], []>} : vector<8x32xbf16>, vector<32x8xbf16>, vector<8x8xf32> -> vector<8x8xf32>
    %c9_62 = arith.constant 9 : index
    %c0_63 = arith.constant 0 : index
    %c0_64 = arith.constant 0 : index
    %95 = vector.load %arg7[%c9_62, %c0_63, %c0_64] : memref<12x1x8xf32, #tpu.memory_space<vmem>>, vector<1x1x8xf32>
    %96 = vector.shape_cast %95 : vector<1x1x8xf32> to vector<1x8xf32>
    %97 = vector.broadcast %96 : vector<1x8xf32> to vector<8x8xf32>
    %98 = arith.addf %94, %97 : vector<8x8xf32>
    %99 = arith.truncf %82 : vector<8x8xf32> to vector<8x8xbf16>
    %100 = arith.truncf %90 : vector<8x8xf32> to vector<8x8xbf16>
    %cst_65 = arith.constant dense<0.000000e+00> : vector<8x8xf32>
    %101 = tpu.matmul %99, %100, %cst_65 {dimension_numbers = #tpu.dot_dimension_numbers<[1], [1], [0], [0], [0, 0, 1, 0], [], []>} : vector<8x8xbf16>, vector<8x8xbf16>, vector<8x8xf32> -> vector<8x8xf32>
    %cst_66 = arith.constant 0.353553385 : f32
    %102 = vector.broadcast %cst_66 : f32 to vector<8x8xf32>
    %103 = arith.mulf %101, %102 : vector<8x8xf32>
    %cst_67 = arith.constant -1.000000e+09 : f32
    %104 = vector.broadcast %cst_67 : f32 to vector<8x8xf32>
    %105 = arith.select %12, %103, %104 : vector<8x8xi1>, vector<8x8xf32>
    %cst_68 = arith.constant dense<0xFF800000> : vector<8xf32>
    %106 = vector.multi_reduction <maximumf>, %105, %cst_68 [1] : vector<8x8xf32> to vector<8xf32>
    %107 = vector.shape_cast %106 : vector<8xf32> to vector<8x1xf32>
    %108 = vector.broadcast %107 : vector<8x1xf32> to vector<8x8xf32>
    %109 = arith.subf %105, %108 : vector<8x8xf32>
    %110 = math.exp %109 : vector<8x8xf32>
    %cst_69 = arith.constant dense<0.000000e+00> : vector<8xf32>
    %111 = vector.multi_reduction <add>, %110, %cst_69 [1] : vector<8x8xf32> to vector<8xf32>
    %112 = vector.shape_cast %111 : vector<8xf32> to vector<8x1xf32>
    %113 = vector.broadcast %112 : vector<8x1xf32> to vector<8x8xf32>
    %114 = arith.divf %110, %113 : vector<8x8xf32>
    %115 = arith.truncf %114 : vector<8x8xf32> to vector<8x8xbf16>
    %116 = arith.truncf %98 : vector<8x8xf32> to vector<8x8xbf16>
    %cst_70 = arith.constant dense<0.000000e+00> : vector<8x8xf32>
    %117 = tpu.matmul %115, %116, %cst_70 {dimension_numbers = #tpu.dot_dimension_numbers<[1], [0], [0], [1], [0, 0, 1, 1], [], []>} : vector<8x8xbf16>, vector<8x8xbf16>, vector<8x8xf32> -> vector<8x8xf32>
    %118 = arith.truncf %117 : vector<8x8xf32> to vector<8x8xbf16>
    %c1_71 = arith.constant 1 : index
    %c0_72 = arith.constant 0 : index
    %c0_73 = arith.constant 0 : index
    %119 = vector.load %arg8[%c1_71, %c0_72, %c0_73] : memref<4x8x32xf32, #tpu.memory_space<vmem>>, vector<1x8x32xf32>
    %120 = vector.shape_cast %119 : vector<1x8x32xf32> to vector<8x32xf32>
    %121 = arith.truncf %120 : vector<8x32xf32> to vector<8x32xbf16>
    %cst_74 = arith.constant dense<0.000000e+00> : vector<8x32xf32>
    %122 = tpu.matmul %118, %121, %cst_74 {dimension_numbers = #tpu.dot_dimension_numbers<[1], [0], [0], [1], [0, 0, 1, 1], [], []>} : vector<8x8xbf16>, vector<8x32xbf16>, vector<8x32xf32> -> vector<8x32xf32>
    %123 = arith.addf %74, %122 : vector<8x32xf32>
    %c2 = arith.constant 2 : index
    %c0_75 = arith.constant 0 : index
    %c0_76 = arith.constant 0 : index
    %124 = vector.load %arg6[%c2, %c0_75, %c0_76] : memref<12x32x8xf32, #tpu.memory_space<vmem>>, vector<1x32x8xf32>
    %125 = vector.shape_cast %124 : vector<1x32x8xf32> to vector<32x8xf32>
    %126 = arith.truncf %125 : vector<32x8xf32> to vector<32x8xbf16>
    %cst_77 = arith.constant dense<0.000000e+00> : vector<8x8xf32>
    %127 = tpu.matmul %23, %126, %cst_77 {dimension_numbers = #tpu.dot_dimension_numbers<[1], [0], [0], [1], [0, 0, 1, 1], [], []>} : vector<8x32xbf16>, vector<32x8xbf16>, vector<8x8xf32> -> vector<8x8xf32>
    %c2_78 = arith.constant 2 : index
    %c0_79 = arith.constant 0 : index
    %c0_80 = arith.constant 0 : index
    %128 = vector.load %arg7[%c2_78, %c0_79, %c0_80] : memref<12x1x8xf32, #tpu.memory_space<vmem>>, vector<1x1x8xf32>
    %129 = vector.shape_cast %128 : vector<1x1x8xf32> to vector<1x8xf32>
    %130 = vector.broadcast %129 : vector<1x8xf32> to vector<8x8xf32>
    %131 = arith.addf %127, %130 : vector<8x8xf32>
    %c6 = arith.constant 6 : index
    %c0_81 = arith.constant 0 : index
    %c0_82 = arith.constant 0 : index
    %132 = vector.load %arg6[%c6, %c0_81, %c0_82] : memref<12x32x8xf32, #tpu.memory_space<vmem>>, vector<1x32x8xf32>
    %133 = vector.shape_cast %132 : vector<1x32x8xf32> to vector<32x8xf32>
    %134 = arith.truncf %133 : vector<32x8xf32> to vector<32x8xbf16>
    %cst_83 = arith.constant dense<0.000000e+00> : vector<8x8xf32>
    %135 = tpu.matmul %24, %134, %cst_83 {dimension_numbers = #tpu.dot_dimension_numbers<[1], [0], [0], [1], [0, 0, 1, 1], [], []>} : vector<8x32xbf16>, vector<32x8xbf16>, vector<8x8xf32> -> vector<8x8xf32>
    %c6_84 = arith.constant 6 : index
    %c0_85 = arith.constant 0 : index
    %c0_86 = arith.constant 0 : index
    %136 = vector.load %arg7[%c6_84, %c0_85, %c0_86] : memref<12x1x8xf32, #tpu.memory_space<vmem>>, vector<1x1x8xf32>
    %137 = vector.shape_cast %136 : vector<1x1x8xf32> to vector<1x8xf32>
    %138 = vector.broadcast %137 : vector<1x8xf32> to vector<8x8xf32>
    %139 = arith.addf %135, %138 : vector<8x8xf32>
    %c10 = arith.constant 10 : index
    %c0_87 = arith.constant 0 : index
    %c0_88 = arith.constant 0 : index
    %140 = vector.load %arg6[%c10, %c0_87, %c0_88] : memref<12x32x8xf32, #tpu.memory_space<vmem>>, vector<1x32x8xf32>
    %141 = vector.shape_cast %140 : vector<1x32x8xf32> to vector<32x8xf32>
    %142 = arith.truncf %141 : vector<32x8xf32> to vector<32x8xbf16>
    %cst_89 = arith.constant dense<0.000000e+00> : vector<8x8xf32>
    %143 = tpu.matmul %24, %142, %cst_89 {dimension_numbers = #tpu.dot_dimension_numbers<[1], [0], [0], [1], [0, 0, 1, 1], [], []>} : vector<8x32xbf16>, vector<32x8xbf16>, vector<8x8xf32> -> vector<8x8xf32>
    %c10_90 = arith.constant 10 : index
    %c0_91 = arith.constant 0 : index
    %c0_92 = arith.constant 0 : index
    %144 = vector.load %arg7[%c10_90, %c0_91, %c0_92] : memref<12x1x8xf32, #tpu.memory_space<vmem>>, vector<1x1x8xf32>
    %145 = vector.shape_cast %144 : vector<1x1x8xf32> to vector<1x8xf32>
    %146 = vector.broadcast %145 : vector<1x8xf32> to vector<8x8xf32>
    %147 = arith.addf %143, %146 : vector<8x8xf32>
    %148 = arith.truncf %131 : vector<8x8xf32> to vector<8x8xbf16>
    %149 = arith.truncf %139 : vector<8x8xf32> to vector<8x8xbf16>
    %cst_93 = arith.constant dense<0.000000e+00> : vector<8x8xf32>
    %150 = tpu.matmul %148, %149, %cst_93 {dimension_numbers = #tpu.dot_dimension_numbers<[1], [1], [0], [0], [0, 0, 1, 0], [], []>} : vector<8x8xbf16>, vector<8x8xbf16>, vector<8x8xf32> -> vector<8x8xf32>
    %cst_94 = arith.constant 0.353553385 : f32
    %151 = vector.broadcast %cst_94 : f32 to vector<8x8xf32>
    %152 = arith.mulf %150, %151 : vector<8x8xf32>
    %cst_95 = arith.constant -1.000000e+09 : f32
    %153 = vector.broadcast %cst_95 : f32 to vector<8x8xf32>
    %154 = arith.select %12, %152, %153 : vector<8x8xi1>, vector<8x8xf32>
    %cst_96 = arith.constant dense<0xFF800000> : vector<8xf32>
    %155 = vector.multi_reduction <maximumf>, %154, %cst_96 [1] : vector<8x8xf32> to vector<8xf32>
    %156 = vector.shape_cast %155 : vector<8xf32> to vector<8x1xf32>
    %157 = vector.broadcast %156 : vector<8x1xf32> to vector<8x8xf32>
    %158 = arith.subf %154, %157 : vector<8x8xf32>
    %159 = math.exp %158 : vector<8x8xf32>
    %cst_97 = arith.constant dense<0.000000e+00> : vector<8xf32>
    %160 = vector.multi_reduction <add>, %159, %cst_97 [1] : vector<8x8xf32> to vector<8xf32>
    %161 = vector.shape_cast %160 : vector<8xf32> to vector<8x1xf32>
    %162 = vector.broadcast %161 : vector<8x1xf32> to vector<8x8xf32>
    %163 = arith.divf %159, %162 : vector<8x8xf32>
    %164 = arith.truncf %163 : vector<8x8xf32> to vector<8x8xbf16>
    %165 = arith.truncf %147 : vector<8x8xf32> to vector<8x8xbf16>
    %cst_98 = arith.constant dense<0.000000e+00> : vector<8x8xf32>
    %166 = tpu.matmul %164, %165, %cst_98 {dimension_numbers = #tpu.dot_dimension_numbers<[1], [0], [0], [1], [0, 0, 1, 1], [], []>} : vector<8x8xbf16>, vector<8x8xbf16>, vector<8x8xf32> -> vector<8x8xf32>
    %167 = arith.truncf %166 : vector<8x8xf32> to vector<8x8xbf16>
    %c2_99 = arith.constant 2 : index
    %c0_100 = arith.constant 0 : index
    %c0_101 = arith.constant 0 : index
    %168 = vector.load %arg8[%c2_99, %c0_100, %c0_101] : memref<4x8x32xf32, #tpu.memory_space<vmem>>, vector<1x8x32xf32>
    %169 = vector.shape_cast %168 : vector<1x8x32xf32> to vector<8x32xf32>
    %170 = arith.truncf %169 : vector<8x32xf32> to vector<8x32xbf16>
    %cst_102 = arith.constant dense<0.000000e+00> : vector<8x32xf32>
    %171 = tpu.matmul %167, %170, %cst_102 {dimension_numbers = #tpu.dot_dimension_numbers<[1], [0], [0], [1], [0, 0, 1, 1], [], []>} : vector<8x8xbf16>, vector<8x32xbf16>, vector<8x32xf32> -> vector<8x32xf32>
    %172 = arith.addf %123, %171 : vector<8x32xf32>
    %c3 = arith.constant 3 : index
    %c0_103 = arith.constant 0 : index
    %c0_104 = arith.constant 0 : index
    %173 = vector.load %arg6[%c3, %c0_103, %c0_104] : memref<12x32x8xf32, #tpu.memory_space<vmem>>, vector<1x32x8xf32>
    %174 = vector.shape_cast %173 : vector<1x32x8xf32> to vector<32x8xf32>
    %175 = arith.truncf %174 : vector<32x8xf32> to vector<32x8xbf16>
    %cst_105 = arith.constant dense<0.000000e+00> : vector<8x8xf32>
    %176 = tpu.matmul %23, %175, %cst_105 {dimension_numbers = #tpu.dot_dimension_numbers<[1], [0], [0], [1], [0, 0, 1, 1], [], []>} : vector<8x32xbf16>, vector<32x8xbf16>, vector<8x8xf32> -> vector<8x8xf32>
    %c3_106 = arith.constant 3 : index
    %c0_107 = arith.constant 0 : index
    %c0_108 = arith.constant 0 : index
    %177 = vector.load %arg7[%c3_106, %c0_107, %c0_108] : memref<12x1x8xf32, #tpu.memory_space<vmem>>, vector<1x1x8xf32>
    %178 = vector.shape_cast %177 : vector<1x1x8xf32> to vector<1x8xf32>
    %179 = vector.broadcast %178 : vector<1x8xf32> to vector<8x8xf32>
    %180 = arith.addf %176, %179 : vector<8x8xf32>
    %c7 = arith.constant 7 : index
    %c0_109 = arith.constant 0 : index
    %c0_110 = arith.constant 0 : index
    %181 = vector.load %arg6[%c7, %c0_109, %c0_110] : memref<12x32x8xf32, #tpu.memory_space<vmem>>, vector<1x32x8xf32>
    %182 = vector.shape_cast %181 : vector<1x32x8xf32> to vector<32x8xf32>
    %183 = arith.truncf %182 : vector<32x8xf32> to vector<32x8xbf16>
    %cst_111 = arith.constant dense<0.000000e+00> : vector<8x8xf32>
    %184 = tpu.matmul %24, %183, %cst_111 {dimension_numbers = #tpu.dot_dimension_numbers<[1], [0], [0], [1], [0, 0, 1, 1], [], []>} : vector<8x32xbf16>, vector<32x8xbf16>, vector<8x8xf32> -> vector<8x8xf32>
    %c7_112 = arith.constant 7 : index
    %c0_113 = arith.constant 0 : index
    %c0_114 = arith.constant 0 : index
    %185 = vector.load %arg7[%c7_112, %c0_113, %c0_114] : memref<12x1x8xf32, #tpu.memory_space<vmem>>, vector<1x1x8xf32>
    %186 = vector.shape_cast %185 : vector<1x1x8xf32> to vector<1x8xf32>
    %187 = vector.broadcast %186 : vector<1x8xf32> to vector<8x8xf32>
    %188 = arith.addf %184, %187 : vector<8x8xf32>
    %c11 = arith.constant 11 : index
    %c0_115 = arith.constant 0 : index
    %c0_116 = arith.constant 0 : index
    %189 = vector.load %arg6[%c11, %c0_115, %c0_116] : memref<12x32x8xf32, #tpu.memory_space<vmem>>, vector<1x32x8xf32>
    %190 = vector.shape_cast %189 : vector<1x32x8xf32> to vector<32x8xf32>
    %191 = arith.truncf %190 : vector<32x8xf32> to vector<32x8xbf16>
    %cst_117 = arith.constant dense<0.000000e+00> : vector<8x8xf32>
    %192 = tpu.matmul %24, %191, %cst_117 {dimension_numbers = #tpu.dot_dimension_numbers<[1], [0], [0], [1], [0, 0, 1, 1], [], []>} : vector<8x32xbf16>, vector<32x8xbf16>, vector<8x8xf32> -> vector<8x8xf32>
    %c11_118 = arith.constant 11 : index
    %c0_119 = arith.constant 0 : index
    %c0_120 = arith.constant 0 : index
    %193 = vector.load %arg7[%c11_118, %c0_119, %c0_120] : memref<12x1x8xf32, #tpu.memory_space<vmem>>, vector<1x1x8xf32>
    %194 = vector.shape_cast %193 : vector<1x1x8xf32> to vector<1x8xf32>
    %195 = vector.broadcast %194 : vector<1x8xf32> to vector<8x8xf32>
    %196 = arith.addf %192, %195 : vector<8x8xf32>
    %197 = arith.truncf %180 : vector<8x8xf32> to vector<8x8xbf16>
    %198 = arith.truncf %188 : vector<8x8xf32> to vector<8x8xbf16>
    %cst_121 = arith.constant dense<0.000000e+00> : vector<8x8xf32>
    %199 = tpu.matmul %197, %198, %cst_121 {dimension_numbers = #tpu.dot_dimension_numbers<[1], [1], [0], [0], [0, 0, 1, 0], [], []>} : vector<8x8xbf16>, vector<8x8xbf16>, vector<8x8xf32> -> vector<8x8xf32>
    %cst_122 = arith.constant 0.353553385 : f32
    %200 = vector.broadcast %cst_122 : f32 to vector<8x8xf32>
    %201 = arith.mulf %199, %200 : vector<8x8xf32>
    %cst_123 = arith.constant -1.000000e+09 : f32
    %202 = vector.broadcast %cst_123 : f32 to vector<8x8xf32>
    %203 = arith.select %12, %201, %202 : vector<8x8xi1>, vector<8x8xf32>
    %cst_124 = arith.constant dense<0xFF800000> : vector<8xf32>
    %204 = vector.multi_reduction <maximumf>, %203, %cst_124 [1] : vector<8x8xf32> to vector<8xf32>
    %205 = vector.shape_cast %204 : vector<8xf32> to vector<8x1xf32>
    %206 = vector.broadcast %205 : vector<8x1xf32> to vector<8x8xf32>
    %207 = arith.subf %203, %206 : vector<8x8xf32>
    %208 = math.exp %207 : vector<8x8xf32>
    %cst_125 = arith.constant dense<0.000000e+00> : vector<8xf32>
    %209 = vector.multi_reduction <add>, %208, %cst_125 [1] : vector<8x8xf32> to vector<8xf32>
    %210 = vector.shape_cast %209 : vector<8xf32> to vector<8x1xf32>
    %211 = vector.broadcast %210 : vector<8x1xf32> to vector<8x8xf32>
    %212 = arith.divf %208, %211 : vector<8x8xf32>
    %213 = arith.truncf %212 : vector<8x8xf32> to vector<8x8xbf16>
    %214 = arith.truncf %196 : vector<8x8xf32> to vector<8x8xbf16>
    %cst_126 = arith.constant dense<0.000000e+00> : vector<8x8xf32>
    %215 = tpu.matmul %213, %214, %cst_126 {dimension_numbers = #tpu.dot_dimension_numbers<[1], [0], [0], [1], [0, 0, 1, 1], [], []>} : vector<8x8xbf16>, vector<8x8xbf16>, vector<8x8xf32> -> vector<8x8xf32>
    %216 = arith.truncf %215 : vector<8x8xf32> to vector<8x8xbf16>
    %c3_127 = arith.constant 3 : index
    %c0_128 = arith.constant 0 : index
    %c0_129 = arith.constant 0 : index
    %217 = vector.load %arg8[%c3_127, %c0_128, %c0_129] : memref<4x8x32xf32, #tpu.memory_space<vmem>>, vector<1x8x32xf32>
    %218 = vector.shape_cast %217 : vector<1x8x32xf32> to vector<8x32xf32>
    %219 = arith.truncf %218 : vector<8x32xf32> to vector<8x32xbf16>
    %cst_130 = arith.constant dense<0.000000e+00> : vector<8x32xf32>
    %220 = tpu.matmul %216, %219, %cst_130 {dimension_numbers = #tpu.dot_dimension_numbers<[1], [0], [0], [1], [0, 0, 1, 1], [], []>} : vector<8x8xbf16>, vector<8x32xbf16>, vector<8x32xf32> -> vector<8x32xf32>
    %221 = arith.addf %172, %220 : vector<8x32xf32>
    %222 = vector.broadcast %22 : vector<1x32xf32> to vector<8x32xf32>
    %223 = arith.addf %221, %222 : vector<8x32xf32>
    %224 = arith.addf %223, %1 : vector<8x32xf32>
    %c0_131 = arith.constant 0 : index
    %c0_132 = arith.constant 0 : index
    %225 = vector.load %arg10[%c0_131, %c0_132] : memref<1x32xf32, #tpu.memory_space<vmem>>, vector<1x32xf32>
    %c0_133 = arith.constant 0 : index
    %c0_134 = arith.constant 0 : index
    %226 = vector.load %arg11[%c0_133, %c0_134] : memref<1x32xf32, #tpu.memory_space<vmem>>, vector<1x32xf32>
    %cst_135 = arith.constant dense<0.000000e+00> : vector<8xf32>
    %227 = vector.multi_reduction <add>, %224, %cst_135 [1] : vector<8x32xf32> to vector<8xf32>
    %228 = vector.shape_cast %227 : vector<8xf32> to vector<8x1xf32>
    %cst_136 = arith.constant 3.200000e+01 : f32
    %229 = vector.broadcast %cst_136 : f32 to vector<8x1xf32>
    %230 = arith.divf %228, %229 : vector<8x1xf32>
    %231 = vector.broadcast %230 : vector<8x1xf32> to vector<8x32xf32>
    %232 = arith.subf %224, %231 : vector<8x32xf32>
    %233 = arith.mulf %232, %232 : vector<8x32xf32>
    %cst_137 = arith.constant dense<0.000000e+00> : vector<8xf32>
    %234 = vector.multi_reduction <add>, %233, %cst_137 [1] : vector<8x32xf32> to vector<8xf32>
    %235 = vector.shape_cast %234 : vector<8xf32> to vector<8x1xf32>
    %cst_138 = arith.constant 3.200000e+01 : f32
    %236 = vector.broadcast %cst_138 : f32 to vector<8x1xf32>
    %237 = arith.divf %235, %236 : vector<8x1xf32>
    %238 = vector.broadcast %230 : vector<8x1xf32> to vector<8x32xf32>
    %239 = arith.subf %224, %238 : vector<8x32xf32>
    %cst_139 = arith.constant 9.99999974E-6 : f32
    %240 = vector.broadcast %cst_139 : f32 to vector<8x1xf32>
    %241 = arith.addf %237, %240 : vector<8x1xf32>
    %242 = math.rsqrt %241 : vector<8x1xf32>
    %243 = vector.broadcast %242 : vector<8x1xf32> to vector<8x32xf32>
    %244 = arith.mulf %239, %243 : vector<8x32xf32>
    %245 = vector.broadcast %225 : vector<1x32xf32> to vector<8x32xf32>
    %246 = arith.mulf %244, %245 : vector<8x32xf32>
    %247 = vector.broadcast %226 : vector<1x32xf32> to vector<8x32xf32>
    %248 = arith.addf %246, %247 : vector<8x32xf32>
    %c0_140 = arith.constant 0 : index
    %c0_141 = arith.constant 0 : index
    %249 = vector.load %arg17[%c0_140, %c0_141] : memref<1x32xf32, #tpu.memory_space<vmem>>, vector<1x32xf32>
    %250 = arith.truncf %248 : vector<8x32xf32> to vector<8x32xbf16>
    %251 = arith.truncf %3 : vector<8x32xf32> to vector<8x32xbf16>
    %cst_142 = arith.constant 0.000000e+00 : f32
    %252 = vector.broadcast %cst_142 : f32 to vector<8x32xf32>
    %c0_143 = arith.constant 0 : index
    %c0_144 = arith.constant 0 : index
    %c0_145 = arith.constant 0 : index
    %253 = vector.load %arg12[%c0_143, %c0_144, %c0_145] : memref<4x32x8xf32, #tpu.memory_space<vmem>>, vector<1x32x8xf32>
    %254 = vector.shape_cast %253 : vector<1x32x8xf32> to vector<32x8xf32>
    %255 = arith.truncf %254 : vector<32x8xf32> to vector<32x8xbf16>
    %cst_146 = arith.constant dense<0.000000e+00> : vector<8x8xf32>
    %256 = tpu.matmul %250, %255, %cst_146 {dimension_numbers = #tpu.dot_dimension_numbers<[1], [0], [0], [1], [0, 0, 1, 1], [], []>} : vector<8x32xbf16>, vector<32x8xbf16>, vector<8x8xf32> -> vector<8x8xf32>
    %c0_147 = arith.constant 0 : index
    %c0_148 = arith.constant 0 : index
    %c0_149 = arith.constant 0 : index
    %257 = vector.load %arg13[%c0_147, %c0_148, %c0_149] : memref<4x1x8xf32, #tpu.memory_space<vmem>>, vector<1x1x8xf32>
    %258 = vector.shape_cast %257 : vector<1x1x8xf32> to vector<1x8xf32>
    %259 = vector.broadcast %258 : vector<1x8xf32> to vector<8x8xf32>
    %260 = arith.addf %256, %259 : vector<8x8xf32>
    %c0_150 = arith.constant 0 : index
    %c0_151 = arith.constant 0 : index
    %c0_152 = arith.constant 0 : index
    %261 = vector.load %arg14[%c0_150, %c0_151, %c0_152] : memref<8x32x8xf32, #tpu.memory_space<vmem>>, vector<1x32x8xf32>
    %262 = vector.shape_cast %261 : vector<1x32x8xf32> to vector<32x8xf32>
    %263 = arith.truncf %262 : vector<32x8xf32> to vector<32x8xbf16>
    %cst_153 = arith.constant dense<0.000000e+00> : vector<8x8xf32>
    %264 = tpu.matmul %251, %263, %cst_153 {dimension_numbers = #tpu.dot_dimension_numbers<[1], [0], [0], [1], [0, 0, 1, 1], [], []>} : vector<8x32xbf16>, vector<32x8xbf16>, vector<8x8xf32> -> vector<8x8xf32>
    %c0_154 = arith.constant 0 : index
    %c0_155 = arith.constant 0 : index
    %c0_156 = arith.constant 0 : index
    %265 = vector.load %arg15[%c0_154, %c0_155, %c0_156] : memref<8x1x8xf32, #tpu.memory_space<vmem>>, vector<1x1x8xf32>
    %266 = vector.shape_cast %265 : vector<1x1x8xf32> to vector<1x8xf32>
    %267 = vector.broadcast %266 : vector<1x8xf32> to vector<8x8xf32>
    %268 = arith.addf %264, %267 : vector<8x8xf32>
    %c4_157 = arith.constant 4 : index
    %c0_158 = arith.constant 0 : index
    %c0_159 = arith.constant 0 : index
    %269 = vector.load %arg14[%c4_157, %c0_158, %c0_159] : memref<8x32x8xf32, #tpu.memory_space<vmem>>, vector<1x32x8xf32>
    %270 = vector.shape_cast %269 : vector<1x32x8xf32> to vector<32x8xf32>
    %271 = arith.truncf %270 : vector<32x8xf32> to vector<32x8xbf16>
    %cst_160 = arith.constant dense<0.000000e+00> : vector<8x8xf32>
    %272 = tpu.matmul %251, %271, %cst_160 {dimension_numbers = #tpu.dot_dimension_numbers<[1], [0], [0], [1], [0, 0, 1, 1], [], []>} : vector<8x32xbf16>, vector<32x8xbf16>, vector<8x8xf32> -> vector<8x8xf32>
    %c4_161 = arith.constant 4 : index
    %c0_162 = arith.constant 0 : index
    %c0_163 = arith.constant 0 : index
    %273 = vector.load %arg15[%c4_161, %c0_162, %c0_163] : memref<8x1x8xf32, #tpu.memory_space<vmem>>, vector<1x1x8xf32>
    %274 = vector.shape_cast %273 : vector<1x1x8xf32> to vector<1x8xf32>
    %275 = vector.broadcast %274 : vector<1x8xf32> to vector<8x8xf32>
    %276 = arith.addf %272, %275 : vector<8x8xf32>
    %277 = arith.truncf %260 : vector<8x8xf32> to vector<8x8xbf16>
    %278 = arith.truncf %268 : vector<8x8xf32> to vector<8x8xbf16>
    %cst_164 = arith.constant dense<0.000000e+00> : vector<8x8xf32>
    %279 = tpu.matmul %277, %278, %cst_164 {dimension_numbers = #tpu.dot_dimension_numbers<[1], [1], [0], [0], [0, 0, 1, 0], [], []>} : vector<8x8xbf16>, vector<8x8xbf16>, vector<8x8xf32> -> vector<8x8xf32>
    %cst_165 = arith.constant 0.353553385 : f32
    %280 = vector.broadcast %cst_165 : f32 to vector<8x8xf32>
    %281 = arith.mulf %279, %280 : vector<8x8xf32>
    %cst_166 = arith.constant -1.000000e+09 : f32
    %282 = vector.broadcast %cst_166 : f32 to vector<8x8xf32>
    %283 = arith.select %21, %281, %282 : vector<8x8xi1>, vector<8x8xf32>
    %cst_167 = arith.constant dense<0xFF800000> : vector<8xf32>
    %284 = vector.multi_reduction <maximumf>, %283, %cst_167 [1] : vector<8x8xf32> to vector<8xf32>
    %285 = vector.shape_cast %284 : vector<8xf32> to vector<8x1xf32>
    %286 = vector.broadcast %285 : vector<8x1xf32> to vector<8x8xf32>
    %287 = arith.subf %283, %286 : vector<8x8xf32>
    %288 = math.exp %287 : vector<8x8xf32>
    %cst_168 = arith.constant dense<0.000000e+00> : vector<8xf32>
    %289 = vector.multi_reduction <add>, %288, %cst_168 [1] : vector<8x8xf32> to vector<8xf32>
    %290 = vector.shape_cast %289 : vector<8xf32> to vector<8x1xf32>
    %291 = vector.broadcast %290 : vector<8x1xf32> to vector<8x8xf32>
    %292 = arith.divf %288, %291 : vector<8x8xf32>
    %293 = arith.truncf %292 : vector<8x8xf32> to vector<8x8xbf16>
    %294 = arith.truncf %276 : vector<8x8xf32> to vector<8x8xbf16>
    %cst_169 = arith.constant dense<0.000000e+00> : vector<8x8xf32>
    %295 = tpu.matmul %293, %294, %cst_169 {dimension_numbers = #tpu.dot_dimension_numbers<[1], [0], [0], [1], [0, 0, 1, 1], [], []>} : vector<8x8xbf16>, vector<8x8xbf16>, vector<8x8xf32> -> vector<8x8xf32>
    %296 = arith.truncf %295 : vector<8x8xf32> to vector<8x8xbf16>
    %c0_170 = arith.constant 0 : index
    %c0_171 = arith.constant 0 : index
    %c0_172 = arith.constant 0 : index
    %297 = vector.load %arg16[%c0_170, %c0_171, %c0_172] : memref<4x8x32xf32, #tpu.memory_space<vmem>>, vector<1x8x32xf32>
    %298 = vector.shape_cast %297 : vector<1x8x32xf32> to vector<8x32xf32>
    %299 = arith.truncf %298 : vector<8x32xf32> to vector<8x32xbf16>
    %cst_173 = arith.constant dense<0.000000e+00> : vector<8x32xf32>
    %300 = tpu.matmul %296, %299, %cst_173 {dimension_numbers = #tpu.dot_dimension_numbers<[1], [0], [0], [1], [0, 0, 1, 1], [], []>} : vector<8x8xbf16>, vector<8x32xbf16>, vector<8x32xf32> -> vector<8x32xf32>
    %301 = arith.addf %252, %300 : vector<8x32xf32>
    %c1_174 = arith.constant 1 : index
    %c0_175 = arith.constant 0 : index
    %c0_176 = arith.constant 0 : index
    %302 = vector.load %arg12[%c1_174, %c0_175, %c0_176] : memref<4x32x8xf32, #tpu.memory_space<vmem>>, vector<1x32x8xf32>
    %303 = vector.shape_cast %302 : vector<1x32x8xf32> to vector<32x8xf32>
    %304 = arith.truncf %303 : vector<32x8xf32> to vector<32x8xbf16>
    %cst_177 = arith.constant dense<0.000000e+00> : vector<8x8xf32>
    %305 = tpu.matmul %250, %304, %cst_177 {dimension_numbers = #tpu.dot_dimension_numbers<[1], [0], [0], [1], [0, 0, 1, 1], [], []>} : vector<8x32xbf16>, vector<32x8xbf16>, vector<8x8xf32> -> vector<8x8xf32>
    %c1_178 = arith.constant 1 : index
    %c0_179 = arith.constant 0 : index
    %c0_180 = arith.constant 0 : index
    %306 = vector.load %arg13[%c1_178, %c0_179, %c0_180] : memref<4x1x8xf32, #tpu.memory_space<vmem>>, vector<1x1x8xf32>
    %307 = vector.shape_cast %306 : vector<1x1x8xf32> to vector<1x8xf32>
    %308 = vector.broadcast %307 : vector<1x8xf32> to vector<8x8xf32>
    %309 = arith.addf %305, %308 : vector<8x8xf32>
    %c1_181 = arith.constant 1 : index
    %c0_182 = arith.constant 0 : index
    %c0_183 = arith.constant 0 : index
    %310 = vector.load %arg14[%c1_181, %c0_182, %c0_183] : memref<8x32x8xf32, #tpu.memory_space<vmem>>, vector<1x32x8xf32>
    %311 = vector.shape_cast %310 : vector<1x32x8xf32> to vector<32x8xf32>
    %312 = arith.truncf %311 : vector<32x8xf32> to vector<32x8xbf16>
    %cst_184 = arith.constant dense<0.000000e+00> : vector<8x8xf32>
    %313 = tpu.matmul %251, %312, %cst_184 {dimension_numbers = #tpu.dot_dimension_numbers<[1], [0], [0], [1], [0, 0, 1, 1], [], []>} : vector<8x32xbf16>, vector<32x8xbf16>, vector<8x8xf32> -> vector<8x8xf32>
    %c1_185 = arith.constant 1 : index
    %c0_186 = arith.constant 0 : index
    %c0_187 = arith.constant 0 : index
    %314 = vector.load %arg15[%c1_185, %c0_186, %c0_187] : memref<8x1x8xf32, #tpu.memory_space<vmem>>, vector<1x1x8xf32>
    %315 = vector.shape_cast %314 : vector<1x1x8xf32> to vector<1x8xf32>
    %316 = vector.broadcast %315 : vector<1x8xf32> to vector<8x8xf32>
    %317 = arith.addf %313, %316 : vector<8x8xf32>
    %c5_188 = arith.constant 5 : index
    %c0_189 = arith.constant 0 : index
    %c0_190 = arith.constant 0 : index
    %318 = vector.load %arg14[%c5_188, %c0_189, %c0_190] : memref<8x32x8xf32, #tpu.memory_space<vmem>>, vector<1x32x8xf32>
    %319 = vector.shape_cast %318 : vector<1x32x8xf32> to vector<32x8xf32>
    %320 = arith.truncf %319 : vector<32x8xf32> to vector<32x8xbf16>
    %cst_191 = arith.constant dense<0.000000e+00> : vector<8x8xf32>
    %321 = tpu.matmul %251, %320, %cst_191 {dimension_numbers = #tpu.dot_dimension_numbers<[1], [0], [0], [1], [0, 0, 1, 1], [], []>} : vector<8x32xbf16>, vector<32x8xbf16>, vector<8x8xf32> -> vector<8x8xf32>
    %c5_192 = arith.constant 5 : index
    %c0_193 = arith.constant 0 : index
    %c0_194 = arith.constant 0 : index
    %322 = vector.load %arg15[%c5_192, %c0_193, %c0_194] : memref<8x1x8xf32, #tpu.memory_space<vmem>>, vector<1x1x8xf32>
    %323 = vector.shape_cast %322 : vector<1x1x8xf32> to vector<1x8xf32>
    %324 = vector.broadcast %323 : vector<1x8xf32> to vector<8x8xf32>
    %325 = arith.addf %321, %324 : vector<8x8xf32>
    %326 = arith.truncf %309 : vector<8x8xf32> to vector<8x8xbf16>
    %327 = arith.truncf %317 : vector<8x8xf32> to vector<8x8xbf16>
    %cst_195 = arith.constant dense<0.000000e+00> : vector<8x8xf32>
    %328 = tpu.matmul %326, %327, %cst_195 {dimension_numbers = #tpu.dot_dimension_numbers<[1], [1], [0], [0], [0, 0, 1, 0], [], []>} : vector<8x8xbf16>, vector<8x8xbf16>, vector<8x8xf32> -> vector<8x8xf32>
    %cst_196 = arith.constant 0.353553385 : f32
    %329 = vector.broadcast %cst_196 : f32 to vector<8x8xf32>
    %330 = arith.mulf %328, %329 : vector<8x8xf32>
    %cst_197 = arith.constant -1.000000e+09 : f32
    %331 = vector.broadcast %cst_197 : f32 to vector<8x8xf32>
    %332 = arith.select %21, %330, %331 : vector<8x8xi1>, vector<8x8xf32>
    %cst_198 = arith.constant dense<0xFF800000> : vector<8xf32>
    %333 = vector.multi_reduction <maximumf>, %332, %cst_198 [1] : vector<8x8xf32> to vector<8xf32>
    %334 = vector.shape_cast %333 : vector<8xf32> to vector<8x1xf32>
    %335 = vector.broadcast %334 : vector<8x1xf32> to vector<8x8xf32>
    %336 = arith.subf %332, %335 : vector<8x8xf32>
    %337 = math.exp %336 : vector<8x8xf32>
    %cst_199 = arith.constant dense<0.000000e+00> : vector<8xf32>
    %338 = vector.multi_reduction <add>, %337, %cst_199 [1] : vector<8x8xf32> to vector<8xf32>
    %339 = vector.shape_cast %338 : vector<8xf32> to vector<8x1xf32>
    %340 = vector.broadcast %339 : vector<8x1xf32> to vector<8x8xf32>
    %341 = arith.divf %337, %340 : vector<8x8xf32>
    %342 = arith.truncf %341 : vector<8x8xf32> to vector<8x8xbf16>
    %343 = arith.truncf %325 : vector<8x8xf32> to vector<8x8xbf16>
    %cst_200 = arith.constant dense<0.000000e+00> : vector<8x8xf32>
    %344 = tpu.matmul %342, %343, %cst_200 {dimension_numbers = #tpu.dot_dimension_numbers<[1], [0], [0], [1], [0, 0, 1, 1], [], []>} : vector<8x8xbf16>, vector<8x8xbf16>, vector<8x8xf32> -> vector<8x8xf32>
    %345 = arith.truncf %344 : vector<8x8xf32> to vector<8x8xbf16>
    %c1_201 = arith.constant 1 : index
    %c0_202 = arith.constant 0 : index
    %c0_203 = arith.constant 0 : index
    %346 = vector.load %arg16[%c1_201, %c0_202, %c0_203] : memref<4x8x32xf32, #tpu.memory_space<vmem>>, vector<1x8x32xf32>
    %347 = vector.shape_cast %346 : vector<1x8x32xf32> to vector<8x32xf32>
    %348 = arith.truncf %347 : vector<8x32xf32> to vector<8x32xbf16>
    %cst_204 = arith.constant dense<0.000000e+00> : vector<8x32xf32>
    %349 = tpu.matmul %345, %348, %cst_204 {dimension_numbers = #tpu.dot_dimension_numbers<[1], [0], [0], [1], [0, 0, 1, 1], [], []>} : vector<8x8xbf16>, vector<8x32xbf16>, vector<8x32xf32> -> vector<8x32xf32>
    %350 = arith.addf %301, %349 : vector<8x32xf32>
    %c2_205 = arith.constant 2 : index
    %c0_206 = arith.constant 0 : index
    %c0_207 = arith.constant 0 : index
    %351 = vector.load %arg12[%c2_205, %c0_206, %c0_207] : memref<4x32x8xf32, #tpu.memory_space<vmem>>, vector<1x32x8xf32>
    %352 = vector.shape_cast %351 : vector<1x32x8xf32> to vector<32x8xf32>
    %353 = arith.truncf %352 : vector<32x8xf32> to vector<32x8xbf16>
    %cst_208 = arith.constant dense<0.000000e+00> : vector<8x8xf32>
    %354 = tpu.matmul %250, %353, %cst_208 {dimension_numbers = #tpu.dot_dimension_numbers<[1], [0], [0], [1], [0, 0, 1, 1], [], []>} : vector<8x32xbf16>, vector<32x8xbf16>, vector<8x8xf32> -> vector<8x8xf32>
    %c2_209 = arith.constant 2 : index
    %c0_210 = arith.constant 0 : index
    %c0_211 = arith.constant 0 : index
    %355 = vector.load %arg13[%c2_209, %c0_210, %c0_211] : memref<4x1x8xf32, #tpu.memory_space<vmem>>, vector<1x1x8xf32>
    %356 = vector.shape_cast %355 : vector<1x1x8xf32> to vector<1x8xf32>
    %357 = vector.broadcast %356 : vector<1x8xf32> to vector<8x8xf32>
    %358 = arith.addf %354, %357 : vector<8x8xf32>
    %c2_212 = arith.constant 2 : index
    %c0_213 = arith.constant 0 : index
    %c0_214 = arith.constant 0 : index
    %359 = vector.load %arg14[%c2_212, %c0_213, %c0_214] : memref<8x32x8xf32, #tpu.memory_space<vmem>>, vector<1x32x8xf32>
    %360 = vector.shape_cast %359 : vector<1x32x8xf32> to vector<32x8xf32>
    %361 = arith.truncf %360 : vector<32x8xf32> to vector<32x8xbf16>
    %cst_215 = arith.constant dense<0.000000e+00> : vector<8x8xf32>
    %362 = tpu.matmul %251, %361, %cst_215 {dimension_numbers = #tpu.dot_dimension_numbers<[1], [0], [0], [1], [0, 0, 1, 1], [], []>} : vector<8x32xbf16>, vector<32x8xbf16>, vector<8x8xf32> -> vector<8x8xf32>
    %c2_216 = arith.constant 2 : index
    %c0_217 = arith.constant 0 : index
    %c0_218 = arith.constant 0 : index
    %363 = vector.load %arg15[%c2_216, %c0_217, %c0_218] : memref<8x1x8xf32, #tpu.memory_space<vmem>>, vector<1x1x8xf32>
    %364 = vector.shape_cast %363 : vector<1x1x8xf32> to vector<1x8xf32>
    %365 = vector.broadcast %364 : vector<1x8xf32> to vector<8x8xf32>
    %366 = arith.addf %362, %365 : vector<8x8xf32>
    %c6_219 = arith.constant 6 : index
    %c0_220 = arith.constant 0 : index
    %c0_221 = arith.constant 0 : index
    %367 = vector.load %arg14[%c6_219, %c0_220, %c0_221] : memref<8x32x8xf32, #tpu.memory_space<vmem>>, vector<1x32x8xf32>
    %368 = vector.shape_cast %367 : vector<1x32x8xf32> to vector<32x8xf32>
    %369 = arith.truncf %368 : vector<32x8xf32> to vector<32x8xbf16>
    %cst_222 = arith.constant dense<0.000000e+00> : vector<8x8xf32>
    %370 = tpu.matmul %251, %369, %cst_222 {dimension_numbers = #tpu.dot_dimension_numbers<[1], [0], [0], [1], [0, 0, 1, 1], [], []>} : vector<8x32xbf16>, vector<32x8xbf16>, vector<8x8xf32> -> vector<8x8xf32>
    %c6_223 = arith.constant 6 : index
    %c0_224 = arith.constant 0 : index
    %c0_225 = arith.constant 0 : index
    %371 = vector.load %arg15[%c6_223, %c0_224, %c0_225] : memref<8x1x8xf32, #tpu.memory_space<vmem>>, vector<1x1x8xf32>
    %372 = vector.shape_cast %371 : vector<1x1x8xf32> to vector<1x8xf32>
    %373 = vector.broadcast %372 : vector<1x8xf32> to vector<8x8xf32>
    %374 = arith.addf %370, %373 : vector<8x8xf32>
    %375 = arith.truncf %358 : vector<8x8xf32> to vector<8x8xbf16>
    %376 = arith.truncf %366 : vector<8x8xf32> to vector<8x8xbf16>
    %cst_226 = arith.constant dense<0.000000e+00> : vector<8x8xf32>
    %377 = tpu.matmul %375, %376, %cst_226 {dimension_numbers = #tpu.dot_dimension_numbers<[1], [1], [0], [0], [0, 0, 1, 0], [], []>} : vector<8x8xbf16>, vector<8x8xbf16>, vector<8x8xf32> -> vector<8x8xf32>
    %cst_227 = arith.constant 0.353553385 : f32
    %378 = vector.broadcast %cst_227 : f32 to vector<8x8xf32>
    %379 = arith.mulf %377, %378 : vector<8x8xf32>
    %cst_228 = arith.constant -1.000000e+09 : f32
    %380 = vector.broadcast %cst_228 : f32 to vector<8x8xf32>
    %381 = arith.select %21, %379, %380 : vector<8x8xi1>, vector<8x8xf32>
    %cst_229 = arith.constant dense<0xFF800000> : vector<8xf32>
    %382 = vector.multi_reduction <maximumf>, %381, %cst_229 [1] : vector<8x8xf32> to vector<8xf32>
    %383 = vector.shape_cast %382 : vector<8xf32> to vector<8x1xf32>
    %384 = vector.broadcast %383 : vector<8x1xf32> to vector<8x8xf32>
    %385 = arith.subf %381, %384 : vector<8x8xf32>
    %386 = math.exp %385 : vector<8x8xf32>
    %cst_230 = arith.constant dense<0.000000e+00> : vector<8xf32>
    %387 = vector.multi_reduction <add>, %386, %cst_230 [1] : vector<8x8xf32> to vector<8xf32>
    %388 = vector.shape_cast %387 : vector<8xf32> to vector<8x1xf32>
    %389 = vector.broadcast %388 : vector<8x1xf32> to vector<8x8xf32>
    %390 = arith.divf %386, %389 : vector<8x8xf32>
    %391 = arith.truncf %390 : vector<8x8xf32> to vector<8x8xbf16>
    %392 = arith.truncf %374 : vector<8x8xf32> to vector<8x8xbf16>
    %cst_231 = arith.constant dense<0.000000e+00> : vector<8x8xf32>
    %393 = tpu.matmul %391, %392, %cst_231 {dimension_numbers = #tpu.dot_dimension_numbers<[1], [0], [0], [1], [0, 0, 1, 1], [], []>} : vector<8x8xbf16>, vector<8x8xbf16>, vector<8x8xf32> -> vector<8x8xf32>
    %394 = arith.truncf %393 : vector<8x8xf32> to vector<8x8xbf16>
    %c2_232 = arith.constant 2 : index
    %c0_233 = arith.constant 0 : index
    %c0_234 = arith.constant 0 : index
    %395 = vector.load %arg16[%c2_232, %c0_233, %c0_234] : memref<4x8x32xf32, #tpu.memory_space<vmem>>, vector<1x8x32xf32>
    %396 = vector.shape_cast %395 : vector<1x8x32xf32> to vector<8x32xf32>
    %397 = arith.truncf %396 : vector<8x32xf32> to vector<8x32xbf16>
    %cst_235 = arith.constant dense<0.000000e+00> : vector<8x32xf32>
    %398 = tpu.matmul %394, %397, %cst_235 {dimension_numbers = #tpu.dot_dimension_numbers<[1], [0], [0], [1], [0, 0, 1, 1], [], []>} : vector<8x8xbf16>, vector<8x32xbf16>, vector<8x32xf32> -> vector<8x32xf32>
    %399 = arith.addf %350, %398 : vector<8x32xf32>
    %c3_236 = arith.constant 3 : index
    %c0_237 = arith.constant 0 : index
    %c0_238 = arith.constant 0 : index
    %400 = vector.load %arg12[%c3_236, %c0_237, %c0_238] : memref<4x32x8xf32, #tpu.memory_space<vmem>>, vector<1x32x8xf32>
    %401 = vector.shape_cast %400 : vector<1x32x8xf32> to vector<32x8xf32>
    %402 = arith.truncf %401 : vector<32x8xf32> to vector<32x8xbf16>
    %cst_239 = arith.constant dense<0.000000e+00> : vector<8x8xf32>
    %403 = tpu.matmul %250, %402, %cst_239 {dimension_numbers = #tpu.dot_dimension_numbers<[1], [0], [0], [1], [0, 0, 1, 1], [], []>} : vector<8x32xbf16>, vector<32x8xbf16>, vector<8x8xf32> -> vector<8x8xf32>
    %c3_240 = arith.constant 3 : index
    %c0_241 = arith.constant 0 : index
    %c0_242 = arith.constant 0 : index
    %404 = vector.load %arg13[%c3_240, %c0_241, %c0_242] : memref<4x1x8xf32, #tpu.memory_space<vmem>>, vector<1x1x8xf32>
    %405 = vector.shape_cast %404 : vector<1x1x8xf32> to vector<1x8xf32>
    %406 = vector.broadcast %405 : vector<1x8xf32> to vector<8x8xf32>
    %407 = arith.addf %403, %406 : vector<8x8xf32>
    %c3_243 = arith.constant 3 : index
    %c0_244 = arith.constant 0 : index
    %c0_245 = arith.constant 0 : index
    %408 = vector.load %arg14[%c3_243, %c0_244, %c0_245] : memref<8x32x8xf32, #tpu.memory_space<vmem>>, vector<1x32x8xf32>
    %409 = vector.shape_cast %408 : vector<1x32x8xf32> to vector<32x8xf32>
    %410 = arith.truncf %409 : vector<32x8xf32> to vector<32x8xbf16>
    %cst_246 = arith.constant dense<0.000000e+00> : vector<8x8xf32>
    %411 = tpu.matmul %251, %410, %cst_246 {dimension_numbers = #tpu.dot_dimension_numbers<[1], [0], [0], [1], [0, 0, 1, 1], [], []>} : vector<8x32xbf16>, vector<32x8xbf16>, vector<8x8xf32> -> vector<8x8xf32>
    %c3_247 = arith.constant 3 : index
    %c0_248 = arith.constant 0 : index
    %c0_249 = arith.constant 0 : index
    %412 = vector.load %arg15[%c3_247, %c0_248, %c0_249] : memref<8x1x8xf32, #tpu.memory_space<vmem>>, vector<1x1x8xf32>
    %413 = vector.shape_cast %412 : vector<1x1x8xf32> to vector<1x8xf32>
    %414 = vector.broadcast %413 : vector<1x8xf32> to vector<8x8xf32>
    %415 = arith.addf %411, %414 : vector<8x8xf32>
    %c7_250 = arith.constant 7 : index
    %c0_251 = arith.constant 0 : index
    %c0_252 = arith.constant 0 : index
    %416 = vector.load %arg14[%c7_250, %c0_251, %c0_252] : memref<8x32x8xf32, #tpu.memory_space<vmem>>, vector<1x32x8xf32>
    %417 = vector.shape_cast %416 : vector<1x32x8xf32> to vector<32x8xf32>
    %418 = arith.truncf %417 : vector<32x8xf32> to vector<32x8xbf16>
    %cst_253 = arith.constant dense<0.000000e+00> : vector<8x8xf32>
    %419 = tpu.matmul %251, %418, %cst_253 {dimension_numbers = #tpu.dot_dimension_numbers<[1], [0], [0], [1], [0, 0, 1, 1], [], []>} : vector<8x32xbf16>, vector<32x8xbf16>, vector<8x8xf32> -> vector<8x8xf32>
    %c7_254 = arith.constant 7 : index
    %c0_255 = arith.constant 0 : index
    %c0_256 = arith.constant 0 : index
    %420 = vector.load %arg15[%c7_254, %c0_255, %c0_256] : memref<8x1x8xf32, #tpu.memory_space<vmem>>, vector<1x1x8xf32>
    %421 = vector.shape_cast %420 : vector<1x1x8xf32> to vector<1x8xf32>
    %422 = vector.broadcast %421 : vector<1x8xf32> to vector<8x8xf32>
    %423 = arith.addf %419, %422 : vector<8x8xf32>
    %424 = arith.truncf %407 : vector<8x8xf32> to vector<8x8xbf16>
    %425 = arith.truncf %415 : vector<8x8xf32> to vector<8x8xbf16>
    %cst_257 = arith.constant dense<0.000000e+00> : vector<8x8xf32>
    %426 = tpu.matmul %424, %425, %cst_257 {dimension_numbers = #tpu.dot_dimension_numbers<[1], [1], [0], [0], [0, 0, 1, 0], [], []>} : vector<8x8xbf16>, vector<8x8xbf16>, vector<8x8xf32> -> vector<8x8xf32>
    %cst_258 = arith.constant 0.353553385 : f32
    %427 = vector.broadcast %cst_258 : f32 to vector<8x8xf32>
    %428 = arith.mulf %426, %427 : vector<8x8xf32>
    %cst_259 = arith.constant -1.000000e+09 : f32
    %429 = vector.broadcast %cst_259 : f32 to vector<8x8xf32>
    %430 = arith.select %21, %428, %429 : vector<8x8xi1>, vector<8x8xf32>
    %cst_260 = arith.constant dense<0xFF800000> : vector<8xf32>
    %431 = vector.multi_reduction <maximumf>, %430, %cst_260 [1] : vector<8x8xf32> to vector<8xf32>
    %432 = vector.shape_cast %431 : vector<8xf32> to vector<8x1xf32>
    %433 = vector.broadcast %432 : vector<8x1xf32> to vector<8x8xf32>
    %434 = arith.subf %430, %433 : vector<8x8xf32>
    %435 = math.exp %434 : vector<8x8xf32>
    %cst_261 = arith.constant dense<0.000000e+00> : vector<8xf32>
    %436 = vector.multi_reduction <add>, %435, %cst_261 [1] : vector<8x8xf32> to vector<8xf32>
    %437 = vector.shape_cast %436 : vector<8xf32> to vector<8x1xf32>
    %438 = vector.broadcast %437 : vector<8x1xf32> to vector<8x8xf32>
    %439 = arith.divf %435, %438 : vector<8x8xf32>
    %440 = arith.truncf %439 : vector<8x8xf32> to vector<8x8xbf16>
    %441 = arith.truncf %423 : vector<8x8xf32> to vector<8x8xbf16>
    %cst_262 = arith.constant dense<0.000000e+00> : vector<8x8xf32>
    %442 = tpu.matmul %440, %441, %cst_262 {dimension_numbers = #tpu.dot_dimension_numbers<[1], [0], [0], [1], [0, 0, 1, 1], [], []>} : vector<8x8xbf16>, vector<8x8xbf16>, vector<8x8xf32> -> vector<8x8xf32>
    %443 = arith.truncf %442 : vector<8x8xf32> to vector<8x8xbf16>
    %c3_263 = arith.constant 3 : index
    %c0_264 = arith.constant 0 : index
    %c0_265 = arith.constant 0 : index
    %444 = vector.load %arg16[%c3_263, %c0_264, %c0_265] : memref<4x8x32xf32, #tpu.memory_space<vmem>>, vector<1x8x32xf32>
    %445 = vector.shape_cast %444 : vector<1x8x32xf32> to vector<8x32xf32>
    %446 = arith.truncf %445 : vector<8x32xf32> to vector<8x32xbf16>
    %cst_266 = arith.constant dense<0.000000e+00> : vector<8x32xf32>
    %447 = tpu.matmul %443, %446, %cst_266 {dimension_numbers = #tpu.dot_dimension_numbers<[1], [0], [0], [1], [0, 0, 1, 1], [], []>} : vector<8x8xbf16>, vector<8x32xbf16>, vector<8x32xf32> -> vector<8x32xf32>
    %448 = arith.addf %399, %447 : vector<8x32xf32>
    %449 = vector.broadcast %249 : vector<1x32xf32> to vector<8x32xf32>
    %450 = arith.addf %448, %449 : vector<8x32xf32>
    %451 = arith.addf %450, %248 : vector<8x32xf32>
    %c0_267 = arith.constant 0 : index
    %c0_268 = arith.constant 0 : index
    %452 = vector.load %arg18[%c0_267, %c0_268] : memref<1x32xf32, #tpu.memory_space<vmem>>, vector<1x32xf32>
    %c0_269 = arith.constant 0 : index
    %c0_270 = arith.constant 0 : index
    %453 = vector.load %arg19[%c0_269, %c0_270] : memref<1x32xf32, #tpu.memory_space<vmem>>, vector<1x32xf32>
    %cst_271 = arith.constant dense<0.000000e+00> : vector<8xf32>
    %454 = vector.multi_reduction <add>, %451, %cst_271 [1] : vector<8x32xf32> to vector<8xf32>
    %455 = vector.shape_cast %454 : vector<8xf32> to vector<8x1xf32>
    %cst_272 = arith.constant 3.200000e+01 : f32
    %456 = vector.broadcast %cst_272 : f32 to vector<8x1xf32>
    %457 = arith.divf %455, %456 : vector<8x1xf32>
    %458 = vector.broadcast %457 : vector<8x1xf32> to vector<8x32xf32>
    %459 = arith.subf %451, %458 : vector<8x32xf32>
    %460 = arith.mulf %459, %459 : vector<8x32xf32>
    %cst_273 = arith.constant dense<0.000000e+00> : vector<8xf32>
    %461 = vector.multi_reduction <add>, %460, %cst_273 [1] : vector<8x32xf32> to vector<8xf32>
    %462 = vector.shape_cast %461 : vector<8xf32> to vector<8x1xf32>
    %cst_274 = arith.constant 3.200000e+01 : f32
    %463 = vector.broadcast %cst_274 : f32 to vector<8x1xf32>
    %464 = arith.divf %462, %463 : vector<8x1xf32>
    %465 = vector.broadcast %457 : vector<8x1xf32> to vector<8x32xf32>
    %466 = arith.subf %451, %465 : vector<8x32xf32>
    %cst_275 = arith.constant 9.99999974E-6 : f32
    %467 = vector.broadcast %cst_275 : f32 to vector<8x1xf32>
    %468 = arith.addf %464, %467 : vector<8x1xf32>
    %469 = math.rsqrt %468 : vector<8x1xf32>
    %470 = vector.broadcast %469 : vector<8x1xf32> to vector<8x32xf32>
    %471 = arith.mulf %466, %470 : vector<8x32xf32>
    %472 = vector.broadcast %452 : vector<1x32xf32> to vector<8x32xf32>
    %473 = arith.mulf %471, %472 : vector<8x32xf32>
    %474 = vector.broadcast %453 : vector<1x32xf32> to vector<8x32xf32>
    %475 = arith.addf %473, %474 : vector<8x32xf32>
    %476 = arith.truncf %475 : vector<8x32xf32> to vector<8x32xbf16>
    %c0_276 = arith.constant 0 : index
    %c0_277 = arith.constant 0 : index
    %477 = vector.load %arg20[%c0_276, %c0_277] : memref<32x64xf32, #tpu.memory_space<vmem>>, vector<32x64xf32>
    %478 = arith.truncf %477 : vector<32x64xf32> to vector<32x64xbf16>
    %cst_278 = arith.constant dense<0.000000e+00> : vector<8x64xf32>
    %479 = tpu.matmul %476, %478, %cst_278 {dimension_numbers = #tpu.dot_dimension_numbers<[1], [0], [0], [1], [0, 0, 1, 1], [], []>} : vector<8x32xbf16>, vector<32x64xbf16>, vector<8x64xf32> -> vector<8x64xf32>
    %c0_279 = arith.constant 0 : index
    %c0_280 = arith.constant 0 : index
    %480 = vector.load %arg21[%c0_279, %c0_280] : memref<1x64xf32, #tpu.memory_space<vmem>>, vector<1x64xf32>
    %481 = vector.broadcast %480 : vector<1x64xf32> to vector<8x64xf32>
    %482 = arith.addf %479, %481 : vector<8x64xf32>
    %cst_281 = arith.constant 0.000000e+00 : f32
    %483 = vector.broadcast %cst_281 : f32 to vector<8x64xf32>
    %484 = arith.maximumf %482, %483 : vector<8x64xf32>
    %485 = arith.truncf %484 : vector<8x64xf32> to vector<8x64xbf16>
    %c0_282 = arith.constant 0 : index
    %c0_283 = arith.constant 0 : index
    %486 = vector.load %arg22[%c0_282, %c0_283] : memref<64x32xf32, #tpu.memory_space<vmem>>, vector<64x32xf32>
    %487 = arith.truncf %486 : vector<64x32xf32> to vector<64x32xbf16>
    %cst_284 = arith.constant dense<0.000000e+00> : vector<8x32xf32>
    %488 = tpu.matmul %485, %487, %cst_284 {dimension_numbers = #tpu.dot_dimension_numbers<[1], [0], [0], [1], [0, 0, 1, 1], [], []>} : vector<8x64xbf16>, vector<64x32xbf16>, vector<8x32xf32> -> vector<8x32xf32>
    %c0_285 = arith.constant 0 : index
    %c0_286 = arith.constant 0 : index
    %489 = vector.load %arg23[%c0_285, %c0_286] : memref<1x32xf32, #tpu.memory_space<vmem>>, vector<1x32xf32>
    %490 = vector.broadcast %489 : vector<1x32xf32> to vector<8x32xf32>
    %491 = arith.addf %488, %490 : vector<8x32xf32>
    %492 = arith.addf %491, %475 : vector<8x32xf32>
    %c0_287 = arith.constant 0 : index
    %c0_288 = arith.constant 0 : index
    %493 = vector.load %arg24[%c0_287, %c0_288] : memref<1x32xf32, #tpu.memory_space<vmem>>, vector<1x32xf32>
    %c0_289 = arith.constant 0 : index
    %c0_290 = arith.constant 0 : index
    %494 = vector.load %arg25[%c0_289, %c0_290] : memref<1x32xf32, #tpu.memory_space<vmem>>, vector<1x32xf32>
    %cst_291 = arith.constant dense<0.000000e+00> : vector<8xf32>
    %495 = vector.multi_reduction <add>, %492, %cst_291 [1] : vector<8x32xf32> to vector<8xf32>
    %496 = vector.shape_cast %495 : vector<8xf32> to vector<8x1xf32>
    %cst_292 = arith.constant 3.200000e+01 : f32
    %497 = vector.broadcast %cst_292 : f32 to vector<8x1xf32>
    %498 = arith.divf %496, %497 : vector<8x1xf32>
    %499 = vector.broadcast %498 : vector<8x1xf32> to vector<8x32xf32>
    %500 = arith.subf %492, %499 : vector<8x32xf32>
    %501 = arith.mulf %500, %500 : vector<8x32xf32>
    %cst_293 = arith.constant dense<0.000000e+00> : vector<8xf32>
    %502 = vector.multi_reduction <add>, %501, %cst_293 [1] : vector<8x32xf32> to vector<8xf32>
    %503 = vector.shape_cast %502 : vector<8xf32> to vector<8x1xf32>
    %cst_294 = arith.constant 3.200000e+01 : f32
    %504 = vector.broadcast %cst_294 : f32 to vector<8x1xf32>
    %505 = arith.divf %503, %504 : vector<8x1xf32>
    %506 = vector.broadcast %498 : vector<8x1xf32> to vector<8x32xf32>
    %507 = arith.subf %492, %506 : vector<8x32xf32>
    %cst_295 = arith.constant 9.99999974E-6 : f32
    %508 = vector.broadcast %cst_295 : f32 to vector<8x1xf32>
    %509 = arith.addf %505, %508 : vector<8x1xf32>
    %510 = math.rsqrt %509 : vector<8x1xf32>
    %511 = vector.broadcast %510 : vector<8x1xf32> to vector<8x32xf32>
    %512 = arith.mulf %507, %511 : vector<8x32xf32>
    %513 = vector.broadcast %493 : vector<1x32xf32> to vector<8x32xf32>
    %514 = arith.mulf %512, %513 : vector<8x32xf32>
    %515 = vector.broadcast %494 : vector<1x32xf32> to vector<8x32xf32>
    %516 = arith.addf %514, %515 : vector<8x32xf32>
    %c0_296 = arith.constant 0 : index
    %c0_297 = arith.constant 0 : index
    %c0_298 = arith.constant 0 : index
    %517 = vector.load %arg26[%c0_296, %c0_297, %c0_298] : memref<1x8x32xf32, #tpu.memory_space<vmem>>, vector<1x8x32xf32>
    %518 = vector.shape_cast %517 : vector<1x8x32xf32> to vector<8x32xf32>
    %519 = vector.shape_cast %516 : vector<8x32xf32> to vector<1x8x32xf32>
    tpu.vector_store %arg26[%c0_296, %c0_297, %c0_298], %519 {strides = array<i32>} : memref<1x8x32xf32, #tpu.memory_space<vmem>>, vector<1x8x32xf32>,
    return
  }
  func.func @transform_0(%arg0: i32) -> (i32, i32, i32) {
    %c0_i32 = arith.constant 0 : i32
    %c0_i32_0 = arith.constant 0 : i32
    %c0_i32_1 = arith.constant 0 : i32
    return %arg0, %c0_i32, %c0_i32_0 : i32, i32, i32
  }
  func.func @transform_1(%arg0: i32) -> (i32, i32, i32) {
    %c0_i32 = arith.constant 0 : i32
    %c0_i32_0 = arith.constant 0 : i32
    %c0_i32_1 = arith.constant 0 : i32
    return %arg0, %c0_i32, %c0_i32_0 : i32, i32, i32
  }
  func.func @transform_2(%arg0: i32) -> (i32, i32, i32) {
    %c0_i32 = arith.constant 0 : i32
    %c0_i32_0 = arith.constant 0 : i32
    %c0_i32_1 = arith.constant 0 : i32
    return %arg0, %c0_i32, %c0_i32_0 : i32, i32, i32
  }
  func.func @transform_3(%arg0: i32) -> (i32, i32, i32) {
    %c0_i32 = arith.constant 0 : i32
    %c0_i32_0 = arith.constant 0 : i32
    %c0_i32_1 = arith.constant 0 : i32
    return %arg0, %c0_i32, %c0_i32_0 : i32, i32, i32
  }
  func.func @transform_4(%arg0: i32) -> (i32, i32, i32) {
    %c0_i32 = arith.constant 0 : i32
    %c0_i32_0 = arith.constant 0 : i32
    %c0_i32_1 = arith.constant 0 : i32
    return %arg0, %c0_i32, %c0_i32_0 : i32, i32, i32
  }
  func.func @transform_5(%arg0: i32) -> (i32, i32, i32) {
    %c0_i32 = arith.constant 0 : i32
    %c0_i32_0 = arith.constant 0 : i32
    %c0_i32_1 = arith.constant 0 : i32
    %c0_i32_2 = arith.constant 0 : i32
    return %c0_i32, %c0_i32_0, %c0_i32_1 : i32, i32, i32
  }
  func.func @transform_6(%arg0: i32) -> (i32, i32, i32) {
    %c0_i32 = arith.constant 0 : i32
    %c0_i32_0 = arith.constant 0 : i32
    %c0_i32_1 = arith.constant 0 : i32
    %c0_i32_2 = arith.constant 0 : i32
    return %c0_i32, %c0_i32_0, %c0_i32_1 : i32, i32, i32
  }
  func.func @transform_7(%arg0: i32) -> (i32, i32, i32) {
    %c0_i32 = arith.constant 0 : i32
    %c0_i32_0 = arith.constant 0 : i32
    %c0_i32_1 = arith.constant 0 : i32
    %c0_i32_2 = arith.constant 0 : i32
    return %c0_i32, %c0_i32_0, %c0_i32_1 : i32, i32, i32
  }
  func.func @transform_8(%arg0: i32) -> (i32, i32) {
    %c0_i32 = arith.constant 0 : i32
    %c0_i32_0 = arith.constant 0 : i32
    %c0_i32_1 = arith.constant 0 : i32
    return %c0_i32, %c0_i32_0 : i32, i32
  }
  func.func @transform_9(%arg0: i32) -> (i32, i32) {
    %c0_i32 = arith.constant 0 : i32
    %c0_i32_0 = arith.constant 0 : i32
    %c0_i32_1 = arith.constant 0 : i32
    return %c0_i32, %c0_i32_0 : i32, i32
  }
  func.func @transform_10(%arg0: i32) -> (i32, i32) {
    %c0_i32 = arith.constant 0 : i32
    %c0_i32_0 = arith.constant 0 : i32
    %c0_i32_1 = arith.constant 0 : i32
    return %c0_i32, %c0_i32_0 : i32, i32
  }
  func.func @transform_11(%arg0: i32) -> (i32, i32, i32) {
    %c0_i32 = arith.constant 0 : i32
    %c0_i32_0 = arith.constant 0 : i32
    %c0_i32_1 = arith.constant 0 : i32
    %c0_i32_2 = arith.constant 0 : i32
    return %c0_i32, %c0_i32_0, %c0_i32_1 : i32, i32, i32
  }
  func.func @transform_12(%arg0: i32) -> (i32, i32, i32) {
    %c0_i32 = arith.constant 0 : i32
    %c0_i32_0 = arith.constant 0 : i32
    %c0_i32_1 = arith.constant 0 : i32
    %c0_i32_2 = arith.constant 0 : i32
    return %c0_i32, %c0_i32_0, %c0_i32_1 : i32, i32, i32
  }
  func.func @transform_13(%arg0: i32) -> (i32, i32, i32) {
    %c0_i32 = arith.constant 0 : i32
    %c0_i32_0 = arith.constant 0 : i32
    %c0_i32_1 = arith.constant 0 : i32
    %c0_i32_2 = arith.constant 0 : i32
    return %c0_i32, %c0_i32_0, %c0_i32_1 : i32, i32, i32
  }
  func.func @transform_14(%arg0: i32) -> (i32, i32, i32) {
    %c0_i32 = arith.constant 0 : i32
    %c0_i32_0 = arith.constant 0 : i32
    %c0_i32_1 = arith.constant 0 : i32
    %c0_i32_2 = arith.constant 0 : i32
    return %c0_i32, %c0_i32_0, %c0_i32_1 : i32, i32, i32
  }
  func.func @transform_15(%arg0: i32) -> (i32, i32, i32) {
    %c0_i32 = arith.constant 0 : i32
    %c0_i32_0 = arith.constant 0 : i32
    %c0_i32_1 = arith.constant 0 : i32
    %c0_i32_2 = arith.constant 0 : i32
    return %c0_i32, %c0_i32_0, %c0_i32_1 : i32, i32, i32
  }
  func.func @transform_16(%arg0: i32) -> (i32, i32) {
    %c0_i32 = arith.constant 0 : i32
    %c0_i32_0 = arith.constant 0 : i32
    %c0_i32_1 = arith.constant 0 : i32
    return %c0_i32, %c0_i32_0 : i32, i32
  }
  func.func @transform_17(%arg0: i32) -> (i32, i32) {
    %c0_i32 = arith.constant 0 : i32
    %c0_i32_0 = arith.constant 0 : i32
    %c0_i32_1 = arith.constant 0 : i32
    return %c0_i32, %c0_i32_0 : i32, i32
  }
  func.func @transform_18(%arg0: i32) -> (i32, i32) {
    %c0_i32 = arith.constant 0 : i32
    %c0_i32_0 = arith.constant 0 : i32
    %c0_i32_1 = arith.constant 0 : i32
    return %c0_i32, %c0_i32_0 : i32, i32
  }
  func.func @transform_19(%arg0: i32) -> (i32, i32) {
    %c0_i32 = arith.constant 0 : i32
    %c0_i32_0 = arith.constant 0 : i32
    %c0_i32_1 = arith.constant 0 : i32
    return %c0_i32, %c0_i32_0 : i32, i32
  }
  func.func @transform_20(%arg0: i32) -> (i32, i32) {
    %c0_i32 = arith.constant 0 : i32
    %c0_i32_0 = arith.constant 0 : i32
    %c0_i32_1 = arith.constant 0 : i32
    return %c0_i32, %c0_i32_0 : i32, i32
  }
  func.func @transform_21(%arg0: i32) -> (i32, i32) {
    %c0_i32 = arith.constant 0 : i32
    %c0_i32_0 = arith.constant 0 : i32
    %c0_i32_1 = arith.constant 0 : i32
    return %c0_i32, %c0_i32_0 : i32, i32
  }
  func.func @transform_22(%arg0: i32) -> (i32, i32) {
    %c0_i32 = arith.constant 0 : i32
    %c0_i32_0 = arith.constant 0 : i32
    %c0_i32_1 = arith.constant 0 : i32
    return %c0_i32, %c0_i32_0 : i32, i32
  }
  func.func @transform_23(%arg0: i32) -> (i32, i32) {
    %c0_i32 = arith.constant 0 : i32
    %c0_i32_0 = arith.constant 0 : i32
    %c0_i32_1 = arith.constant 0 : i32
    return %c0_i32, %c0_i32_0 : i32, i32
  }
  func.func @transform_24(%arg0: i32) -> (i32, i32) {
    %c0_i32 = arith.constant 0 : i32
    %c0_i32_0 = arith.constant 0 : i32
    %c0_i32_1 = arith.constant 0 : i32
    return %c0_i32, %c0_i32_0 : i32, i32
  }
  func.func @transform_25(%arg0: i32) -> (i32, i32, i32) {
    %c0_i32 = arith.constant 0 : i32
    %c0_i32_0 = arith.constant 0 : i32
    %c0_i32_1 = arith.constant 0 : i32
    return %arg0, %c0_i32, %c0_i32_0 : i32, i32, i32
  }
}

</mosaic_0001>

<bundles_post_ra>
// kernel: transformer_forward.9
= control target key start
LH: loop header
LB: loop body
LE: loop exit
PB: predicated region body
PF: predicated region fallthrough
CT: control target
= control target key end

     0   :  { %v136_v3 = vmov 0.0   ;;  %vm137_vm0 = vmmov 0   ;;  %s185_s0 = inlined_call_operand.vmem [shape: f32[16,32], index: 0, kind: input, shape index: {}]   ;;  %s186_s1 = inlined_call_operand.vmem [shape: f32[32,60], index: 1, kind: input, shape index: {}]   ;;  %s187_s2 = inlined_call_operand.vmem [shape: f32[1,60], index: 2, kind: input, shape index: {}]   ;;  %s188_s3 = inlined_call_operand.hbm [shape: f32[16,60], index: 3, kind: output, shape index: {}]  }
   0x1   :  { %v21_v0 = vld [vmem:[%s186_s1 + $0x10] sm:$0xff]  ;;  %v22_v1 = vld [vmem:[%s186_s1 + $0x18] sm:$0xff]  ;;  %v19_v2 = vld [vmem:[%s186_s1] sm:$0xff]  ;;  %101 = vmatprep.subr.bf16.mxu0 %v136_v3  ;;  %105 = vmatprep.mubr.msk.bf16.mxu0 %vm137_vm0, %v136_v3 }
   0x2   :  { %v24_v4 = vpack.c.bf16 %v22_v1, %v21_v0  ;;  %v20_v5 = vld [vmem:[%s186_s1 + $0x8] sm:$0xff] }
   0x3   :  { %8 = vsyncpa [#allocation3], 0  ;;  %v23_v6 = vpack.c.bf16 %v20_v5, %v19_v2  ;;  %v16_v7 = vld [vmem:[%s185_s0] sm:$0xff]  ;;  %v17_v8 = vld [vmem:[%s185_s0 + $0x8] sm:$0xff]  ;;  %vm32_vm1 = vcmask 261120   ;;  %vm77_vm2 = vcmask 490496  }
   0x4   :  { %102 = vmatpush3.bf16.msra.mxu0 %v24_v4  ;;  %v18_v9 = vpack.c.bf16 %v17_v8, %v16_v7  ;;  %v96_v10 = vld [vmem:[%s187_s2] ss:$0 sm:$0xff]  ;;  %s138_s25 = smov [#allocation2]  }
   0x5   :  { %103 = vmatprep.subr.bf16.mxu0 %v136_v3  ;;  %s85_s26 = sshll.u32 %s138_s25, 4  ;;  %s86_s26 = int_to_ptr.vmem [resolvable:$true] %s85_s26 }
   0x6   :  { %s114_s0 = scalar_lea.vmem %s86_s26, 256  ;;  %p119_p1 = scmp.lt.s32.totalorder %s86_s26, %s86_s26 }
   0x7   :  { %p115_p0 = scmp.ne.s32.totalorder %s86_s26, %s114_s0  ;;  %p120_p2 = scmp.lt.s32.totalorder %s114_s0, %s114_s0 }
   0x8   :  { %104 = vmatpush3.bf16.msra.mxu0 %v23_v6 }
   0x9   :  { %p121_p3 = por %p120_p2, %p119_p1 }
   0xb   :  { %106 = vmatmul.mubr.msk.bf16.vlgmr.msra.gmra.mxu0 %vm32_vm1, %v18_v9  ;;  %p122_p4 = pnand %p121_p3, %p115_p0 }
  0xcb   :  { %v70_v11 = vpop.f32.mrf.mxu0 }
  0xcc   :  { %v71_v12 = vadd.f32 %v96_v10, %v70_v11 }
  0xcd   :  { %v107_v13 = vpop.f32.mrf.mxu0 }
  0xce   :  { %78 = vst.msk [vmem:[#allocation2] sm:$0xff] %vm77_vm2, %v71_v12 }
  0xcf   :  { %v73_v14 = vpop.f32.mrf.mxu0 }
  0xd0   :  { %v74_v15 = vadd.f32 %v96_v10, %v73_v14 }
  0xd1   :  { %v108_v16 = vpop.f32.mrf.mxu0 }
  0xd2   :  { %79 = vst.msk [vmem:[#allocation2 + $0x8] sm:$0xff] %vm77_vm2, %v74_v15 }
  0xd3   :  { %125 = shalt.err (!%p122_p4)
}
  0xd4   :  { %s139_s2 = smov 128   ;;  %s140_s27 = smov 8  }
  0xd5   :  { %91 = dma.vmem_to_hbm [thread:$0]  %s86_s26, 256, %s188_s3, [#allocation3], %s139_s2, %s139_s2, %s140_s27  }
  0xd6   :  { %134 = dma.done.wait [#allocation3], 256  }
  0xd7   :  { %135 = vsyncadd [#allocation3], 4294967040 }
  0xd8   :  { %95 = vsyncpa [#allocation3], 1 }

// kernel: transformer_forward.5
= control target key start
LH: loop header
LB: loop body
LE: loop exit
PB: predicated region body
PF: predicated region fallthrough
CT: control target
= control target key end

     0   :  { %s2599_s18 = smov 0   ;;  %s3067_s0 = inlined_call_operand.vmem [shape: f32[2,8,32], index: 0, kind: input, shape index: {}]   ;;  %s3068_s1 = inlined_call_operand.vmem [shape: f32[2,8,1], index: 1, kind: input, shape index: {}]   ;;  %s3069_s2 = inlined_call_operand.vmem [shape: f32[2,1,8], index: 2, kind: input, shape index: {}]   ;;  %s3070_s3 = inlined_call_operand.vmem [shape: f32[12,32,8], index: 3, kind: input, shape index: {}]   ;;  %s3071_s4 = inlined_call_operand.vmem [shape: f32[12,1,8], index: 4, kind: input, shape index: {}]   ;;  %s3072_s5 = inlined_call_operand.vmem [shape: f32[4,8,32], index: 5, kind: input, shape index: {}]   ;;  %s3073_s6 = inlined_call_operand.vmem [shape: f32[1,32], index: 6, kind: input, shape index: {}]   ;;  %s3074_s7 = inlined_call_operand.vmem [shape: f32[1,32], index: 7, kind: input, shape index: {}]   ;;  %s3075_s8 = inlined_call_operand.vmem [shape: f32[1,32], index: 8, kind: input, shape index: {}]   ;;  %s3076_s9 = inlined_call_operand.vmem [shape: f32[32,64], index: 9, kind: input, shape index: {}]   ;;  %s3077_s10 = inlined_call_operand.vmem [shape: f32[1,64], index: 10, kind: input, shape index: {}]   ;;  %s3078_s11 = inlined_call_operand.vmem [shape: f32[64,32], index: 11, kind: input, shape index: {}]   ;;  %s3079_s12 = inlined_call_operand.vmem [shape: f32[1,32], index: 12, kind: input, shape index: {}]   ;;  %s3080_s13 = inlined_call_operand.vmem [shape: f32[1,32], index: 13, kind: input, shape index: {}]   ;;  %s3081_s14 = inlined_call_operand.vmem [shape: f32[1,32], index: 14, kind: input, shape index: {}]   ;;  %s3082_s15 = inlined_call_operand.vmem [shape: f32[2,8,32], index: 15, kind: output, shape index: {}]  }
   0x1 LB: > { %s2106_s19 = sadd.s32 4294967295, %s2514_s18   ;;  %p2110_p0 = scmp.ge.s32.totalorder %s2514_s18, 1  ;;  %s2514_s18 = sphi %s2599_s18, %s25_s18  }
   0x2   : > { %p453_p1 = scmp.lt.s32.totalorder %s2514_s18, 3 }
   0x4   : > { %p454_p2 = pnand %p2110_p0, %p453_p1 }
   0x5   : > { %p506_p3 = scmp.lt.s32.totalorder (!%p454_p2), %s2106_s19, 1 }
   0x6   : > { %457 = sbr.rel (%p454_p2) target bundleno = 4696 (0x1258), region = 80 }
   0xb   : > { %v2119_v0 = vld [vmem:[%s3070_s3 + $0x90] sm:$0xff]  ;;  %v2120_v1 = vld [vmem:[%s3070_s3 + $0x98] sm:$0xff]  ;;  %v2516_v3 = vmov 0.0   ;;  %v2117_v6 = vld [vmem:[%s3070_s3 + $0x80] sm:$0xff]  ;;  %vm2517_vm0 = vmmov 0   ;;  %s3084_s19 = smov (!%p506_p3, %s2106_s19), 1 }
   0xc   : > { %v542_v2 = vld [vmem:[%s3070_s3 + $0x10] sm:$0xff]  ;;  %2296 = vmatprep.subr.bf16.mxu1 %v2516_v3  ;;  %v603_v4 = vpack.c.bf16 %v2120_v1, %v2119_v0  ;;  %2288 = vmatprep.subr.bf16.mxu0 %v2516_v3  ;;  %v543_v5 = vld [vmem:[%s3070_s3 + $0x18] sm:$0xff]  ;;  %v2118_v7 = vld [vmem:[%s3070_s3 + $0x88] sm:$0xff]  ;;  %s2641_s23 = sshll.u32 %s3084_s19, 3  ;;  %vm553_vm1 = vcmask 261120   ;;  %v2518_v15 = vmov 0   ;;  %s516_s17 = scalar_lea.vmem %s3069_s2, %s3084_s19 }
   0xd   : > { %v545_v8 = vpack.c.bf16 %v543_v5, %v542_v2  ;;  %v540_v9 = vld [vmem:[%s3070_s3] sm:$0xff]  ;;  %v541_v10 = vld [vmem:[%s3070_s3 + $0x8] sm:$0xff]  ;;  %2300 = vmatprep.mubr.msk.bf16.mxu1 %vm2517_vm0, %v2516_v3  ;;  %2292 = vmatprep.mubr.msk.bf16.mxu0 %vm2517_vm0, %v2516_v3  ;;  %v602_v11 = vpack.c.bf16 %v2118_v7, %v2117_v6  ;;  %s509_s26 = scalar_lea.vmem %s3067_s0, %s2641_s23  ;;  %s513_s29 = scalar_lea.vmem %s3068_s1, %s2641_s23  ;;  %vm709_vm2 = vcmask 64512   ;;  %v2126_v32 = vld [vmem:[%s3070_s3 + $0x110] sm:$0xff]  ;;  %vm774_vm4 = vcmask 1043456  }
   0xe   : > { %2297 = vmatpush3.bf16.msra.mxu1 %v603_v4  ;;  %v544_v12 = vpack.c.bf16 %v541_v10, %v540_v9  ;;  %v2648_v13 = vld [vmem:[%s509_s26] sm:$0xff]  ;;  %2487 = vset.pattern.permute.xlu0 %v2518_v15  ;;  %v2127_v33 = vld [vmem:[%s3070_s3 + $0x118] sm:$0xff]  ;;  %v2125_v36 = vld [vmem:[%s3070_s3 + $0x108] sm:$0xff]  ;;  %vm1957_vm5 = vcmask 523264   ;;  %s520_s30 = scalar_lea.vmem %s3082_s15, %s2641_s23 }
   0xf   : > { %2289 = vmatpush3.bf16.msra.mxu0 %v545_v8  ;;  %2298 = vmatprep.subr.bf16.mxu1 %v2516_v3  ;;  %v2652_v14 = vpack.c.bf16 %v2648_v13, %v2648_v13  ;;  %v523_v16 = vld [vmem:[%s513_s29] sm:$0xff]  ;;  %v658_v35 = vpack.c.bf16 %v2127_v33, %v2126_v32  ;;  %v2129_v53 = vld [vmem:[%s3071_s4 + $0x8] ss:$0 sm:$0xff]  ;;  %v2135_v61 = vld [vmem:[%s3070_s3 + $0x30] sm:$0xff] }
  0x10   : > { %2290 = vmatprep.subr.bf16.mxu0 %v2516_v3  ;;  %527 = vperm.xlu0 %2487, %v523_v16   ;;  %v2122_v17 = vld [vmem:[%s3071_s4 + $0x4] ss:$0 sm:$0xff]  ;;  %v2115_v21 = vld [vmem:[%s3071_s4] ss:$0 sm:$0xff]  ;;  %v2136_v62 = vld [vmem:[%s3070_s3 + $0x38] sm:$0xff] }
  0x11   : > { %v2124_v34 = vld [vmem:[%s3070_s3 + $0x100] sm:$0xff]  ;;  %v827_v63 = vpack.c.bf16 %v2136_v62, %v2135_v61  ;;  %v2134_v1 = vld [vmem:[%s3070_s3 + $0x28] sm:$0xff]  ;;  %v2142_v5 = vld [vmem:[%s3070_s3 + $0xb0] sm:$0xff] }
  0x12   : > { %2299 = vmatpush3.bf16.msra.mxu1 %v602_v11  ;;  %v657_v37 = vpack.c.bf16 %v2125_v36, %v2124_v34  ;;  %v2114_v38 = vld [vmem:[%s516_s17] ss:$0 sm:$0xff]  ;;  %v2143_v6 = vld [vmem:[%s3070_s3 + $0xb8] sm:$0xff]  ;;  %v2156_v62 = vld [vmem:[%s3072_s5 + $0x8] sm:$0xff] }
  0x13   : > { %2291 = vmatpush3.bf16.msra.mxu0 %v544_v12  ;;  %2312 = vmatprep.subr.bf16.mxu1 %v2516_v3  ;;  %v2133_v0 = vld [vmem:[%s3070_s3 + $0x20] sm:$0xff]  ;;  %v882_v9 = vpack.c.bf16 %v2143_v6, %v2142_v5  ;;  %v2141_v12 = vld [vmem:[%s3070_s3 + $0xa8] sm:$0xff]  ;;  %v2150_v36 = vld [vmem:[%s3070_s3 + $0x138] sm:$0xff] }
  0x14   : > { %2304 = vmatprep.subr.bf16.mxu0 %v2516_v3  ;;  %v826_v2 = vpack.c.bf16 %v2134_v1, %v2133_v0  ;;  %v2140_v11 = vld [vmem:[%s3070_s3 + $0xa0] sm:$0xff] }
  0x15   : > { %2301 = vmatmul.mubr.msk.bf16.vlgmr.msra.gmra.mxu1 %vm553_vm1, %v2652_v14  ;;  %v881_v15 = vpack.c.bf16 %v2141_v12, %v2140_v11 }
  0x16   : > { %2293 = vmatmul.mubr.msk.bf16.vlgmr.msra.gmra.mxu0 %vm553_vm1, %v2652_v14  ;;  %2314 = vmatprep.mubr.msk.bf16.mxu1 %vm2517_vm0, %v2516_v3 }
  0x17   : > { %2308 = vmatprep.mubr.msk.bf16.mxu0 %vm2517_vm0, %v2516_v3  ;;  %2305 = vmatpush3.bf16.msra.mxu0 %v658_v35  ;;  %v2149_v35 = vld [vmem:[%s3070_s3 + $0x130] sm:$0xff] }
  0x18   : > { %2306 = vmatprep.subr.bf16.mxu0 %v2516_v3 }
  0x1b   : > { %2307 = vmatpush3.bf16.msra.mxu0 %v657_v37  ;;  %v2147_v37 = vld [vmem:[%s3070_s3 + $0x120] sm:$0xff] }
  0x1c   : > { %2318 = vmatprep.subr.bf16.mxu0 %v2516_v3 }
  0x1e   : > { %2309 = vmatmul.mubr.msk.bf16.vlgmr.msra.gmra.mxu0 %vm553_vm1, %v2652_v14 }
  0x1f   : > { %2320 = vmatprep.mubr.msk.bf16.mxu0 %vm2517_vm0, %v2516_v3 }
  0x8b   : > { %v528_v39 = vpop.permute.xlu0 %527 }
  0x8c   : > { %v2701_v40 = vmul.f32 %v2114_v38, %v528_v39  ;;  %v937_v38 = vpack.c.bf16 %v2150_v36, %v2149_v35  ;;  %v2148_v39 = vld [vmem:[%s3070_s3 + $0x128] sm:$0xff] }
  0x8e   : > { %vm537_vm3 = vcmp.gt.f32.partialorder %v2701_v40, 0.0 }
  0xd5   : > { %v646_v18 = vpop.f32.mrf.mxu1 }
  0xd6   : > { %v647_v19 = vadd.f32 %v2122_v17, %v646_v18  ;;  %v591_v20 = vpop.f32.mrf.mxu0 }
  0xd7   : > { %v2302_v22 = vpop.f32.mrf.mxu1  ;;  %v592_v27 = vadd.f32 %v2115_v21, %v591_v20 }
  0xd8   : > { %v708_v23 = vpack.c.bf16 %v647_v19, %v647_v19  ;;  %v2294_v24 = vpop.f32.mrf.mxu0 }
  0xd9   : > { %v649_v25 = vpop.f32.mrf.mxu1  ;;  %v707_v31 = vpack.c.bf16 %v592_v27, %v592_v27  ;;  %v2145_v24 = vld [vmem:[%s3071_s4 + $0x5] ss:$0 sm:$0xff]  ;;  %v2138_v27 = vld [vmem:[%s3071_s4 + $0x1] ss:$0 sm:$0xff] }
  0xda   : > { %v714_v26 = vsel %vm709_vm2, %v708_v23, 0  ;;  %v594_v28 = vpop.f32.mrf.mxu0 }
  0xdb   : > { %v2303_v29 = vpop.f32.mrf.mxu1  ;;  %2313 = vmatpush3.bf16.xpose.msra.mxu1 %v714_v26 }
  0xdc   : > { %v2295_v30 = vpop.f32.mrf.mxu0  ;;  %2324 = vmatprep.subr.bf16.mxu1 %v2516_v3 }
  0xde   : > { %v701_v54 = vpop.f32.mrf.mxu0 }
  0xdf   : > { %v702_v55 = vadd.f32 %v2129_v53, %v701_v54 }
  0xe0   : > { %v2310_v56 = vpop.f32.mrf.mxu0 }
  0xe1   : > { %v770_v57 = vpack.c.bf16 %v702_v55, %v702_v55 }
  0xe2   : > { %2315 = vmatmul.mubr.msk.bf16.vlgmr.msra.gmra.mxu1 %vm709_vm2, %v707_v31  ;;  %v704_v58 = vpop.f32.mrf.mxu0 }
  0xe3   : > { %2328 = vmatprep.mubr.msk.bf16.mxu1 %vm2517_vm0, %v2516_v3  ;;  %v776_v59 = vsel %vm774_vm4, %v770_v57, 0  ;;  %2325 = vmatpush3.bf16.msra.mxu1 %v827_v63  ;;  %v1098_v63 = vpack.c.bf16 %v2156_v62, %v2156_v62 }
  0xe4   : > { %v2311_v60 = vpop.f32.mrf.mxu0  ;;  %2319 = vmatpush3.bf16.msra.mxu0 %v776_v59  ;;  %2326 = vmatprep.subr.bf16.mxu1 %v2516_v3 }
  0xe5   : > { %2332 = vmatprep.subr.bf16.mxu0 %v2516_v3  ;;  %v1103_v0 = vsel %vm774_vm4, %v1098_v63, 0 }
  0xe7   : > { %2327 = vmatpush3.bf16.msra.mxu1 %v826_v2  ;;  %v819_v2 = vld [vmem:[%s3072_s5] sm:$0xff] }
  0xe8   : > { %2340 = vmatprep.subr.bf16.mxu1 %v2516_v3 }
  0xea   : > { %2329 = vmatmul.mubr.msk.bf16.vlgmr.msra.gmra.mxu1 %vm553_vm1, %v2652_v14 }
  0xeb   : > { %2344 = vmatprep.mubr.msk.bf16.mxu1 %vm2517_vm0, %v2516_v3  ;;  %2341 = vmatpush3.bf16.msra.mxu1 %v937_v38 }
  0xec   : > { %2342 = vmatprep.subr.bf16.mxu1 %v2516_v3 }
 0x1a2   : > { %v750_v41 = vpop.f32.mrf.mxu1 }
 0x1a3   : > { %v756_v42 = vmul.f32 0.35355338, %v750_v41  ;;  %v936_v41 = vpack.c.bf16 %v2148_v39, %v2147_v37 }
 0x1a4   : > { %v2316_v43 = vpop.f32.mrf.mxu1 }
 0x1a5   : > { %v757_v44 = vsel %vm537_vm3, %v756_v42, -1e+09  ;;  %2343 = vmatpush3.bf16.msra.mxu1 %v936_v41 }
 0x1a6   : > { %v753_v45 = vpop.f32.mrf.mxu1  ;;  %v758_v46 = vsel %vm709_vm2, %v757_v44, -inf  ;;  %2354 = vmatprep.subr.bf16.mxu1 %v2516_v3 }
 0x1a7   : > { %759 = vmax.xlane.f32.xlu0 %v758_v46 }
 0x1a8   : > { %v2317_v47 = vpop.f32.mrf.mxu1  ;;  %2345 = vmatmul.mubr.msk.bf16.vlgmr.msra.gmra.mxu1 %vm553_vm1, %v2652_v14 }
 0x1a9   : > { %2356 = vmatprep.mubr.msk.bf16.mxu1 %vm2517_vm0, %v2516_v3 }
 0x1aa   : > { %v870_v16 = vpop.f32.mrf.mxu1 }
 0x1ab   : > { %v871_v32 = vadd.f32 %v2138_v27, %v870_v16  ;;  %v2167_v16 = vld [vmem:[%s3070_s3 + $0xc8] sm:$0xff] }
 0x1ac   : > { %v2330_v17 = vpop.f32.mrf.mxu1 }
 0x1ad   : > { %v986_v34 = vpack.c.bf16 %v871_v32, %v871_v32 }
 0x1ae   : > { %v873_v18 = vpop.f32.mrf.mxu1 }
 0x1af   : > { %v2161_v18 = vld [vmem:[%s3070_s3 + $0x50] sm:$0xff] }
 0x1b0   : > { %v2331_v19 = vpop.f32.mrf.mxu1 }
 0x1b1   : > { %v2162_v19 = vld [vmem:[%s3070_s3 + $0x58] sm:$0xff] }
 0x230   : > { %v760_v48 = vpop.xlane.xlu0 %759 }
 0x231   : > { %v761_v49 = vsub.f32 %v757_v44, %v760_v48 }
 0x233   : > { %v762_v50 = vmul.f32 1.442695, %v761_v49  ;;  %v2152_v49 = vld [vmem:[%s3071_s4 + $0x9] ss:$0 sm:$0xff] }
 0x235   : > { %2488 = vpow2.f32 %v762_v50 }
 0x242   : > { %v2489_v51 = vpop.eup %2488 }
 0x243   : > { %v764_v52 = vsel %vm709_vm2, %v2489_v51, 0.0 }
 0x244   : > { %765 = vadd.xlane.f32.xlu1 %v764_v52 }
 0x268   : > { %v980_v50 = vpop.f32.mrf.mxu1 }
 0x26a   : > { %v2346_v52 = vpop.f32.mrf.mxu1 }
 0x26c   : > { %v983_v54 = vpop.f32.mrf.mxu1 }
 0x26d   : > { %v2176_v54 = vld [vmem:[%s3070_s3 + $0x158] sm:$0xff] }
 0x26e   : > { %v2347_v56 = vpop.f32.mrf.mxu1 }
 0x2cd   : > { %v766_v4 = vpop.xlane.xlu1 %765 }
 0x2ce   : > { %2490 = vrcp.f32 %v766_v4  ;;  %v820_v4 = vpack.c.bf16 %v819_v2, %v819_v2 }
 0x2db   : > { %v2491_v7 = vpop.eup %2490 }
 0x2dc   : > { %v768_v8 = vmul.f32 %v2491_v7, %v2489_v51  ;;  %v981_v51 = vadd.f32 %v2152_v49, %v980_v50 }
 0x2de   : > { %v769_v10 = vpack.c.bf16 %v768_v8, %v768_v8  ;;  %v1048_v53 = vpack.c.bf16 %v981_v51, %v981_v51  ;;  %v1149_v8 = vsel %vm774_vm4, %v820_v4, 0 }
 0x2e0   : > { %2321 = vmatmul.mubr.msk.bf16.vlgmr.msra.gmra.mxu0 %vm709_vm2, %v769_v10  ;;  %v1053_v55 = vsel %vm774_vm4, %v1048_v53, 0  ;;  %v2169_v10 = vld [vmem:[%s3070_s3 + $0xd8] sm:$0xff]  ;;  %v2175_v53 = vld [vmem:[%s3070_s3 + $0x150] sm:$0xff] }
 0x2e1   : > { %2333 = vmatpush3.bf16.msra.mxu0 %v882_v9  ;;  %2336 = vmatprep.mubr.msk.bf16.mxu0 %vm2517_vm0, %v2516_v3  ;;  %v2168_v9 = vld [vmem:[%s3070_s3 + $0xd0] sm:$0xff]  ;;  %v1307_v56 = vpack.c.bf16 %v2176_v54, %v2175_v53 }
 0x2e2   : > { %2334 = vmatprep.subr.bf16.mxu0 %v2516_v3  ;;  %2355 = vmatpush3.bf16.msra.mxu1 %v1053_v55  ;;  %v1252_v11 = vpack.c.bf16 %v2169_v10, %v2168_v9  ;;  %v2173_v55 = vld [vmem:[%s3070_s3 + $0x140] sm:$0xff] }
 0x2e3   : > { %2366 = vmatprep.subr.bf16.mxu1 %v2516_v3 }
 0x2e5   : > { %2335 = vmatpush3.bf16.msra.mxu0 %v881_v15  ;;  %v2166_v15 = vld [vmem:[%s3070_s3 + $0xc0] sm:$0xff] }
 0x2e6   : > { %2348 = vmatprep.subr.bf16.mxu0 %v2516_v3  ;;  %v1251_v17 = vpack.c.bf16 %v2167_v16, %v2166_v15 }
 0x2e8   : > { %2337 = vmatmul.mubr.msk.bf16.vlgmr.msra.gmra.mxu0 %vm553_vm1, %v2652_v14 }
 0x2e9   : > { %2350 = vmatprep.mubr.msk.bf16.mxu0 %vm2517_vm0, %v2516_v3 }
 0x3a0   : > { %v2752_v20 = vpop.f32.mrf.mxu0 }
 0x3a1   : > { %v818_v12 = vpack.c.bf16 %v2752_v20, %v2752_v20 }
 0x3a2   : > { %v2322_v21 = vpop.f32.mrf.mxu0 }
 0x3a3   : > { %v1197_v21 = vpack.c.bf16 %v2162_v19, %v2161_v18  ;;  %v2182_v18 = vld [vmem:[%s3072_s5 + $0x10] sm:$0xff] }
 0x3a4   : > { %v815_v22 = vpop.f32.mrf.mxu0  ;;  %v1468_v19 = vpack.c.bf16 %v2182_v18, %v2182_v18 }
 0x3a6   : > { %v2323_v23 = vpop.f32.mrf.mxu0 }
 0x3a7   : > { %v2159_v23 = vld [vmem:[%s3070_s3 + $0x40] sm:$0xff] }
 0x3a8   : > { %v925_v25 = vpop.f32.mrf.mxu0 }
 0x3a9   : > { %v926_v26 = vadd.f32 %v2145_v24, %v925_v25  ;;  %v2160_v24 = vld [vmem:[%s3070_s3 + $0x48] sm:$0xff] }
 0x3aa   : > { %v2338_v28 = vpop.f32.mrf.mxu0  ;;  %v1196_v27 = vpack.c.bf16 %v2160_v24, %v2159_v23 }
 0x3ab   : > { %v987_v29 = vpack.c.bf16 %v926_v26, %v926_v26 }
 0x3ac   : > { %v928_v30 = vpop.f32.mrf.mxu0 }
 0x3ad   : > { %v992_v31 = vsel %vm709_vm2, %v987_v29, 0 }
 0x3ae   : > { %v2339_v33 = vpop.f32.mrf.mxu0  ;;  %2349 = vmatpush3.bf16.xpose.msra.mxu0 %v992_v31 }
 0x3af   : > { %2360 = vmatprep.subr.bf16.mxu0 %v2516_v3  ;;  %v2171_v33 = vld [vmem:[%s3071_s4 + $0x6] ss:$0 sm:$0xff] }
 0x3b5   : > { %2351 = vmatmul.mubr.msk.bf16.vlgmr.msra.gmra.mxu0 %vm709_vm2, %v986_v34 }
 0x3b6   : > { %2362 = vmatprep.mubr.msk.bf16.mxu0 %vm2517_vm0, %v2516_v3  ;;  %2361 = vmatpush3.bf16.msra.mxu0 %v1103_v0 }
 0x3b7   : > { %2372 = vmatprep.subr.bf16.mxu0 %v2516_v3 }
 0x475   : > { %v1028_v42 = vpop.f32.mrf.mxu0 }
 0x476   : > { %v1034_v43 = vmul.f32 0.35355338, %v1028_v42 }
 0x477   : > { %v2352_v44 = vpop.f32.mrf.mxu0 }
 0x478   : > { %v1035_v45 = vsel %vm537_vm3, %v1034_v43, -1e+09 }
 0x479   : > { %v1031_v46 = vpop.f32.mrf.mxu0  ;;  %v1036_v47 = vsel %vm709_vm2, %v1035_v45, -inf }
 0x47a   : > { %1037 = vmax.xlane.f32.xlu1 %v1036_v47  ;;  %v2164_v46 = vld [vmem:[%s3071_s4 + $0x2] ss:$0 sm:$0xff] }
 0x47b   : > { %v2353_v48 = vpop.f32.mrf.mxu0 }
 0x503   : > { %v1038_v57 = vpop.xlane.xlu1 %1037 }
 0x504   : > { %v1039_v58 = vsub.f32 %v1035_v45, %v1038_v57  ;;  %v2174_v57 = vld [vmem:[%s3070_s3 + $0x148] sm:$0xff] }
 0x506   : > { %v1040_v59 = vmul.f32 1.442695, %v1039_v58  ;;  %v1306_v58 = vpack.c.bf16 %v2174_v57, %v2173_v55  ;;  %v2196_v55 = vld [vmem:[%s3071_s4 + $0x7] ss:$0 sm:$0xff] }
 0x508   : > { %2492 = vpow2.f32 %v1040_v59 }
 0x515   : > { %v2493_v60 = vpop.eup %2492 }
 0x516   : > { %v1042_v61 = vsel %vm709_vm2, %v2493_v60, 0.0 }
 0x517   : > { %1043 = vadd.xlane.f32.xlu1 %v1042_v61 }
 0x5a0   : > { %v1044_v1 = vpop.xlane.xlu1 %1043 }
 0x5a1   : > { %2494 = vrcp.f32 %v1044_v1 }
 0x5ae   : > { %v2495_v5 = vpop.eup %2494 }
 0x5af   : > { %v1046_v6 = vmul.f32 %v2495_v5, %v2493_v60 }
 0x5b1   : > { %v1047_v7 = vpack.c.bf16 %v1046_v6, %v1046_v6 }
 0x5b3   : > { %2357 = vmatmul.mubr.msk.bf16.vlgmr.msra.gmra.mxu1 %vm709_vm2, %v1047_v7 }
 0x5b4   : > { %2367 = vmatpush3.bf16.msra.mxu1 %v1149_v8  ;;  %2368 = vmatprep.mubr.msk.bf16.mxu1 %vm2517_vm0, %v2516_v3  ;;  %v2178_v8 = vld [vmem:[%s3071_s4 + $0xa] ss:$0 sm:$0xff] }
 0x5b5   : > { %2380 = vmatprep.subr.bf16.mxu1 %v2516_v3 }
 0x5bb   : > { %2369 = vmatmul.mubr.msk.bf16.vlgmr.msra.gmra.mxu1 %vm709_vm2, %v818_v12 }
 0x5bc   : > { %2381 = vmatpush3.bf16.msra.mxu1 %v1252_v11  ;;  %2384 = vmatprep.mubr.msk.bf16.mxu1 %vm2517_vm0, %v2516_v3 }
 0x5bd   : > { %2382 = vmatprep.subr.bf16.mxu1 %v2516_v3 }
 0x5c0   : > { %2383 = vmatpush3.bf16.msra.mxu1 %v1251_v17 }
 0x5c1   : > { %2396 = vmatprep.subr.bf16.mxu1 %v2516_v3 }
 0x5c3   : > { %2385 = vmatmul.mubr.msk.bf16.vlgmr.msra.gmra.mxu1 %vm553_vm1, %v2652_v14 }
 0x5c4   : > { %2398 = vmatprep.mubr.msk.bf16.mxu1 %vm2517_vm0, %v2516_v3 }
 0x673   : > { %v1089_v20 = vpop.f32.mrf.mxu1 }
 0x674   : > { %v1095_v22 = vpack.c.bf16 %v1089_v20, %v1089_v20  ;;  %v1473_v20 = vsel %vm774_vm4, %v1468_v19, 0 }
 0x675   : > { %v2358_v25 = vpop.f32.mrf.mxu1 }
 0x676   : > { %2363 = vmatmul.mubr.msk.bf16.vlgmr.msra.gmra.mxu0 %vm709_vm2, %v1095_v22  ;;  %v2186_v25 = vld [vmem:[%s3070_s3 + $0x70] sm:$0xff] }
 0x677   : > { %v1092_v26 = vpop.f32.mrf.mxu1  ;;  %2373 = vmatpush3.bf16.msra.mxu0 %v1197_v21  ;;  %2376 = vmatprep.mubr.msk.bf16.mxu0 %vm2517_vm0, %v2516_v3 }
 0x678   : > { %2374 = vmatprep.subr.bf16.mxu0 %v2516_v3  ;;  %v2187_v26 = vld [vmem:[%s3070_s3 + $0x78] sm:$0xff] }
 0x679   : > { %v2359_v28 = vpop.f32.mrf.mxu1 }
 0x67a   : > { %v2184_v28 = vld [vmem:[%s3070_s3 + $0x60] sm:$0xff] }
 0x67b   : > { %v2844_v29 = vpop.f32.mrf.mxu1  ;;  %2375 = vmatpush3.bf16.msra.mxu0 %v1196_v27  ;;  %v1522_v27 = vpack.c.bf16 %v2187_v26, %v2186_v25 }
 0x67c   : > { %2388 = vmatprep.subr.bf16.mxu0 %v2516_v3 }
 0x67d   : > { %v2370_v30 = vpop.f32.mrf.mxu1 }
 0x67e   : > { %2377 = vmatmul.mubr.msk.bf16.vlgmr.msra.gmra.mxu0 %vm553_vm1, %v2652_v14  ;;  %v2185_v30 = vld [vmem:[%s3070_s3 + $0x68] sm:$0xff] }
 0x67f   : > { %v1188_v31 = vpop.f32.mrf.mxu1  ;;  %2392 = vmatprep.mubr.msk.bf16.mxu0 %vm2517_vm0, %v2516_v3  ;;  %2389 = vmatpush3.bf16.msra.mxu0 %v1307_v56 }
 0x680   : > { %2390 = vmatprep.subr.bf16.mxu0 %v2516_v3  ;;  %v1521_v31 = vpack.c.bf16 %v2185_v30, %v2184_v28 }
 0x681   : > { %v2371_v32 = vpop.f32.mrf.mxu1 }
 0x682   : > { %v2193_v32 = vld [vmem:[%s3070_s3 + $0xf0] sm:$0xff] }
 0x683   : > { %v1295_v34 = vpop.f32.mrf.mxu1  ;;  %2391 = vmatpush3.bf16.msra.mxu0 %v1306_v58 }
 0x684   : > { %v1296_v35 = vadd.f32 %v2171_v33, %v1295_v34  ;;  %2402 = vmatprep.subr.bf16.mxu0 %v2516_v3  ;;  %v2194_v33 = vld [vmem:[%s3070_s3 + $0xf8] sm:$0xff] }
 0x685   : > { %v2386_v36 = vpop.f32.mrf.mxu1 }
 0x686   : > { %v1357_v37 = vpack.c.bf16 %v1296_v35, %v1296_v35  ;;  %2393 = vmatmul.mubr.msk.bf16.vlgmr.msra.gmra.mxu0 %vm553_vm1, %v2652_v14  ;;  %v1577_v35 = vpack.c.bf16 %v2194_v33, %v2193_v32 }
 0x687   : > { %v1298_v38 = vpop.f32.mrf.mxu1  ;;  %2404 = vmatprep.mubr.msk.bf16.mxu0 %vm2517_vm0, %v2516_v3 }
 0x688   : > { %v1362_v39 = vsel %vm709_vm2, %v1357_v37, 0  ;;  %v2191_v37 = vld [vmem:[%s3070_s3 + $0xe0] sm:$0xff]  ;;  %v2192_v38 = vld [vmem:[%s3070_s3 + $0xe8] sm:$0xff] }
 0x689   : > { %v2387_v41 = vpop.f32.mrf.mxu1  ;;  %2397 = vmatpush3.bf16.xpose.msra.mxu1 %v1362_v39 }
 0x68a   : > { %2408 = vmatprep.subr.bf16.mxu1 %v2516_v3 }
 0x736   : > { %v2856_v42 = vpop.f32.mrf.mxu0 }
 0x738   : > { %v2364_v43 = vpop.f32.mrf.mxu0 }
 0x739   : > { %v1576_v43 = vpack.c.bf16 %v2192_v38, %v2191_v37 }
 0x73a   : > { %v1142_v44 = vpop.f32.mrf.mxu0 }
 0x73c   : > { %v2365_v45 = vpop.f32.mrf.mxu0 }
 0x73e   : > { %v1240_v47 = vpop.f32.mrf.mxu0 }
 0x73f   : > { %v1241_v48 = vadd.f32 %v2164_v46, %v1240_v47 }
 0x740   : > { %v2378_v49 = vpop.f32.mrf.mxu0 }
 0x741   : > { %v1356_v50 = vpack.c.bf16 %v1241_v48, %v1241_v48  ;;  %v1186_v49 = vadd.f32 %v2844_v29, %v2856_v42 }
 0x742   : > { %v1243_v51 = vpop.f32.mrf.mxu0 }
 0x743   : > { %2399 = vmatmul.mubr.msk.bf16.vlgmr.msra.gmra.mxu1 %vm709_vm2, %v1356_v50 }
 0x744   : > { %v2379_v52 = vpop.f32.mrf.mxu0  ;;  %2410 = vmatprep.mubr.msk.bf16.mxu1 %vm2517_vm0, %v2516_v3  ;;  %2409 = vmatpush3.bf16.msra.mxu1 %v1473_v20  ;;  %v2203_v20 = vld [vmem:[%s3071_s4 + $0xb] ss:$0 sm:$0xff] }
 0x745   : > { %2422 = vmatprep.subr.bf16.mxu1 %v2516_v3 }
 0x746   : > { %v1350_v9 = vpop.f32.mrf.mxu0 }
 0x747   : > { %v1351_v10 = vadd.f32 %v2178_v8, %v1350_v9 }
 0x748   : > { %v2394_v11 = vpop.f32.mrf.mxu0 }
 0x749   : > { %v1418_v12 = vpack.c.bf16 %v1351_v10, %v1351_v10 }
 0x74a   : > { %v1353_v15 = vpop.f32.mrf.mxu0 }
 0x74b   : > { %v1423_v16 = vsel %vm774_vm4, %v1418_v12, 0 }
 0x74c   : > { %v2395_v17 = vpop.f32.mrf.mxu0  ;;  %2403 = vmatpush3.bf16.msra.mxu0 %v1423_v16 }
 0x74d   : > { %2414 = vmatprep.subr.bf16.mxu0 %v2516_v3 }
 0x803   : > { %v1398_v59 = vpop.f32.mrf.mxu1 }
 0x804   : > { %v1404_v60 = vmul.f32 0.35355338, %v1398_v59  ;;  %v2189_v59 = vld [vmem:[%s3071_s4 + $0x3] ss:$0 sm:$0xff] }
 0x805   : > { %v2400_v61 = vpop.f32.mrf.mxu1 }
 0x806   : > { %v1405_v62 = vsel %vm537_vm3, %v1404_v60, -1e+09 }
 0x807   : > { %v1401_v63 = vpop.f32.mrf.mxu1  ;;  %v1406_v0 = vsel %vm709_vm2, %v1405_v62, -inf }
 0x808   : > { %1407 = vmax.xlane.f32.xlu1 %v1406_v0  ;;  %v2200_v0 = vld [vmem:[%s3070_s3 + $0x170] sm:$0xff] }
 0x809   : > { %v2401_v1 = vpop.f32.mrf.mxu1 }
 0x80a   : > { %v2201_v1 = vld [vmem:[%s3070_s3 + $0x178] sm:$0xff] }
 0x891   : > { %v1408_v2 = vpop.xlane.xlu1 %1407 }
 0x892   : > { %v1409_v4 = vsub.f32 %v1405_v62, %v1408_v2  ;;  %v2198_v2 = vld [vmem:[%s3070_s3 + $0x160] sm:$0xff] }
 0x894   : > { %v1410_v5 = vmul.f32 1.442695, %v1409_v4  ;;  %v1632_v4 = vpack.c.bf16 %v2201_v1, %v2200_v0 }
 0x896   : > { %2496 = vpow2.f32 %v1410_v5  ;;  %v2199_v5 = vld [vmem:[%s3070_s3 + $0x168] sm:$0xff] }
 0x8a3   : > { %v2497_v6 = vpop.eup %2496 }
 0x8a4   : > { %v1412_v7 = vsel %vm709_vm2, %v2497_v6, 0.0 }
 0x8a5   : > { %1413 = vadd.xlane.f32.xlu1 %v1412_v7 }
 0x92e   : > { %v1414_v21 = vpop.xlane.xlu1 %1413 }
 0x92f   : > { %2498 = vrcp.f32 %v1414_v21 }
 0x93c   : > { %v2499_v22 = vpop.eup %2498 }
 0x93d   : > { %v1416_v23 = vmul.f32 %v2499_v22, %v2497_v6  ;;  %v1631_v6 = vpack.c.bf16 %v2199_v5, %v2198_v2 }
 0x93f   : > { %v1417_v24 = vpack.c.bf16 %v1416_v23, %v1416_v23 }
 0x941   : > { %2405 = vmatmul.mubr.msk.bf16.vlgmr.msra.gmra.mxu0 %vm709_vm2, %v1417_v24 }
 0x942   : > { %2418 = vmatprep.mubr.msk.bf16.mxu0 %vm2517_vm0, %v2516_v3  ;;  %2415 = vmatpush3.bf16.msra.mxu0 %v1522_v27  ;;  %v2207_v27 = vld [vmem:[%s3072_s5 + $0x18] sm:$0xff] }
 0x943   : > { %2416 = vmatprep.subr.bf16.mxu0 %v2516_v3  ;;  %v1793_v28 = vpack.c.bf16 %v2207_v27, %v2207_v27 }
 0x945   : > { %v1798_v30 = vsel %vm774_vm4, %v1793_v28, 0 }
 0x946   : > { %2417 = vmatpush3.bf16.msra.mxu0 %v1521_v31 }
 0x947   : > { %2430 = vmatprep.subr.bf16.mxu0 %v2516_v3 }
 0x949   : > { %2419 = vmatmul.mubr.msk.bf16.vlgmr.msra.gmra.mxu0 %vm553_vm1, %v2652_v14 }
 0x94a   : > { %2434 = vmatprep.mubr.msk.bf16.mxu0 %vm2517_vm0, %v2516_v3  ;;  %2431 = vmatpush3.bf16.msra.mxu0 %v1632_v4 }
 0x94b   : > { %2432 = vmatprep.subr.bf16.mxu0 %v2516_v3 }
 0x94e   : > { %2433 = vmatpush3.bf16.msra.mxu0 %v1631_v6  ;;  %v2210_v6 = vld [vmem:[%s3074_s7] ss:$0 sm:$0xff] }
 0x94f   : > { %2444 = vmatprep.subr.bf16.mxu0 %v2516_v3 }
 0x951   : > { %2435 = vmatmul.mubr.msk.bf16.vlgmr.msra.gmra.mxu0 %vm553_vm1, %v2652_v14 }
 0x952   : > { %2446 = vmatprep.mubr.msk.bf16.mxu0 %vm2517_vm0, %v2516_v3 }
 0xa01   : > { %v1459_v34 = vpop.f32.mrf.mxu0 }
 0xa02   : > { %v1465_v36 = vpack.c.bf16 %v1459_v34, %v1459_v34 }
 0xa03   : > { %v2406_v39 = vpop.f32.mrf.mxu0 }
 0xa04   : > { %2411 = vmatmul.mubr.msk.bf16.vlgmr.msra.gmra.mxu1 %vm709_vm2, %v1465_v36 }
 0xa05   : > { %v1462_v41 = vpop.f32.mrf.mxu0  ;;  %2423 = vmatpush3.bf16.msra.mxu1 %v1577_v35  ;;  %2426 = vmatprep.mubr.msk.bf16.mxu1 %vm2517_vm0, %v2516_v3 }
 0xa06   : > { %2424 = vmatprep.subr.bf16.mxu1 %v2516_v3  ;;  %v2209_v41 = vld [vmem:[%s3073_s6] ss:$0 sm:$0xff] }
 0xa07   : > { %v2407_v44 = vpop.f32.mrf.mxu0 }
 0xa09   : > { %2425 = vmatpush3.bf16.msra.mxu1 %v1576_v43  ;;  %v1565_v45 = vpop.f32.mrf.mxu0 }
 0xa0a   : > { %2438 = vmatprep.subr.bf16.mxu1 %v2516_v3  ;;  %v1566_v42 = vadd.f32 %v2189_v59, %v1565_v45  ;;  %v1881_v59 = vld [vmem:[%s3076_s9 + $0x8] sm:$0xff] }
 0xa0b   : > { %v2420_v46 = vpop.f32.mrf.mxu0 }
 0xa0c   : > { %2427 = vmatmul.mubr.msk.bf16.vlgmr.msra.gmra.mxu1 %vm553_vm1, %v2652_v14  ;;  %v1681_v63 = vpack.c.bf16 %v1566_v42, %v1566_v42  ;;  %v1942_v42 = vld [vmem:[%s3078_s11 + $0x20] sm:$0xff] }
 0xa0d   : > { %2440 = vmatprep.mubr.msk.bf16.mxu1 %vm2517_vm0, %v2516_v3  ;;  %v1568_v47 = vpop.f32.mrf.mxu0 }
 0xa0f   : > { %v2421_v48 = vpop.f32.mrf.mxu0 }
 0xa11   : > { %v1675_v21 = vpop.f32.mrf.mxu0 }
 0xa12   : > { %v1676_v40 = vadd.f32 %v2203_v20, %v1675_v21 }
 0xa13   : > { %v2436_v22 = vpop.f32.mrf.mxu0 }
 0xa14   : > { %v1743_v23 = vpack.c.bf16 %v1676_v40, %v1676_v40 }
 0xa15   : > { %v1678_v24 = vpop.f32.mrf.mxu0 }
 0xa16   : > { %v1748_v25 = vsel %vm774_vm4, %v1743_v23, 0 }
 0xa17   : > { %v2437_v26 = vpop.f32.mrf.mxu0  ;;  %2445 = vmatpush3.bf16.msra.mxu0 %v1748_v25  ;;  %v2214_v25 = vld [vmem:[%s3079_s12] ss:$0 sm:$0xff] }
 0xa18   : > { %2456 = vmatprep.subr.bf16.mxu0 %v2516_v3 }
 0xac4   : > { %v1509_v50 = vpop.f32.mrf.mxu1 }
 0xac5   : > { %v2940_v51 = vadd.f32 %v1509_v50, %v1186_v49 }
 0xac6   : > { %v2412_v52 = vpop.f32.mrf.mxu1 }
 0xac8   : > { %v1512_v53 = vpop.f32.mrf.mxu1 }
 0xaca   : > { %v2413_v54 = vpop.f32.mrf.mxu1 }
 0xacc   : > { %v1620_v56 = vpop.f32.mrf.mxu1 }
 0xacd   : > { %v1621_v57 = vadd.f32 %v2196_v55, %v1620_v56 }
 0xace   : > { %v2428_v58 = vpop.f32.mrf.mxu1 }
 0xacf   : > { %v1682_v60 = vpack.c.bf16 %v1621_v57, %v1621_v57  ;;  %v1883_v57 = vld [vmem:[%s3076_s9 + $0x18] sm:$0xff]  ;;  %v1880_v58 = vld [vmem:[%s3076_s9] sm:$0xff] }
 0xad0   : > { %v1623_v61 = vpop.f32.mrf.mxu1 }
 0xad1   : > { %v1687_v29 = vsel %vm709_vm2, %v1682_v60, 0  ;;  %v1884_v60 = vpack.c.bf16 %v1881_v59, %v1880_v58  ;;  %v1944_v61 = vld [vmem:[%s3078_s11 + $0x30] sm:$0xff] }
 0xad2   : > { %v2429_v62 = vpop.f32.mrf.mxu1  ;;  %2439 = vmatpush3.bf16.xpose.msra.mxu1 %v1687_v29  ;;  %v1945_v29 = vld [vmem:[%s3078_s11 + $0x38] sm:$0xff] }
 0xad3   : > { %2450 = vmatprep.subr.bf16.mxu1 %v2516_v3  ;;  %v1949_v62 = vpack.c.bf16 %v1945_v29, %v1944_v61 }
 0xad9   : > { %2441 = vmatmul.mubr.msk.bf16.vlgmr.msra.gmra.mxu1 %vm709_vm2, %v1681_v63  ;;  %v1943_v63 = vld [vmem:[%s3078_s11 + $0x28] sm:$0xff] }
 0xada   : > { %2452 = vmatprep.mubr.msk.bf16.mxu1 %vm2517_vm0, %v2516_v3  ;;  %2451 = vmatpush3.bf16.msra.mxu1 %v1798_v30  ;;  %v1948_v0 = vpack.c.bf16 %v1943_v63, %v1942_v42 }
 0xadb   : > { %2464 = vmatprep.subr.bf16.mxu1 %v2516_v3 }
 0xb99   : > { %v1723_v7 = vpop.f32.mrf.mxu1 }
 0xb9a   : > { %v1729_v8 = vmul.f32 0.35355338, %v1723_v7 }
 0xb9b   : > { %v2442_v9 = vpop.f32.mrf.mxu1 }
 0xb9c   : > { %v1730_v10 = vsel %vm537_vm3, %v1729_v8, -1e+09  ;;  %v2211_v8 = vld [vmem:[%s3075_s8] ss:$0 sm:$0xff] }
 0xb9d   : > { %v1726_v11 = vpop.f32.mrf.mxu1  ;;  %v1731_v12 = vsel %vm709_vm2, %v1730_v10, -inf }
 0xb9e   : > { %1732 = vmax.xlane.f32.xlu1 %v1731_v12  ;;  %v1940_v12 = vld [vmem:[%s3078_s11 + $0x10] sm:$0xff] }
 0xb9f   : > { %v2443_v15 = vpop.f32.mrf.mxu1 }
 0xba0   : > { %v1941_v15 = vld [vmem:[%s3078_s11 + $0x18] sm:$0xff] }
 0xc27   : > { %v1733_v16 = vpop.xlane.xlu1 %1732 }
 0xc28   : > { %v1734_v17 = vsub.f32 %v1730_v10, %v1733_v16  ;;  %v1947_v16 = vpack.c.bf16 %v1941_v15, %v1940_v12 }
 0xc2a   : > { %v1735_v18 = vmul.f32 1.442695, %v1734_v17  ;;  %v1938_v17 = vld [vmem:[%s3078_s11] sm:$0xff] }
 0xc2c   : > { %2500 = vpow2.f32 %v1735_v18  ;;  %v1939_v18 = vld [vmem:[%s3078_s11 + $0x8] sm:$0xff] }
 0xc39   : > { %v2501_v19 = vpop.eup %2500 }
 0xc3a   : > { %v1737_v14 = vsel %vm709_vm2, %v2501_v19, 0.0 }
 0xc3b   : > { %1738 = vadd.xlane.f32.xlu1 %v1737_v14  ;;  %v2212_v14 = vld [vmem:[%s3077_s10] ss:$0 sm:$0xff] }
 0xcc4   : > { %v1739_v31 = vpop.xlane.xlu1 %1738 }
 0xcc5   : > { %2502 = vrcp.f32 %v1739_v31 }
 0xcd2   : > { %v2503_v32 = vpop.eup %2502 }
 0xcd3   : > { %v1741_v33 = vmul.f32 %v2503_v32, %v2501_v19  ;;  %v1946_v19 = vpack.c.bf16 %v1939_v18, %v1938_v17 }
 0xcd5   : > { %v1742_v34 = vpack.c.bf16 %v1741_v33, %v1741_v33 }
 0xcd7   : > { %2447 = vmatmul.mubr.msk.bf16.vlgmr.msra.gmra.mxu0 %vm709_vm2, %v1742_v34 }
 0xcd8   : > { %2460 = vmatprep.mubr.msk.bf16.mxu0 %vm2517_vm0, %v2516_v3 }
 0xd97   : > { %v1784_v35 = vpop.f32.mrf.mxu0 }
 0xd98   : > { %v1790_v36 = vpack.c.bf16 %v1784_v35, %v1784_v35 }
 0xd99   : > { %v2448_v37 = vpop.f32.mrf.mxu0 }
 0xd9a   : > { %2453 = vmatmul.mubr.msk.bf16.vlgmr.msra.gmra.mxu1 %vm709_vm2, %v1790_v36 }
 0xd9b   : > { %v1787_v38 = vpop.f32.mrf.mxu0  ;;  %2472 = vmatprep.mubr.msk.bf16.mxu1 %vm2517_vm0, %v2516_v3  ;;  %2465 = vmatpush3.bf16.msra.mxu1 %v1949_v62 }
 0xd9c   : > { %2466 = vmatprep.subr.bf16.mxu1 %v2516_v3 }
 0xd9d   : > { %v2449_v39 = vpop.f32.mrf.mxu0 }
 0xd9f   : > { %2467 = vmatpush3.bf16.msra.mxu1 %v1948_v0 }
 0xda0   : > { %2468 = vmatprep.subr.bf16.mxu1 %v2516_v3 }
 0xda3   : > { %2469 = vmatpush3.bf16.msra.mxu1 %v1947_v16 }
 0xda4   : > { %2470 = vmatprep.subr.bf16.mxu1 %v2516_v3 }
 0xda7   : > { %2471 = vmatpush3.bf16.msra.mxu1 %v1946_v19 }
 0xe5a   : > { %v1834_v43 = vpop.f32.mrf.mxu1 }
 0xe5b   : > { %v1840_v44 = vadd.f32 %v1834_v43, %v2940_v51  ;;  %v1882_v51 = vld [vmem:[%s3076_s9 + $0x10] sm:$0xff] }
 0xe5c   : > { %v2454_v45 = vpop.f32.mrf.mxu1 }
 0xe5d   : > { %v1847_v46 = vadd.f32 %v2209_v41, %v1840_v44  ;;  %v2216_v45 = vld [vmem:[%s3080_s13] ss:$0 sm:$0xff] }
 0xe5e   : > { %v1837_v47 = vpop.f32.mrf.mxu1 }
 0xe5f   : > { %v1848_v48 = vadd.f32 %v1847_v46, %v2648_v13  ;;  %v1885_v13 = vpack.c.bf16 %v1883_v57, %v1882_v51  ;;  %v2217_v47 = vld [vmem:[%s3081_s14] ss:$0 sm:$0xff] }
 0xe60   : > { %v2455_v49 = vpop.f32.mrf.mxu1 }
 0xe61   : > { %v1851_v50 = vsel %vm553_vm1, %v1848_v48, 0.0  ;;  %2457 = vmatpush3.bf16.msra.mxu0 %v1885_v13 }
 0xe62   : > { %1852 = vadd.xlane.f32.xlu1 %v1851_v50  ;;  %2458 = vmatprep.subr.bf16.mxu0 %v2516_v3 }
 0xe65   : > { %2459 = vmatpush3.bf16.msra.mxu0 %v1884_v60 }
 0xeeb   : > { %v1853_v52 = vpop.xlane.xlu1 %1852 }
 0xeec   : > { %v1855_v53 = vmul.f32 0.03125, %v1853_v52 }
 0xeee   : > { %v1856_v54 = vsub.f32 %v1848_v48, %v1855_v53 }
 0xef0   : > { %v1857_v55 = vmul.f32 %v1856_v54, %v1856_v54 }
 0xef2   : > { %v1858_v56 = vsel %vm553_vm1, %v1857_v55, 0.0 }
 0xef3   : > { %1859 = vadd.xlane.f32.xlu1 %v1858_v56 }
 0xf7c   : > { %v1860_v1 = vpop.xlane.xlu1 %1859 }
 0xf7d   : > { %v1861_v2 = vmul.f32 0.03125, %v1860_v1 }
 0xf7f   : > { %v1862_v4 = vadd.f32 1e-05, %v1861_v2 }
 0xf81   : > { %2504 = vrsqrt.f32 %v1862_v4 }
 0xf8e   : > { %v2505_v5 = vpop.eup %2504 }
 0xf8f   : > { %v1864_v7 = vmul.f32 %v2505_v5, %v1856_v54 }
 0xf91   : > { %v1871_v9 = vmul.f32 %v2210_v6, %v1864_v7 }
 0xf93   : > { %v1878_v10 = vadd.f32 %v2211_v8, %v1871_v9 }
 0xf95   : > { %v1879_v11 = vpack.c.bf16 %v1878_v10, %v1878_v10 }
 0xf97   : > { %2461 = vmatmul.mubr.msk.bf16.vlgmr.msra.gmra.mxu0 %vm553_vm1, %v1879_v11 }
0x1057   : > { %v1930_v20 = vpop.f32.mrf.mxu0 }
0x1058   : > { %v1931_v21 = vadd.f32 %v2212_v14, %v1930_v20 }
0x1059   : > { %v2462_v40 = vpop.f32.mrf.mxu0 }
0x105a   : > { %v1936_v22 = vmax.f32 %v1931_v21, 0.0 }
0x105b   : > { %v1933_v23 = vpop.f32.mrf.mxu0 }
0x105c   : > { %v1937_v3 = vpack.c.bf16 %v1936_v22, %v1936_v22 }
0x105d   : > { %v2463_v24 = vpop.f32.mrf.mxu0 }
0x105e   : > { %2473 = vmatmul.mubr.msk.bf16.vlgmr.msra.gmra.mxu1 %vm1957_vm5, %v1937_v3 }
0x111e   : > { %v1995_v26 = vpop.f32.mrf.mxu1 }
0x111f   : > { %v1996_v27 = vadd.f32 %v2214_v25, %v1995_v26 }
0x1120   : > { %v2474_v28 = vpop.f32.mrf.mxu1 }
0x1121   : > { %v2001_v30 = vadd.f32 %v1996_v27, %v1878_v10 }
0x1122   : > { %v1998_v31 = vpop.f32.mrf.mxu1 }
0x1123   : > { %v2004_v32 = vsel %vm553_vm1, %v2001_v30, 0.0 }
0x1124   : > { %2005 = vadd.xlane.f32.xlu0 %v2004_v32  ;;  %v2475_v33 = vpop.f32.mrf.mxu1 }
0x11ad   : > { %v2006_v34 = vpop.xlane.xlu0 %2005 }
0x11ae   : > { %v2007_v35 = vmul.f32 0.03125, %v2006_v34 }
0x11b0   : > { %v2008_v36 = vsub.f32 %v2001_v30, %v2007_v35 }
0x11b2   : > { %v2009_v37 = vmul.f32 %v2008_v36, %v2008_v36 }
0x11b4   : > { %v2010_v38 = vsel %vm553_vm1, %v2009_v37, 0.0 }
0x11b5   : > { %2011 = vadd.xlane.f32.xlu1 %v2010_v38 }
0x123e   : > { %v2012_v39 = vpop.xlane.xlu1 %2011 }
0x123f   : > { %v2013_v41 = vmul.f32 0.03125, %v2012_v39 }
0x1241   : > { %v2014_v43 = vadd.f32 1e-05, %v2013_v41 }
0x1243   : > { %2506 = vrsqrt.f32 %v2014_v43 }
0x1250   : > { %v2507_v44 = vpop.eup %2506 }
0x1251   : > { %v2016_v46 = vmul.f32 %v2507_v44, %v2008_v36 }
0x1253   : > { %v2023_v48 = vmul.f32 %v2216_v45, %v2016_v46 }
0x1255   : > { %v2030_v49 = vadd.f32 %v2217_v47, %v2023_v48 }
0x1257   : > { %2031 = vst.msk [vmem:[%s520_s30] sm:$0xff] %vm553_vm1, %v2030_v49 }
0x1258 PF: > { %s25_s18 = sadd.s32 1, %s2514_s18  }
0x1259   : > { %p22_p4 = scmp.ge.s32.totalorder %s25_s18, 4  }
0x125b   :  { %24 = sbr.rel (!%p22_p4) target bundleno = 1 (0x1), region = 141 }

// kernel: transformer_forward.7
= control target key start
LH: loop header
LB: loop body
LE: loop exit
PB: predicated region body
PF: predicated region fallthrough
CT: control target
= control target key end

     0   :  { %s4664_s29 = smov 0   ;;  %s5517_s0 = inlined_call_operand.vmem [shape: f32[2,8,32], index: 0, kind: input, shape index: {}]   ;;  %s5518_s1 = inlined_call_operand.vmem [shape: f32[2,8,32], index: 1, kind: input, shape index: {}]   ;;  %s5519_s2 = inlined_call_operand.vmem [shape: f32[2,1,8], index: 2, kind: input, shape index: {}]   ;;  %s5520_s3 = inlined_call_operand.vmem [shape: f32[2,8,1], index: 3, kind: input, shape index: {}]   ;;  %s5521_s4 = inlined_call_operand.vmem [shape: f32[2,1,8], index: 4, kind: input, shape index: {}]   ;;  %s5522_s5 = inlined_call_operand.vmem [shape: f32[12,32,8], index: 5, kind: input, shape index: {}]   ;;  %s5523_s6 = inlined_call_operand.vmem [shape: f32[12,1,8], index: 6, kind: input, shape index: {}]   ;;  %s5524_s7 = inlined_call_operand.vmem [shape: f32[4,8,32], index: 7, kind: input, shape index: {}]   ;;  %s5525_s8 = inlined_call_operand.vmem [shape: f32[1,32], index: 8, kind: input, shape index: {}]   ;;  %s5526_s9 = inlined_call_operand.vmem [shape: f32[1,32], index: 9, kind: input, shape index: {}]   ;;  %s5527_s10 = inlined_call_operand.vmem [shape: f32[1,32], index: 10, kind: input, shape index: {}]   ;;  %s5528_s11 = inlined_call_operand.vmem [shape: f32[4,32,8], index: 11, kind: input, shape index: {}]   ;;  %s5529_s12 = inlined_call_operand.vmem [shape: f32[4,1,8], index: 12, kind: input, shape index: {}]   ;;  %s5530_s13 = inlined_call_operand.vmem [shape: f32[8,32,8], index: 13, kind: input, shape index: {}]   ;;  %s5531_s14 = inlined_call_operand.vmem [shape: f32[8,1,8], index: 14, kind: input, shape index: {}]   ;;  %s5532_s15 = inlined_call_operand.vmem [shape: f32[4,8,32], index: 15, kind: input, shape index: {}]   ;;  %s5533_s16 = inlined_call_operand.vmem [shape: f32[1,32], index: 16, kind: input, shape index: {}]   ;;  %s5534_s17 = inlined_call_operand.vmem [shape: f32[1,32], index: 17, kind: input, shape index: {}]   ;;  %s5535_s18 = inlined_call_operand.vmem [shape: f32[1,32], index: 18, kind: input, shape index: {}]   ;;  %s5536_s19 = inlined_call_operand.vmem [shape: f32[32,64], index: 19, kind: input, shape index: {}]   ;;  %s5537_s20 = inlined_call_operand.vmem [shape: f32[1,64], index: 20, kind: input, shape index: {}]   ;;  %s5538_s21 = inlined_call_operand.vmem [shape: f32[64,32], index: 21, kind: input, shape index: {}]   ;;  %s5539_s22 = inlined_call_operand.vmem [shape: f32[1,32], index: 22, kind: input, shape index: {}]   ;;  %s5540_s23 = inlined_call_operand.vmem [shape: f32[1,32], index: 23, kind: input, shape index: {}]   ;;  %s5541_s24 = inlined_call_operand.vmem [shape: f32[1,32], index: 24, kind: input, shape index: {}]   ;;  %s5542_s25 = inlined_call_operand.vmem [shape: f32[2,8,32], index: 25, kind: output, shape index: {}]  }
   0x1   :  { %5547 = sst [smem:[#allocation2_spill]] %s5517_s0 }
   0x2   :  { %5548 = sst [smem:[#allocation3_spill]] %s5518_s1 }
   0x3   :  { %5549 = sst [smem:[#allocation4_spill]] %s5519_s2 }
   0x4   :  { %5550 = sst [smem:[#allocation5_spill]] %s5520_s3 }
   0x5   :  { %5551 = sst [smem:[#allocation6_spill]] %s5521_s4 }
   0x6   :  { %5552 = sst [smem:[#allocation7_spill]] %s5522_s5 }
   0x7   :  { %5553 = sst [smem:[#allocation8_spill]] %s5523_s6 }
   0x8   :  { %5554 = sst [smem:[#allocation9_spill]] %s5524_s7 }
   0x9   :  { %5555 = sst [smem:[#allocation10_spill]] %s5525_s8 }
   0xa   :  { %5556 = sst [smem:[#allocation11_spill]] %s5526_s9 }
   0xb LB: > { %s3782_s2 = sadd.s32 4294967295, %s4529_s29   ;;  %p3786_p0 = scmp.ge.s32.totalorder %s4529_s29, 1  ;;  %s4529_s29 = sphi %s4664_s29, %s35_s29  }
   0xc   : > { %p720_p1 = scmp.lt.s32.totalorder %s4529_s29, 3 }
   0xe   : > { %p721_p2 = pnand %p3786_p0, %p720_p1 }
   0xf   : > { %s5557_s7 = sld [smem:[#allocation7_spill]] (!%p721_p2)  ;;  %p800_p3 = scmp.lt.s32.totalorder (!%p721_p2), %s3782_s2, 1 }
  0x10   : > { %724 = sbr.rel (%p721_p2) target bundleno = 8668 (0x21dc), region = 120  ;;  %s5558_s4 = sld [smem:[#allocation2_spill]] (!%p721_p2) }
  0x11   : > { %s5559_s0 = sld [smem:[#allocation8_spill]] (!%p721_p2) }
  0x12   : > { %s5560_s3 = sld [smem:[#allocation4_spill]] (!%p721_p2) }
  0x13   : > { %s5563_s9 = sld [smem:[#allocation9_spill]] (!%p721_p2) }
  0x14   : > { %s5564_s8 = sld [smem:[#allocation10_spill]] (!%p721_p2) }
  0x15   : > { %v3796_v0 = vld [vmem:[%s5557_s7 + $0x90] sm:$0xff]  ;;  %v3797_v1 = vld [vmem:[%s5557_s7 + $0x98] sm:$0xff]  ;;  %v4531_v3 = vmov 0.0   ;;  %v3794_v6 = vld [vmem:[%s5557_s7 + $0x80] sm:$0xff]  ;;  %vm4532_vm0 = vmmov 0   ;;  %s5570_s2 = smov (!%p800_p3, %s3782_s2), 1  ;;  %v825_v37 = vlaneseq }
  0x16   : > { %v858_v2 = vld [vmem:[%s5557_s7 + $0x10] sm:$0xff]  ;;  %4125 = vmatprep.subr.bf16.mxu1 %v4531_v3  ;;  %v919_v4 = vpack.c.bf16 %v3797_v1, %v3796_v0  ;;  %4117 = vmatprep.subr.bf16.mxu0 %v4531_v3  ;;  %v859_v5 = vld [vmem:[%s5557_s7 + $0x18] sm:$0xff]  ;;  %v3795_v7 = vld [vmem:[%s5557_s7 + $0x88] sm:$0xff]  ;;  %s4706_s1 = sshll.u32 %s5570_s2, 3  ;;  %vm869_vm1 = vcmask 261120   ;;  %vm1025_vm2 = vcmask 64512  }
  0x17   : > { %v861_v8 = vpack.c.bf16 %v859_v5, %v858_v2  ;;  %v856_v9 = vld [vmem:[%s5557_s7] sm:$0xff]  ;;  %v857_v10 = vld [vmem:[%s5557_s7 + $0x8] sm:$0xff]  ;;  %4129 = vmatprep.mubr.msk.bf16.mxu1 %vm4532_vm0, %v4531_v3  ;;  %4121 = vmatprep.mubr.msk.bf16.mxu0 %vm4532_vm0, %v4531_v3  ;;  %v918_v11 = vpack.c.bf16 %v3795_v7, %v3794_v6  ;;  %s803_s28 = scalar_lea.vmem %s5558_s4, %s4706_s1  ;;  %v4533_v30 = vmov 0   ;;  %v3803_v31 = vld [vmem:[%s5557_s7 + $0x110] sm:$0xff]  ;;  %v826_v39 = vshrl.u32 %v825_v37, 7  ;;  %s5565_s4 = sld [smem:[#allocation3_spill]] }
  0x18   : > { %4126 = vmatpush3.bf16.msra.mxu1 %v919_v4  ;;  %v860_v12 = vpack.c.bf16 %v857_v10, %v856_v9  ;;  %v4713_v13 = vld [vmem:[%s803_s28] sm:$0xff]  ;;  %4484 = vset.pattern.permute.xlu0 %v4533_v30  ;;  %v3804_v32 = vld [vmem:[%s5557_s7 + $0x118] sm:$0xff]  ;;  %v3802_v35 = vld [vmem:[%s5557_s7 + $0x108] sm:$0xff]  ;;  %s810_s26 = scalar_lea.vmem %s5560_s3, %s5570_s2  ;;  %v828_v42 = vand.u32 127, %v825_v37  ;;  %vm1090_vm7 = vcmask 1043456   ;;  %s5566_s28 = sld [smem:[#allocation11_spill]] }
  0x19   : > { %4118 = vmatpush3.bf16.msra.mxu0 %v861_v8  ;;  %4127 = vmatprep.subr.bf16.mxu1 %v4531_v3  ;;  %v4717_v14 = vpack.c.bf16 %v4713_v13, %v4713_v13  ;;  %v3799_v15 = vld [vmem:[%s5559_s0 + $0x4] ss:$0 sm:$0xff]  ;;  %v3792_v19 = vld [vmem:[%s5559_s0] ss:$0 sm:$0xff]  ;;  %v974_v34 = vpack.c.bf16 %v3804_v32, %v3803_v31  ;;  %v835_v40 = vsub.s32 0, %v826_v39  ;;  %v3812_v1 = vld [vmem:[%s5557_s7 + $0x30] sm:$0xff] }
  0x1a   : > { %4119 = vmatprep.subr.bf16.mxu0 %v4531_v3  ;;  %v3801_v33 = vld [vmem:[%s5557_s7 + $0x100] sm:$0xff]  ;;  %vm831_vm4 = vcmp.le.s32.totalorder %v828_v42, %v826_v39  ;;  %v3806_v57 = vld [vmem:[%s5559_s0 + $0x8] ss:$0 sm:$0xff]  ;;  %v3813_v2 = vld [vmem:[%s5557_s7 + $0x38] sm:$0xff]  ;;  %vm3612_vm9 = vcmask 523264  }
  0x1b   : > { %v973_v36 = vpack.c.bf16 %v3802_v35, %v3801_v33  ;;  %v829_v38 = vld [vmem:[%s810_s26] sm:$0x1]  ;;  %v1143_v4 = vpack.c.bf16 %v3813_v2, %v3812_v1  ;;  %v3811_v6 = vld [vmem:[%s5557_s7 + $0x28] sm:$0xff]  ;;  %v3819_v9 = vld [vmem:[%s5557_s7 + $0xb0] sm:$0xff] }
  0x1c   : > { %4128 = vmatpush3.bf16.msra.mxu1 %v918_v11  ;;  %vm830_vm3 = vcmp.gt.f32.partialorder %v829_v38, 0.0  ;;  %v3810_v5 = vld [vmem:[%s5557_s7 + $0x20] sm:$0xff]  ;;  %v3820_v10 = vld [vmem:[%s5557_s7 + $0xb8] sm:$0xff]  ;;  %v3826_v39 = vld [vmem:[%s5557_s7 + $0x130] sm:$0xff] }
  0x1d   : > { %4120 = vmatpush3.bf16.msra.mxu0 %v860_v12  ;;  %4141 = vmatprep.subr.bf16.mxu1 %v4531_v3  ;;  %v832_v41 = vsel %vm830_vm3, 1, %v4533_v30  ;;  %v1142_v7 = vpack.c.bf16 %v3811_v6, %v3810_v5  ;;  %v3815_v31 = vld [vmem:[%s5559_s0 + $0x1] ss:$0 sm:$0xff]  ;;  %v3833_v2 = vld [vmem:[%s5563_s9 + $0x8] sm:$0xff] }
  0x1e   : > { %4133 = vmatprep.subr.bf16.mxu0 %v4531_v3  ;;  %v836_v43 = vrot.slane %v832_v41, %v835_v40  ;;  %v3827_v40 = vld [vmem:[%s5557_s7 + $0x138] sm:$0xff]  ;;  %v3824_v41 = vld [vmem:[%s5557_s7 + $0x120] sm:$0xff] }
  0x1f   : > { %4130 = vmatmul.mubr.msk.bf16.vlgmr.msra.gmra.mxu1 %vm869_vm1, %v4717_v14  ;;  %v1253_v42 = vpack.c.bf16 %v3827_v40, %v3826_v39 }
  0x20   : > { %4122 = vmatmul.mubr.msk.bf16.vlgmr.msra.gmra.mxu0 %vm869_vm1, %v4717_v14  ;;  %4143 = vmatprep.mubr.msk.bf16.mxu1 %vm4532_vm0, %v4531_v3  ;;  %vm837_vm5 = vcmp.eq.s32.totalorder %v836_v43, 1  ;;  %v3825_v43 = vld [vmem:[%s5557_s7 + $0x128] sm:$0xff] }
  0x21   : > { %4137 = vmatprep.mubr.msk.bf16.mxu0 %vm4532_vm0, %v4531_v3  ;;  %4134 = vmatpush3.bf16.msra.mxu0 %v974_v34  ;;  %vm4762_vm6 = vmand %vm837_vm5, %vm831_vm4 }
  0x22   : > { %4135 = vmatprep.subr.bf16.mxu0 %v4531_v3 }
  0x25   : > { %4136 = vmatpush3.bf16.msra.mxu0 %v973_v36 }
  0x26   : > { %4147 = vmatprep.subr.bf16.mxu0 %v4531_v3 }
  0x28   : > { %4138 = vmatmul.mubr.msk.bf16.vlgmr.msra.gmra.mxu0 %vm869_vm1, %v4717_v14 }
  0x29   : > { %4149 = vmatprep.mubr.msk.bf16.mxu0 %vm4532_vm0, %v4531_v3 }
  0xdf   : > { %v962_v16 = vpop.f32.mrf.mxu1 }
  0xe0   : > { %v963_v17 = vadd.f32 %v3799_v15, %v962_v16  ;;  %v907_v18 = vpop.f32.mrf.mxu0  ;;  %v1198_v15 = vpack.c.bf16 %v3820_v10, %v3819_v9 }
  0xe1   : > { %v4131_v20 = vpop.f32.mrf.mxu1  ;;  %v908_v25 = vadd.f32 %v3792_v19, %v907_v18  ;;  %v3818_v18 = vld [vmem:[%s5557_s7 + $0xa8] sm:$0xff] }
  0xe2   : > { %v1024_v21 = vpack.c.bf16 %v963_v17, %v963_v17  ;;  %v4123_v22 = vpop.f32.mrf.mxu0  ;;  %v3817_v17 = vld [vmem:[%s5557_s7 + $0xa0] sm:$0xff] }
  0xe3   : > { %v965_v23 = vpop.f32.mrf.mxu1  ;;  %v1023_v29 = vpack.c.bf16 %v908_v25, %v908_v25  ;;  %v1197_v19 = vpack.c.bf16 %v3818_v18, %v3817_v17 }
  0xe4   : > { %v1030_v24 = vsel %vm1025_vm2, %v1024_v21, 0  ;;  %v910_v26 = vpop.f32.mrf.mxu0 }
  0xe5   : > { %v4132_v27 = vpop.f32.mrf.mxu1  ;;  %4142 = vmatpush3.bf16.xpose.msra.mxu1 %v1030_v24 }
  0xe6   : > { %v4124_v28 = vpop.f32.mrf.mxu0  ;;  %4153 = vmatprep.subr.bf16.mxu1 %v4531_v3 }
  0xe7   : > { %v3822_v28 = vld [vmem:[%s5559_s0 + $0x5] ss:$0 sm:$0xff] }
  0xe8   : > { %v1017_v58 = vpop.f32.mrf.mxu0 }
  0xe9   : > { %v1018_v59 = vadd.f32 %v3806_v57, %v1017_v58 }
  0xea   : > { %v4139_v60 = vpop.f32.mrf.mxu0 }
  0xeb   : > { %v1086_v61 = vpack.c.bf16 %v1018_v59, %v1018_v59 }
  0xec   : > { %4144 = vmatmul.mubr.msk.bf16.vlgmr.msra.gmra.mxu1 %vm1025_vm2, %v1023_v29  ;;  %v1020_v62 = vpop.f32.mrf.mxu0 }
  0xed   : > { %4157 = vmatprep.mubr.msk.bf16.mxu1 %vm4532_vm0, %v4531_v3  ;;  %v1092_v63 = vsel %vm1090_vm7, %v1086_v61, 0  ;;  %4154 = vmatpush3.bf16.msra.mxu1 %v1143_v4  ;;  %v1414_v4 = vpack.c.bf16 %v3833_v2, %v3833_v2 }
  0xee   : > { %v4140_v0 = vpop.f32.mrf.mxu0  ;;  %4148 = vmatpush3.bf16.msra.mxu0 %v1092_v63  ;;  %4155 = vmatprep.subr.bf16.mxu1 %v4531_v3 }
  0xef   : > { %4161 = vmatprep.subr.bf16.mxu0 %v4531_v3  ;;  %v1419_v5 = vsel %vm1090_vm7, %v1414_v4, 0 }
  0xf1   : > { %4156 = vmatpush3.bf16.msra.mxu1 %v1142_v7  ;;  %v1135_v7 = vld [vmem:[%s5563_s9] sm:$0xff] }
  0xf2   : > { %4169 = vmatprep.subr.bf16.mxu1 %v4531_v3 }
  0xf4   : > { %4158 = vmatmul.mubr.msk.bf16.vlgmr.msra.gmra.mxu1 %vm869_vm1, %v4717_v14 }
  0xf5   : > { %4173 = vmatprep.mubr.msk.bf16.mxu1 %vm4532_vm0, %v4531_v3  ;;  %4170 = vmatpush3.bf16.msra.mxu1 %v1253_v42 }
  0xf6   : > { %4171 = vmatprep.subr.bf16.mxu1 %v4531_v3 }
 0x1ac   : > { %v1066_v44 = vpop.f32.mrf.mxu1 }
 0x1ad   : > { %v1072_v46 = vmul.f32 0.35355338, %v1066_v44  ;;  %v1252_v44 = vpack.c.bf16 %v3825_v43, %v3824_v41 }
 0x1ae   : > { %v4145_v47 = vpop.f32.mrf.mxu1 }
 0x1af   : > { %v1073_v48 = vsel %vm4762_vm6, %v1072_v46, -1e+09  ;;  %4172 = vmatpush3.bf16.msra.mxu1 %v1252_v44 }
 0x1b0   : > { %v1069_v49 = vpop.f32.mrf.mxu1  ;;  %v1074_v50 = vsel %vm1025_vm2, %v1073_v48, -inf  ;;  %4183 = vmatprep.subr.bf16.mxu1 %v4531_v3 }
 0x1b1   : > { %1075 = vmax.xlane.f32.xlu0 %v1074_v50 }
 0x1b2   : > { %v4146_v51 = vpop.f32.mrf.mxu1  ;;  %4174 = vmatmul.mubr.msk.bf16.vlgmr.msra.gmra.mxu1 %vm869_vm1, %v4717_v14 }
 0x1b3   : > { %4185 = vmatprep.mubr.msk.bf16.mxu1 %vm4532_vm0, %v4531_v3 }
 0x1b4   : > { %v1186_v20 = vpop.f32.mrf.mxu1 }
 0x1b5   : > { %v1187_v36 = vadd.f32 %v3815_v31, %v1186_v20  ;;  %v3844_v20 = vld [vmem:[%s5557_s7 + $0xc8] sm:$0xff] }
 0x1b6   : > { %v4159_v21 = vpop.f32.mrf.mxu1 }
 0x1b7   : > { %v1302_v38 = vpack.c.bf16 %v1187_v36, %v1187_v36 }
 0x1b8   : > { %v1189_v22 = vpop.f32.mrf.mxu1 }
 0x1b9   : > { %v3838_v22 = vld [vmem:[%s5557_s7 + $0x50] sm:$0xff] }
 0x1ba   : > { %v4160_v23 = vpop.f32.mrf.mxu1 }
 0x1bb   : > { %v3839_v23 = vld [vmem:[%s5557_s7 + $0x58] sm:$0xff] }
 0x23a   : > { %v1076_v52 = vpop.xlane.xlu0 %1075 }
 0x23b   : > { %v1077_v53 = vsub.f32 %v1073_v48, %v1076_v52 }
 0x23d   : > { %v1078_v54 = vmul.f32 1.442695, %v1077_v53  ;;  %v3829_v53 = vld [vmem:[%s5559_s0 + $0x9] ss:$0 sm:$0xff] }
 0x23f   : > { %4485 = vpow2.f32 %v1078_v54 }
 0x24c   : > { %v4486_v55 = vpop.eup %4485 }
 0x24d   : > { %v1080_v56 = vsel %vm1025_vm2, %v4486_v55, 0.0 }
 0x24e   : > { %1081 = vadd.xlane.f32.xlu0 %v1080_v56 }
 0x272   : > { %v1296_v54 = vpop.f32.mrf.mxu1 }
 0x274   : > { %v4175_v56 = vpop.f32.mrf.mxu1 }
 0x276   : > { %v1299_v58 = vpop.f32.mrf.mxu1 }
 0x277   : > { %v3853_v58 = vld [vmem:[%s5557_s7 + $0x158] sm:$0xff] }
 0x278   : > { %v4176_v60 = vpop.f32.mrf.mxu1 }
 0x2d7   : > { %v1082_v8 = vpop.xlane.xlu0 %1081 }
 0x2d8   : > { %4487 = vrcp.f32 %v1082_v8  ;;  %v1136_v8 = vpack.c.bf16 %v1135_v7, %v1135_v7 }
 0x2e5   : > { %v4488_v11 = vpop.eup %4487 }
 0x2e6   : > { %v1084_v12 = vmul.f32 %v4488_v11, %v4486_v55  ;;  %v1297_v55 = vadd.f32 %v3829_v53, %v1296_v54 }
 0x2e8   : > { %v1085_v16 = vpack.c.bf16 %v1084_v12, %v1084_v12  ;;  %v1364_v57 = vpack.c.bf16 %v1297_v55, %v1297_v55  ;;  %v1465_v12 = vsel %vm1090_vm7, %v1136_v8, 0 }
 0x2ea   : > { %4150 = vmatmul.mubr.msk.bf16.vlgmr.msra.gmra.mxu0 %vm1025_vm2, %v1085_v16  ;;  %v1369_v59 = vsel %vm1090_vm7, %v1364_v57, 0  ;;  %v3846_v16 = vld [vmem:[%s5557_s7 + $0xd8] sm:$0xff]  ;;  %v3852_v57 = vld [vmem:[%s5557_s7 + $0x150] sm:$0xff] }
 0x2eb   : > { %4162 = vmatpush3.bf16.msra.mxu0 %v1198_v15  ;;  %4165 = vmatprep.mubr.msk.bf16.mxu0 %vm4532_vm0, %v4531_v3  ;;  %v3845_v15 = vld [vmem:[%s5557_s7 + $0xd0] sm:$0xff]  ;;  %v1623_v60 = vpack.c.bf16 %v3853_v58, %v3852_v57 }
 0x2ec   : > { %4163 = vmatprep.subr.bf16.mxu0 %v4531_v3  ;;  %4184 = vmatpush3.bf16.msra.mxu1 %v1369_v59  ;;  %v1568_v17 = vpack.c.bf16 %v3846_v16, %v3845_v15  ;;  %v3850_v59 = vld [vmem:[%s5557_s7 + $0x140] sm:$0xff] }
 0x2ed   : > { %4195 = vmatprep.subr.bf16.mxu1 %v4531_v3 }
 0x2ef   : > { %4164 = vmatpush3.bf16.msra.mxu0 %v1197_v19  ;;  %v3843_v19 = vld [vmem:[%s5557_s7 + $0xc0] sm:$0xff] }
 0x2f0   : > { %4177 = vmatprep.subr.bf16.mxu0 %v4531_v3  ;;  %v1567_v21 = vpack.c.bf16 %v3844_v20, %v3843_v19 }
 0x2f2   : > { %4166 = vmatmul.mubr.msk.bf16.vlgmr.msra.gmra.mxu0 %vm869_vm1, %v4717_v14 }
 0x2f3   : > { %4179 = vmatprep.mubr.msk.bf16.mxu0 %vm4532_vm0, %v4531_v3 }
 0x3aa   : > { %v4814_v24 = vpop.f32.mrf.mxu0 }
 0x3ab   : > { %v1134_v18 = vpack.c.bf16 %v4814_v24, %v4814_v24 }
 0x3ac   : > { %v4151_v25 = vpop.f32.mrf.mxu0 }
 0x3ad   : > { %v1513_v25 = vpack.c.bf16 %v3839_v23, %v3838_v22  ;;  %v3859_v22 = vld [vmem:[%s5563_s9 + $0x10] sm:$0xff] }
 0x3ae   : > { %v1131_v26 = vpop.f32.mrf.mxu0  ;;  %v1784_v23 = vpack.c.bf16 %v3859_v22, %v3859_v22 }
 0x3b0   : > { %v4152_v27 = vpop.f32.mrf.mxu0 }
 0x3b1   : > { %v3836_v27 = vld [vmem:[%s5557_s7 + $0x40] sm:$0xff] }
 0x3b2   : > { %v1241_v29 = vpop.f32.mrf.mxu0 }
 0x3b3   : > { %v1242_v30 = vadd.f32 %v3822_v28, %v1241_v29  ;;  %v3837_v28 = vld [vmem:[%s5557_s7 + $0x48] sm:$0xff] }
 0x3b4   : > { %v4167_v32 = vpop.f32.mrf.mxu0  ;;  %v1512_v31 = vpack.c.bf16 %v3837_v28, %v3836_v27 }
 0x3b5   : > { %v1303_v33 = vpack.c.bf16 %v1242_v30, %v1242_v30 }
 0x3b6   : > { %v1244_v34 = vpop.f32.mrf.mxu0 }
 0x3b7   : > { %v1308_v35 = vsel %vm1025_vm2, %v1303_v33, 0 }
 0x3b8   : > { %v4168_v37 = vpop.f32.mrf.mxu0  ;;  %4178 = vmatpush3.bf16.xpose.msra.mxu0 %v1308_v35 }
 0x3b9   : > { %4189 = vmatprep.subr.bf16.mxu0 %v4531_v3  ;;  %v3848_v37 = vld [vmem:[%s5559_s0 + $0x6] ss:$0 sm:$0xff] }
 0x3bf   : > { %4180 = vmatmul.mubr.msk.bf16.vlgmr.msra.gmra.mxu0 %vm1025_vm2, %v1302_v38 }
 0x3c0   : > { %4191 = vmatprep.mubr.msk.bf16.mxu0 %vm4532_vm0, %v4531_v3  ;;  %4190 = vmatpush3.bf16.msra.mxu0 %v1419_v5 }
 0x3c1   : > { %4201 = vmatprep.subr.bf16.mxu0 %v4531_v3 }
 0x47f   : > { %v1344_v46 = vpop.f32.mrf.mxu0 }
 0x480   : > { %v1350_v47 = vmul.f32 0.35355338, %v1344_v46 }
 0x481   : > { %v4181_v48 = vpop.f32.mrf.mxu0 }
 0x482   : > { %v1351_v49 = vsel %vm4762_vm6, %v1350_v47, -1e+09 }
 0x483   : > { %v1347_v50 = vpop.f32.mrf.mxu0  ;;  %v1352_v51 = vsel %vm1025_vm2, %v1351_v49, -inf }
 0x484   : > { %1353 = vmax.xlane.f32.xlu1 %v1352_v51  ;;  %v3841_v50 = vld [vmem:[%s5559_s0 + $0x2] ss:$0 sm:$0xff] }
 0x485   : > { %v4182_v52 = vpop.f32.mrf.mxu0 }
 0x50d   : > { %v1354_v61 = vpop.xlane.xlu1 %1353 }
 0x50e   : > { %v1355_v62 = vsub.f32 %v1351_v49, %v1354_v61  ;;  %v3851_v61 = vld [vmem:[%s5557_s7 + $0x148] sm:$0xff] }
 0x510   : > { %v1356_v63 = vmul.f32 1.442695, %v1355_v62  ;;  %v1622_v62 = vpack.c.bf16 %v3851_v61, %v3850_v59  ;;  %v3873_v59 = vld [vmem:[%s5559_s0 + $0x7] ss:$0 sm:$0xff] }
 0x512   : > { %4489 = vpow2.f32 %v1356_v63 }
 0x51f   : > { %v4490_v0 = vpop.eup %4489 }
 0x520   : > { %v1358_v1 = vsel %vm1025_vm2, %v4490_v0, 0.0 }
 0x521   : > { %1359 = vadd.xlane.f32.xlu1 %v1358_v1 }
 0x5aa   : > { %v1360_v6 = vpop.xlane.xlu1 %1359 }
 0x5ab   : > { %4491 = vrcp.f32 %v1360_v6 }
 0x5b8   : > { %v4492_v9 = vpop.eup %4491 }
 0x5b9   : > { %v1362_v10 = vmul.f32 %v4492_v9, %v4490_v0 }
 0x5bb   : > { %v1363_v11 = vpack.c.bf16 %v1362_v10, %v1362_v10 }
 0x5bd   : > { %4186 = vmatmul.mubr.msk.bf16.vlgmr.msra.gmra.mxu1 %vm1025_vm2, %v1363_v11 }
 0x5be   : > { %4196 = vmatpush3.bf16.msra.mxu1 %v1465_v12  ;;  %4197 = vmatprep.mubr.msk.bf16.mxu1 %vm4532_vm0, %v4531_v3  ;;  %v3855_v12 = vld [vmem:[%s5559_s0 + $0xa] ss:$0 sm:$0xff] }
 0x5bf   : > { %4209 = vmatprep.subr.bf16.mxu1 %v4531_v3 }
 0x5c5   : > { %4198 = vmatmul.mubr.msk.bf16.vlgmr.msra.gmra.mxu1 %vm1025_vm2, %v1134_v18 }
 0x5c6   : > { %4210 = vmatpush3.bf16.msra.mxu1 %v1568_v17  ;;  %4213 = vmatprep.mubr.msk.bf16.mxu1 %vm4532_vm0, %v4531_v3 }
 0x5c7   : > { %4211 = vmatprep.subr.bf16.mxu1 %v4531_v3 }
 0x5ca   : > { %4212 = vmatpush3.bf16.msra.mxu1 %v1567_v21 }
 0x5cb   : > { %4225 = vmatprep.subr.bf16.mxu1 %v4531_v3 }
 0x5cd   : > { %4214 = vmatmul.mubr.msk.bf16.vlgmr.msra.gmra.mxu1 %vm869_vm1, %v4717_v14 }
 0x5ce   : > { %4227 = vmatprep.mubr.msk.bf16.mxu1 %vm4532_vm0, %v4531_v3 }
 0x67d   : > { %v1405_v24 = vpop.f32.mrf.mxu1 }
 0x67e   : > { %v1411_v26 = vpack.c.bf16 %v1405_v24, %v1405_v24  ;;  %v1789_v24 = vsel %vm1090_vm7, %v1784_v23, 0 }
 0x67f   : > { %v4187_v29 = vpop.f32.mrf.mxu1 }
 0x680   : > { %4192 = vmatmul.mubr.msk.bf16.vlgmr.msra.gmra.mxu0 %vm1025_vm2, %v1411_v26  ;;  %v3863_v29 = vld [vmem:[%s5557_s7 + $0x70] sm:$0xff] }
 0x681   : > { %v1408_v30 = vpop.f32.mrf.mxu1  ;;  %4202 = vmatpush3.bf16.msra.mxu0 %v1513_v25  ;;  %4205 = vmatprep.mubr.msk.bf16.mxu0 %vm4532_vm0, %v4531_v3 }
 0x682   : > { %4203 = vmatprep.subr.bf16.mxu0 %v4531_v3  ;;  %v3864_v30 = vld [vmem:[%s5557_s7 + $0x78] sm:$0xff] }
 0x683   : > { %v4188_v32 = vpop.f32.mrf.mxu1 }
 0x684   : > { %v3861_v32 = vld [vmem:[%s5557_s7 + $0x60] sm:$0xff] }
 0x685   : > { %v4906_v33 = vpop.f32.mrf.mxu1  ;;  %4204 = vmatpush3.bf16.msra.mxu0 %v1512_v31  ;;  %v1838_v31 = vpack.c.bf16 %v3864_v30, %v3863_v29 }
 0x686   : > { %4217 = vmatprep.subr.bf16.mxu0 %v4531_v3 }
 0x687   : > { %v4199_v34 = vpop.f32.mrf.mxu1 }
 0x688   : > { %4206 = vmatmul.mubr.msk.bf16.vlgmr.msra.gmra.mxu0 %vm869_vm1, %v4717_v14  ;;  %v3862_v34 = vld [vmem:[%s5557_s7 + $0x68] sm:$0xff] }
 0x689   : > { %v1504_v35 = vpop.f32.mrf.mxu1  ;;  %4221 = vmatprep.mubr.msk.bf16.mxu0 %vm4532_vm0, %v4531_v3  ;;  %4218 = vmatpush3.bf16.msra.mxu0 %v1623_v60 }
 0x68a   : > { %4219 = vmatprep.subr.bf16.mxu0 %v4531_v3  ;;  %v1837_v35 = vpack.c.bf16 %v3862_v34, %v3861_v32 }
 0x68b   : > { %v4200_v36 = vpop.f32.mrf.mxu1 }
 0x68c   : > { %v3870_v36 = vld [vmem:[%s5557_s7 + $0xf0] sm:$0xff] }
 0x68d   : > { %v1611_v38 = vpop.f32.mrf.mxu1  ;;  %4220 = vmatpush3.bf16.msra.mxu0 %v1622_v62  ;;  %v3866_v62 = vld [vmem:[%s5559_s0 + $0x3] ss:$0 sm:$0xff] }
 0x68e   : > { %v1612_v39 = vadd.f32 %v3848_v37, %v1611_v38  ;;  %4231 = vmatprep.subr.bf16.mxu0 %v4531_v3  ;;  %v3871_v37 = vld [vmem:[%s5557_s7 + $0xf8] sm:$0xff] }
 0x68f   : > { %v4215_v40 = vpop.f32.mrf.mxu1 }
 0x690   : > { %v1673_v41 = vpack.c.bf16 %v1612_v39, %v1612_v39  ;;  %4222 = vmatmul.mubr.msk.bf16.vlgmr.msra.gmra.mxu0 %vm869_vm1, %v4717_v14  ;;  %v1893_v39 = vpack.c.bf16 %v3871_v37, %v3870_v36 }
 0x691   : > { %v1614_v42 = vpop.f32.mrf.mxu1  ;;  %4233 = vmatprep.mubr.msk.bf16.mxu0 %vm4532_vm0, %v4531_v3 }
 0x692   : > { %v1678_v43 = vsel %vm1025_vm2, %v1673_v41, 0  ;;  %v3868_v41 = vld [vmem:[%s5557_s7 + $0xe0] sm:$0xff]  ;;  %v3869_v42 = vld [vmem:[%s5557_s7 + $0xe8] sm:$0xff] }
 0x693   : > { %v4216_v44 = vpop.f32.mrf.mxu1  ;;  %4226 = vmatpush3.bf16.xpose.msra.mxu1 %v1678_v43 }
 0x694   : > { %4237 = vmatprep.subr.bf16.mxu1 %v4531_v3 }
 0x740   : > { %v4918_v46 = vpop.f32.mrf.mxu0 }
 0x742   : > { %v4193_v47 = vpop.f32.mrf.mxu0 }
 0x743   : > { %v1892_v47 = vpack.c.bf16 %v3869_v42, %v3868_v41 }
 0x744   : > { %v1458_v48 = vpop.f32.mrf.mxu0 }
 0x746   : > { %v4194_v49 = vpop.f32.mrf.mxu0 }
 0x748   : > { %v1556_v51 = vpop.f32.mrf.mxu0 }
 0x749   : > { %v1557_v52 = vadd.f32 %v3841_v50, %v1556_v51 }
 0x74a   : > { %v4207_v53 = vpop.f32.mrf.mxu0 }
 0x74b   : > { %v1672_v54 = vpack.c.bf16 %v1557_v52, %v1557_v52  ;;  %v1502_v53 = vadd.f32 %v4906_v33, %v4918_v46 }
 0x74c   : > { %v1559_v55 = vpop.f32.mrf.mxu0 }
 0x74d   : > { %4228 = vmatmul.mubr.msk.bf16.vlgmr.msra.gmra.mxu1 %vm1025_vm2, %v1672_v54 }
 0x74e   : > { %v4208_v56 = vpop.f32.mrf.mxu0  ;;  %4239 = vmatprep.mubr.msk.bf16.mxu1 %vm4532_vm0, %v4531_v3  ;;  %4238 = vmatpush3.bf16.msra.mxu1 %v1789_v24  ;;  %v3880_v24 = vld [vmem:[%s5559_s0 + $0xb] ss:$0 sm:$0xff]  ;;  %s807_s0 = scalar_lea.vmem %s5565_s4, %s4706_s1  ;;  %s5568_s4 = sld [smem:[#allocation6_spill]] }
 0x74f   : > { %4251 = vmatprep.subr.bf16.mxu1 %v4531_v3 }
 0x750   : > { %v1666_v15 = vpop.f32.mrf.mxu0 }
 0x751   : > { %v1667_v16 = vadd.f32 %v3855_v12, %v1666_v15 }
 0x752   : > { %v4223_v17 = vpop.f32.mrf.mxu0 }
 0x753   : > { %v1734_v18 = vpack.c.bf16 %v1667_v16, %v1667_v16 }
 0x754   : > { %v1669_v19 = vpop.f32.mrf.mxu0 }
 0x755   : > { %v1739_v20 = vsel %vm1090_vm7, %v1734_v18, 0 }
 0x756   : > { %v4224_v21 = vpop.f32.mrf.mxu0  ;;  %4232 = vmatpush3.bf16.msra.mxu0 %v1739_v20 }
 0x757   : > { %4243 = vmatprep.subr.bf16.mxu0 %v4531_v3 }
 0x80d   : > { %v1714_v63 = vpop.f32.mrf.mxu1 }
 0x80e   : > { %v1720_v0 = vmul.f32 0.35355338, %v1714_v63 }
 0x80f   : > { %v4229_v1 = vpop.f32.mrf.mxu1 }
 0x810   : > { %v1721_v2 = vsel %vm4762_vm6, %v1720_v0, -1e+09 }
 0x811   : > { %v1717_v4 = vpop.f32.mrf.mxu1  ;;  %v1722_v5 = vsel %vm1025_vm2, %v1721_v2, -inf }
 0x812   : > { %1723 = vmax.xlane.f32.xlu0 %v1722_v5  ;;  %v3877_v5 = vld [vmem:[%s5557_s7 + $0x170] sm:$0xff] }
 0x813   : > { %v4230_v6 = vpop.f32.mrf.mxu1 }
 0x814   : > { %v3878_v6 = vld [vmem:[%s5557_s7 + $0x178] sm:$0xff] }
 0x89b   : > { %v1724_v7 = vpop.xlane.xlu0 %1723 }
 0x89c   : > { %v1725_v8 = vsub.f32 %v1721_v2, %v1724_v7  ;;  %v3875_v7 = vld [vmem:[%s5557_s7 + $0x160] sm:$0xff] }
 0x89e   : > { %v1726_v9 = vmul.f32 1.442695, %v1725_v8  ;;  %v1948_v8 = vpack.c.bf16 %v3878_v6, %v3877_v5  ;;  %v2198_v5 = vld [vmem:[%s5528_s11] sm:$0xff]  ;;  %v2199_v6 = vld [vmem:[%s5528_s11 + $0x8] sm:$0xff] }
 0x8a0   : > { %4493 = vpow2.f32 %v1726_v9  ;;  %v3876_v9 = vld [vmem:[%s5557_s7 + $0x168] sm:$0xff] }
 0x8ad   : > { %v4494_v10 = vpop.eup %4493 }
 0x8ae   : > { %v1728_v11 = vsel %vm1025_vm2, %v4494_v10, 0.0 }
 0x8af   : > { %1729 = vadd.xlane.f32.xlu1 %v1728_v11 }
 0x938   : > { %v1730_v25 = vpop.xlane.xlu1 %1729 }
 0x939   : > { %4495 = vrcp.f32 %v1730_v25 }
 0x946   : > { %v4496_v26 = vpop.eup %4495 }
 0x947   : > { %v1732_v27 = vmul.f32 %v4496_v26, %v4494_v10  ;;  %v1947_v10 = vpack.c.bf16 %v3876_v9, %v3875_v7  ;;  %v2202_v7 = vpack.c.bf16 %v2199_v6, %v2198_v5 }
 0x949   : > { %v1733_v28 = vpack.c.bf16 %v1732_v27, %v1732_v27 }
 0x94b   : > { %4234 = vmatmul.mubr.msk.bf16.vlgmr.msra.gmra.mxu0 %vm1025_vm2, %v1733_v28 }
 0x94c   : > { %4247 = vmatprep.mubr.msk.bf16.mxu0 %vm4532_vm0, %v4531_v3  ;;  %4244 = vmatpush3.bf16.msra.mxu0 %v1838_v31  ;;  %v3884_v31 = vld [vmem:[%s5563_s9 + $0x18] sm:$0xff] }
 0x94d   : > { %4245 = vmatprep.subr.bf16.mxu0 %v4531_v3  ;;  %v2109_v32 = vpack.c.bf16 %v3884_v31, %v3884_v31 }
 0x94f   : > { %v2114_v34 = vsel %vm1090_vm7, %v2109_v32, 0 }
 0x950   : > { %4246 = vmatpush3.bf16.msra.mxu0 %v1837_v35 }
 0x951   : > { %4259 = vmatprep.subr.bf16.mxu0 %v4531_v3 }
 0x953   : > { %4248 = vmatmul.mubr.msk.bf16.vlgmr.msra.gmra.mxu0 %vm869_vm1, %v4717_v14 }
 0x954   : > { %4263 = vmatprep.mubr.msk.bf16.mxu0 %vm4532_vm0, %v4531_v3  ;;  %4260 = vmatpush3.bf16.msra.mxu0 %v1948_v8 }
 0x955   : > { %4261 = vmatprep.subr.bf16.mxu0 %v4531_v3 }
 0x958   : > { %4262 = vmatpush3.bf16.msra.mxu0 %v1947_v10 }
 0x959   : > { %4273 = vmatprep.subr.bf16.mxu0 %v4531_v3 }
 0x95b   : > { %4264 = vmatmul.mubr.msk.bf16.vlgmr.msra.gmra.mxu0 %vm869_vm1, %v4717_v14 }
 0x95c   : > { %4275 = vmatprep.mubr.msk.bf16.mxu0 %vm4532_vm0, %v4531_v3 }
 0xa0b   : > { %v1775_v38 = vpop.f32.mrf.mxu0 }
 0xa0c   : > { %v1781_v40 = vpack.c.bf16 %v1775_v38, %v1775_v38 }
 0xa0d   : > { %v4235_v43 = vpop.f32.mrf.mxu0 }
 0xa0e   : > { %4240 = vmatmul.mubr.msk.bf16.vlgmr.msra.gmra.mxu1 %vm1025_vm2, %v1781_v40 }
 0xa0f   : > { %v1778_v44 = vpop.f32.mrf.mxu0  ;;  %4252 = vmatpush3.bf16.msra.mxu1 %v1893_v39  ;;  %4255 = vmatprep.mubr.msk.bf16.mxu1 %vm4532_vm0, %v4531_v3 }
 0xa10   : > { %4253 = vmatprep.subr.bf16.mxu1 %v4531_v3  ;;  %v3886_v44 = vld [vmem:[%s5564_s8] ss:$0 sm:$0xff]  ;;  %s5567_s8 = sld [smem:[#allocation5_spill]] }
 0xa11   : > { %v4236_v48 = vpop.f32.mrf.mxu0 }
 0xa13   : > { %4254 = vmatpush3.bf16.msra.mxu1 %v1892_v47  ;;  %v1881_v49 = vpop.f32.mrf.mxu0 }
 0xa14   : > { %4267 = vmatprep.subr.bf16.mxu1 %v4531_v3  ;;  %v1882_v46 = vadd.f32 %v3866_v62, %v1881_v49  ;;  %v2254_v62 = vld [vmem:[%s5530_s13] sm:$0xff] }
 0xa15   : > { %v4249_v50 = vpop.f32.mrf.mxu0 }
 0xa16   : > { %4256 = vmatmul.mubr.msk.bf16.vlgmr.msra.gmra.mxu1 %vm869_vm1, %v4717_v14  ;;  %v1997_v4 = vpack.c.bf16 %v1882_v46, %v1882_v46  ;;  %v2200_v46 = vld [vmem:[%s5528_s11 + $0x10] sm:$0xff]  ;;  %s814_s27 = scalar_lea.vmem %s5567_s8, %s4706_s1 }
 0xa17   : > { %4269 = vmatprep.mubr.msk.bf16.mxu1 %vm4532_vm0, %v4531_v3  ;;  %v1884_v51 = vpop.f32.mrf.mxu0 }
 0xa19   : > { %v4250_v52 = vpop.f32.mrf.mxu0 }
 0xa1b   : > { %v1991_v25 = vpop.f32.mrf.mxu0 }
 0xa1c   : > { %v1992_v45 = vadd.f32 %v3880_v24, %v1991_v25 }
 0xa1d   : > { %v4265_v26 = vpop.f32.mrf.mxu0 }
 0xa1e   : > { %v2059_v27 = vpack.c.bf16 %v1992_v45, %v1992_v45  ;;  %v839_v26 = vld [vmem:[%s814_s27] sm:$0xff] }
 0xa1f   : > { %v1994_v28 = vpop.f32.mrf.mxu0 }
 0xa20   : > { %v2064_v29 = vsel %vm1090_vm7, %v2059_v27, 0  ;;  %v3889_v27 = vld [vmem:[%s5529_s12] ss:$0 sm:$0xff]  ;;  %v3904_v28 = vld [vmem:[%s5528_s11 + $0x30] sm:$0xff] }
 0xa21   : > { %v4266_v30 = vpop.f32.mrf.mxu0  ;;  %4274 = vmatpush3.bf16.msra.mxu0 %v2064_v29  ;;  %v3905_v29 = vld [vmem:[%s5528_s11 + $0x38] sm:$0xff] }
 0xa22   : > { %4285 = vmatprep.subr.bf16.mxu0 %v4531_v3 }
 0xace   : > { %v1825_v54 = vpop.f32.mrf.mxu1 }
 0xacf   : > { %v5002_v55 = vadd.f32 %v1825_v54, %v1502_v53 }
 0xad0   : > { %v4241_v56 = vpop.f32.mrf.mxu1 }
 0xad2   : > { %v1828_v57 = vpop.f32.mrf.mxu1 }
 0xad4   : > { %v4242_v58 = vpop.f32.mrf.mxu1 }
 0xad6   : > { %v1936_v60 = vpop.f32.mrf.mxu1 }
 0xad7   : > { %v1937_v61 = vadd.f32 %v3873_v59, %v1936_v60 }
 0xad8   : > { %v4257_v63 = vpop.f32.mrf.mxu1 }
 0xad9   : > { %v1998_v0 = vpack.c.bf16 %v1937_v61, %v1937_v61  ;;  %v2255_v63 = vld [vmem:[%s5530_s13 + $0x8] sm:$0xff] }
 0xada   : > { %v1939_v1 = vpop.f32.mrf.mxu1 }
 0xadb   : > { %v2003_v33 = vsel %vm1025_vm2, %v1998_v0, 0  ;;  %v2258_v0 = vpack.c.bf16 %v2255_v63, %v2254_v62  ;;  %v824_v1 = vld [vmem:[%s807_s0] sm:$0xff] }
 0xadc   : > { %v4258_v2 = vpop.f32.mrf.mxu1  ;;  %4268 = vmatpush3.bf16.xpose.msra.mxu1 %v2003_v33  ;;  %v5077_v33 = vpack.c.bf16 %v824_v1, %v824_v1 }
 0xadd   : > { %4279 = vmatprep.subr.bf16.mxu1 %v4531_v3  ;;  %v2201_v2 = vld [vmem:[%s5528_s11 + $0x18] sm:$0xff] }
 0xae3   : > { %4270 = vmatmul.mubr.msk.bf16.vlgmr.msra.gmra.mxu1 %vm1025_vm2, %v1997_v4  ;;  %v2203_v4 = vpack.c.bf16 %v2201_v2, %v2200_v46  ;;  %v3898_v2 = vld [vmem:[%s5531_s14 + $0x4] ss:$0 sm:$0xff] }
 0xae4   : > { %4281 = vmatprep.mubr.msk.bf16.mxu1 %vm4532_vm0, %v4531_v3  ;;  %4280 = vmatpush3.bf16.msra.mxu1 %v2114_v34  ;;  %v2483_v34 = vpack.c.bf16 %v3905_v29, %v3904_v28 }
 0xae5   : > { %4293 = vmatprep.subr.bf16.mxu1 %v4531_v3 }
 0xba3   : > { %v2039_v11 = vpop.f32.mrf.mxu1 }
 0xba4   : > { %v2045_v12 = vmul.f32 0.35355338, %v2039_v11 }
 0xba5   : > { %v4271_v15 = vpop.f32.mrf.mxu1 }
 0xba6   : > { %v2046_v16 = vsel %vm4762_vm6, %v2045_v12, -1e+09  ;;  %v3887_v12 = vld [vmem:[%s5566_s28] ss:$0 sm:$0xff]  ;;  %s817_s28 = scalar_lea.vmem %s5568_s4, %s5570_s2  ;;  %s821_s2 = scalar_lea.vmem %s5542_s25, %s4706_s1 }
 0xba7   : > { %v2042_v17 = vpop.f32.mrf.mxu1  ;;  %v2047_v18 = vsel %vm1025_vm2, %v2046_v16, -inf }
 0xba8   : > { %2048 = vmax.xlane.f32.xlu0 %v2047_v18 }
 0xba9   : > { %v4272_v19 = vpop.f32.mrf.mxu1 }
 0xc31   : > { %v2049_v20 = vpop.xlane.xlu0 %2048 }
 0xc32   : > { %v2050_v21 = vsub.f32 %v2046_v16, %v2049_v20  ;;  %v3888_v16 = vld [vmem:[%s5527_s10] ss:$0 sm:$0xff] }
 0xc33   : > { %v3891_v20 = vld [vmem:[%s5531_s14] ss:$0 sm:$0xff] }
 0xc34   : > { %v2051_v22 = vmul.f32 1.442695, %v2050_v21 }
 0xc36   : > { %4497 = vpow2.f32 %v2051_v22 }
 0xc43   : > { %v4498_v23 = vpop.eup %4497 }
 0xc44   : > { %v2053_v14 = vsel %vm1025_vm2, %v4498_v23, 0.0 }
 0xc45   : > { %2054 = vadd.xlane.f32.xlu1 %v2053_v14 }
 0xcce   : > { %v2055_v35 = vpop.xlane.xlu1 %2054 }
 0xccf   : > { %4499 = vrcp.f32 %v2055_v35 }
 0xcdc   : > { %v4500_v36 = vpop.eup %4499 }
 0xcdd   : > { %v2057_v37 = vmul.f32 %v4500_v36, %v4498_v23  ;;  %v3902_v36 = vld [vmem:[%s5528_s11 + $0x20] sm:$0xff] }
 0xcdf   : > { %v2058_v38 = vpack.c.bf16 %v2057_v37, %v2057_v37  ;;  %v3903_v37 = vld [vmem:[%s5528_s11 + $0x28] sm:$0xff] }
 0xce1   : > { %4276 = vmatmul.mubr.msk.bf16.vlgmr.msra.gmra.mxu0 %vm1025_vm2, %v2058_v38 }
 0xce2   : > { %4289 = vmatprep.mubr.msk.bf16.mxu0 %vm4532_vm0, %v4531_v3  ;;  %4286 = vmatpush3.bf16.msra.mxu0 %v2203_v4 }
 0xce3   : > { %4287 = vmatprep.subr.bf16.mxu0 %v4531_v3 }
 0xce6   : > { %4288 = vmatpush3.bf16.msra.mxu0 %v2202_v7 }
 0xce7   : > { %4301 = vmatprep.subr.bf16.mxu0 %v4531_v3 }
 0xda1   : > { %v2100_v39 = vpop.f32.mrf.mxu0 }
 0xda2   : > { %v2106_v40 = vpack.c.bf16 %v2100_v39, %v2100_v39 }
 0xda3   : > { %v4277_v41 = vpop.f32.mrf.mxu0 }
 0xda4   : > { %4282 = vmatmul.mubr.msk.bf16.vlgmr.msra.gmra.mxu1 %vm1025_vm2, %v2106_v40  ;;  %v2482_v40 = vpack.c.bf16 %v3903_v37, %v3902_v36  ;;  %v3895_v41 = vld [vmem:[%s5530_s13 + $0x90] sm:$0xff] }
 0xda5   : > { %v2103_v42 = vpop.f32.mrf.mxu0  ;;  %4297 = vmatprep.mubr.msk.bf16.mxu1 %vm4532_vm0, %v4531_v3 }
 0xda6   : > { %v3896_v42 = vld [vmem:[%s5530_s13 + $0x98] sm:$0xff] }
 0xda7   : > { %v4278_v43 = vpop.f32.mrf.mxu0 }
 0xda8   : > { %v3893_v43 = vld [vmem:[%s5530_s13 + $0x80] sm:$0xff] }
 0xe64   : > { %v2150_v47 = vpop.f32.mrf.mxu1 }
 0xe65   : > { %v2156_v48 = vadd.f32 %v2150_v47, %v5002_v55  ;;  %v2256_v55 = vld [vmem:[%s5530_s13 + $0x10] sm:$0xff]  ;;  %v3894_v47 = vld [vmem:[%s5530_s13 + $0x88] sm:$0xff] }
 0xe66   : > { %v4283_v49 = vpop.f32.mrf.mxu1 }
 0xe67   : > { %v2163_v50 = vadd.f32 %v3886_v44, %v2156_v48  ;;  %v2316_v44 = vpack.c.bf16 %v3896_v42, %v3895_v41  ;;  %v2315_v48 = vpack.c.bf16 %v3894_v47, %v3893_v43  ;;  %v3791_v49 = vld [vmem:[%s817_s28] ss:$0 sm:$0xff]  ;;  %v3917_v43 = vld [vmem:[%s5530_s13 + $0xa8] sm:$0xff] }
 0xe68   : > { %v2153_v51 = vpop.f32.mrf.mxu1  ;;  %v3916_v41 = vld [vmem:[%s5530_s13 + $0xa0] sm:$0xff] }
 0xe69   : > { %v2164_v52 = vadd.f32 %v2163_v50, %v4713_v13  ;;  %v2257_v13 = vld [vmem:[%s5530_s13 + $0x18] sm:$0xff] }
 0xe6a   : > { %v4284_v53 = vpop.f32.mrf.mxu1  ;;  %v2259_v61 = vpack.c.bf16 %v2257_v13, %v2256_v55 }
 0xe6b   : > { %v2167_v54 = vsel %vm869_vm1, %v2164_v52, 0.0 }
 0xe6c   : > { %2168 = vadd.xlane.f32.xlu0 %v2167_v54  ;;  %4294 = vmatpush3.bf16.msra.mxu1 %v2259_v61 }
 0xe6d   : > { %4295 = vmatprep.subr.bf16.mxu1 %v4531_v3 }
 0xe70   : > { %4296 = vmatpush3.bf16.msra.mxu1 %v2258_v0 }
 0xe71   : > { %4309 = vmatprep.subr.bf16.mxu1 %v4531_v3 }
 0xe73   : > { %4298 = vmatmul.mubr.msk.bf16.vlgmr.msra.gmra.mxu1 %vm869_vm1, %v5077_v33 }
 0xe74   : > { %4311 = vmatprep.mubr.msk.bf16.mxu1 %vm4532_vm0, %v4531_v3 }
 0xe82   : > { %843 = vperm.xlu0 %4484, %v839_v26  }
 0xef5   : > { %v2169_v56 = vpop.xlane.xlu0 %2168 }
 0xef6   : > { %v2171_v57 = vmul.f32 0.03125, %v2169_v56 }
 0xef8   : > { %v2172_v58 = vsub.f32 %v2164_v52, %v2171_v57 }
 0xefa   : > { %v2173_v59 = vmul.f32 %v2172_v58, %v2172_v58 }
 0xefc   : > { %v2174_v60 = vsel %vm869_vm1, %v2173_v59, 0.0 }
 0xefd   : > { %2175 = vadd.xlane.f32.xlu1 %v2174_v60  ;;  %v844_v50 = vpop.permute.xlu0 %843 }
 0xefe   : > { %v5169_v51 = vmul.f32 %v3791_v49, %v844_v50 }
 0xf00   : > { %vm853_vm8 = vcmp.gt.f32.partialorder %v5169_v51, 0.0 }
 0xf33   : > { %v2304_v21 = vpop.f32.mrf.mxu1 }
 0xf34   : > { %v2305_v22 = vadd.f32 %v3891_v20, %v2304_v21 }
 0xf35   : > { %v4299_v23 = vpop.f32.mrf.mxu1 }
 0xf36   : > { %v2366_v14 = vpack.c.bf16 %v2305_v22, %v2305_v22  ;;  %v3909_v22 = vld [vmem:[%s5530_s13 + $0x20] sm:$0xff]  ;;  %v3910_v23 = vld [vmem:[%s5530_s13 + $0x28] sm:$0xff] }
 0xf37   : > { %v2307_v24 = vpop.f32.mrf.mxu1 }
 0xf38   : > { %v2371_v25 = vsel %vm1025_vm2, %v2366_v14, 0  ;;  %v2537_v14 = vpack.c.bf16 %v3910_v23, %v3909_v22  ;;  %v3936_v22 = vld [vmem:[%s5530_s13 + $0x48] sm:$0xff] }
 0xf39   : > { %v4300_v45 = vpop.f32.mrf.mxu1  ;;  %4310 = vmatpush3.bf16.xpose.msra.mxu1 %v2371_v25 }
 0xf3a   : > { %4321 = vmatprep.subr.bf16.mxu1 %v4531_v3 }
 0xf86   : > { %v2176_v8 = vpop.xlane.xlu1 %2175 }
 0xf87   : > { %v2177_v9 = vmul.f32 0.03125, %v2176_v8 }
 0xf89   : > { %v2178_v10 = vadd.f32 1e-05, %v2177_v9 }
 0xf8b   : > { %4501 = vrsqrt.f32 %v2178_v10 }
 0xf98   : > { %v4502_v11 = vpop.eup %4501 }
 0xf99   : > { %v2180_v15 = vmul.f32 %v4502_v11, %v2172_v58 }
 0xf9b   : > { %v2187_v17 = vmul.f32 %v3887_v12, %v2180_v15  ;;  %v3911_v12 = vld [vmem:[%s5530_s13 + $0x30] sm:$0xff]  ;;  %v3912_v15 = vld [vmem:[%s5530_s13 + $0x38] sm:$0xff] }
 0xf9c   : > { %v2538_v20 = vpack.c.bf16 %v3912_v15, %v3911_v12  ;;  %v3937_v15 = vld [vmem:[%s5530_s13 + $0x50] sm:$0xff] }
 0xf9d   : > { %v5104_v18 = vadd.f32 %v3888_v16, %v2187_v17 }
 0xf9f   : > { %v5108_v19 = vpack.c.bf16 %v5104_v18, %v5104_v18 }
 0xfa1   : > { %4290 = vmatmul.mubr.msk.bf16.vlgmr.msra.gmra.mxu0 %vm869_vm1, %v5108_v19 }
 0xfa2   : > { %4305 = vmatprep.mubr.msk.bf16.mxu0 %vm4532_vm0, %v4531_v3  ;;  %4302 = vmatpush3.bf16.msra.mxu0 %v2316_v44  ;;  %v2592_v44 = vpack.c.bf16 %v3917_v43, %v3916_v41 }
 0xfa3   : > { %4303 = vmatprep.subr.bf16.mxu0 %v4531_v3 }
 0xfa6   : > { %4304 = vmatpush3.bf16.msra.mxu0 %v2315_v48 }
 0xfa7   : > { %4315 = vmatprep.subr.bf16.mxu0 %v4531_v3 }
 0xfa9   : > { %4306 = vmatmul.mubr.msk.bf16.vlgmr.msra.gmra.mxu0 %vm869_vm1, %v5077_v33 }
 0xfaa   : > { %4317 = vmatprep.mubr.msk.bf16.mxu0 %vm4532_vm0, %v4531_v3 }
0x1061   : > { %v2248_v30 = vpop.f32.mrf.mxu0 }
0x1062   : > { %v2249_v31 = vadd.f32 %v3889_v27, %v2248_v30  ;;  %v3914_v27 = vld [vmem:[%s5531_s14 + $0x1] ss:$0 sm:$0xff] }
0x1063   : > { %v4291_v32 = vpop.f32.mrf.mxu0 }
0x1064   : > { %v2365_v35 = vpack.c.bf16 %v2249_v31, %v2249_v31  ;;  %v3907_v32 = vld [vmem:[%s5529_s12 + $0x1] ss:$0 sm:$0xff] }
0x1065   : > { %v2251_v38 = vpop.f32.mrf.mxu0 }
0x1066   : > { %4312 = vmatmul.mubr.msk.bf16.vlgmr.msra.gmra.mxu1 %vm1025_vm2, %v2365_v35 }
0x1067   : > { %v4292_v39 = vpop.f32.mrf.mxu0  ;;  %4322 = vmatpush3.bf16.msra.mxu1 %v2483_v34  ;;  %4325 = vmatprep.mubr.msk.bf16.mxu1 %vm4532_vm0, %v4531_v3 }
0x1068   : > { %4323 = vmatprep.subr.bf16.mxu1 %v4531_v3  ;;  %v3918_v39 = vld [vmem:[%s5530_s13 + $0xb0] sm:$0xff] }
0x1069   : > { %v2359_v4 = vpop.f32.mrf.mxu0 }
0x106a   : > { %v2360_v5 = vadd.f32 %v3898_v2, %v2359_v4  ;;  %v3925_v2 = vld [vmem:[%s5532_s15 + $0x8] sm:$0xff] }
0x106b   : > { %4324 = vmatpush3.bf16.msra.mxu1 %v2482_v40  ;;  %v4307_v6 = vpop.f32.mrf.mxu0  ;;  %v3919_v40 = vld [vmem:[%s5530_s13 + $0xb8] sm:$0xff]  ;;  %v2754_v4 = vpack.c.bf16 %v3925_v2, %v3925_v2 }
0x106c   : > { %4337 = vmatprep.subr.bf16.mxu1 %v4531_v3  ;;  %v2427_v7 = vpack.c.bf16 %v2360_v5, %v2360_v5  ;;  %v2593_v42 = vpack.c.bf16 %v3919_v40, %v3918_v39 }
0x106d   : > { %v2362_v8 = vpop.f32.mrf.mxu0  ;;  %v2759_v5 = vsel %vm1090_vm7, %v2754_v4, 0 }
0x106e   : > { %4326 = vmatmul.mubr.msk.bf16.vlgmr.msra.gmra.mxu1 %vm869_vm1, %v5108_v19  ;;  %v2432_v9 = vsel %vm1090_vm7, %v2427_v7, 0  ;;  %v2475_v7 = vld [vmem:[%s5532_s15] sm:$0xff] }
0x106f   : > { %4341 = vmatprep.mubr.msk.bf16.mxu1 %vm4532_vm0, %v4531_v3  ;;  %v4308_v10 = vpop.f32.mrf.mxu0  ;;  %4316 = vmatpush3.bf16.msra.mxu0 %v2432_v9  ;;  %v2476_v8 = vpack.c.bf16 %v2475_v7, %v2475_v7 }
0x1070   : > { %4329 = vmatprep.subr.bf16.mxu0 %v4531_v3  ;;  %4338 = vmatpush3.bf16.msra.mxu1 %v2593_v42 }
0x1071   : > { %4339 = vmatprep.subr.bf16.mxu1 %v4531_v3  ;;  %v2805_v12 = vsel %vm1090_vm7, %v2476_v8, 0 }
0x1074   : > { %4340 = vmatpush3.bf16.msra.mxu1 %v2592_v44 }
0x1075   : > { %4351 = vmatprep.subr.bf16.mxu1 %v4531_v3 }
0x1077   : > { %4342 = vmatmul.mubr.msk.bf16.vlgmr.msra.gmra.mxu1 %vm869_vm1, %v5077_v33 }
0x1078   : > { %4353 = vmatprep.mubr.msk.bf16.mxu1 %vm4532_vm0, %v4531_v3 }
0x1126   : > { %v2407_v52 = vpop.f32.mrf.mxu1 }
0x1127   : > { %v2413_v53 = vmul.f32 0.35355338, %v2407_v52 }
0x1128   : > { %v4313_v54 = vpop.f32.mrf.mxu1 }
0x1129   : > { %v2414_v56 = vsel %vm853_vm8, %v2413_v53, -1e+09 }
0x112a   : > { %v2410_v57 = vpop.f32.mrf.mxu1  ;;  %v2415_v58 = vsel %vm1025_vm2, %v2414_v56, -inf }
0x112b   : > { %2416 = vmax.xlane.f32.xlu1 %v2415_v58 }
0x112c   : > { %v4314_v59 = vpop.f32.mrf.mxu1 }
0x112e   : > { %v2526_v60 = vpop.f32.mrf.mxu1 }
0x112f   : > { %v2527_v37 = vadd.f32 %v3907_v32, %v2526_v60 }
0x1130   : > { %v4327_v55 = vpop.f32.mrf.mxu1 }
0x1131   : > { %v2642_v38 = vpack.c.bf16 %v2527_v37, %v2527_v37 }
0x1132   : > { %v2529_v13 = vpop.f32.mrf.mxu1 }
0x1134   : > { %v4328_v61 = vpop.f32.mrf.mxu1 }
0x1137   : > { %v2636_v57 = vpop.f32.mrf.mxu1 }
0x1139   : > { %v4343_v59 = vpop.f32.mrf.mxu1 }
0x113b   : > { %v2639_v55 = vpop.f32.mrf.mxu1 }
0x113c   : > { %v3944_v55 = vld [vmem:[%s5530_s13 + $0xd0] sm:$0xff] }
0x113d   : > { %v4344_v61 = vpop.f32.mrf.mxu1 }
0x113e   : > { %v3942_v61 = vld [vmem:[%s5530_s13 + $0xc0] sm:$0xff] }
0x11b4   : > { %v2417_v62 = vpop.xlane.xlu1 %2416 }
0x11b5   : > { %v2418_v63 = vsub.f32 %v2414_v56, %v2417_v62  ;;  %v3921_v56 = vld [vmem:[%s5531_s14 + $0x5] ss:$0 sm:$0xff] }
0x11b6   : > { %v2637_v58 = vadd.f32 %v3921_v56, %v2636_v57 }
0x11b7   : > { %v2419_v0 = vmul.f32 1.442695, %v2418_v63 }
0x11b8   : > { %v2704_v60 = vpack.c.bf16 %v2637_v58, %v2637_v58 }
0x11b9   : > { %4503 = vpow2.f32 %v2419_v0 }
0x11ba   : > { %v2709_v13 = vsel %vm1090_vm7, %v2704_v60, 0 }
0x11bb   : > { %4352 = vmatpush3.bf16.msra.mxu1 %v2709_v13  ;;  %v3945_v13 = vld [vmem:[%s5530_s13 + $0xd8] sm:$0xff] }
0x11bc   : > { %4363 = vmatprep.subr.bf16.mxu1 %v4531_v3 }
0x11c6   : > { %v4504_v1 = vpop.eup %4503 }
0x11c7   : > { %v2421_v46 = vsel %vm1025_vm2, %v4504_v1, 0.0 }
0x11c8   : > { %2422 = vadd.xlane.f32.xlu1 %v2421_v46 }
0x1251   : > { %v2423_v11 = vpop.xlane.xlu1 %2422 }
0x1252   : > { %4505 = vrcp.f32 %v2423_v11 }
0x125f   : > { %v4506_v16 = vpop.eup %4505 }
0x1260   : > { %v2425_v17 = vmul.f32 %v4506_v16, %v4504_v1  ;;  %v3938_v16 = vld [vmem:[%s5530_s13 + $0x58] sm:$0xff] }
0x1262   : > { %v2426_v21 = vpack.c.bf16 %v2425_v17, %v2425_v17  ;;  %v2908_v17 = vpack.c.bf16 %v3938_v16, %v3937_v15  ;;  %v3947_v15 = vld [vmem:[%s5531_s14 + $0x6] ss:$0 sm:$0xff] }
0x1264   : > { %4318 = vmatmul.mubr.msk.bf16.vlgmr.msra.gmra.mxu0 %vm1025_vm2, %v2426_v21  ;;  %v3935_v21 = vld [vmem:[%s5530_s13 + $0x40] sm:$0xff] }
0x1265   : > { %4330 = vmatpush3.bf16.msra.mxu0 %v2538_v20  ;;  %4333 = vmatprep.mubr.msk.bf16.mxu0 %vm4532_vm0, %v4531_v3  ;;  %v2907_v23 = vpack.c.bf16 %v3936_v22, %v3935_v21 }
0x1266   : > { %4331 = vmatprep.subr.bf16.mxu0 %v4531_v3 }
0x1269   : > { %4332 = vmatpush3.bf16.msra.mxu0 %v2537_v14  ;;  %v3930_v14 = vld [vmem:[%s5528_s11 + $0x50] sm:$0xff] }
0x126a   : > { %4345 = vmatprep.subr.bf16.mxu0 %v4531_v3 }
0x126c   : > { %4334 = vmatmul.mubr.msk.bf16.vlgmr.msra.gmra.mxu0 %vm869_vm1, %v5077_v33 }
0x126d   : > { %4347 = vmatprep.mubr.msk.bf16.mxu0 %vm4532_vm0, %v4531_v3 }
0x1324   : > { %v5202_v24 = vpop.f32.mrf.mxu0 }
0x1325   : > { %v2474_v20 = vpack.c.bf16 %v5202_v24, %v5202_v24  ;;  %v3931_v24 = vld [vmem:[%s5528_s11 + $0x58] sm:$0xff] }
0x1326   : > { %v4319_v25 = vpop.f32.mrf.mxu0 }
0x1328   : > { %v2471_v45 = vpop.f32.mrf.mxu0 }
0x1329   : > { %v2853_v45 = vpack.c.bf16 %v3931_v24, %v3930_v14  ;;  %v3951_v24 = vld [vmem:[%s5532_s15 + $0x10] sm:$0xff] }
0x132a   : > { %v4320_v26 = vpop.f32.mrf.mxu0 }
0x132c   : > { %v2581_v28 = vpop.f32.mrf.mxu0 }
0x132d   : > { %v2582_v29 = vadd.f32 %v3914_v27, %v2581_v28  ;;  %v3928_v27 = vld [vmem:[%s5528_s11 + $0x40] sm:$0xff]  ;;  %v3929_v28 = vld [vmem:[%s5528_s11 + $0x48] sm:$0xff] }
0x132e   : > { %v4335_v30 = vpop.f32.mrf.mxu0 }
0x132f   : > { %v2643_v31 = vpack.c.bf16 %v2582_v29, %v2582_v29 }
0x1330   : > { %v2584_v34 = vpop.f32.mrf.mxu0 }
0x1331   : > { %v2648_v35 = vsel %vm1025_vm2, %v2643_v31, 0  ;;  %v2852_v31 = vpack.c.bf16 %v3929_v28, %v3928_v27  ;;  %v3955_v27 = vld [vmem:[%s5528_s11 + $0x70] sm:$0xff]  ;;  %v3956_v28 = vld [vmem:[%s5528_s11 + $0x78] sm:$0xff] }
0x1332   : > { %v4336_v36 = vpop.f32.mrf.mxu0  ;;  %4346 = vmatpush3.bf16.xpose.msra.mxu0 %v2648_v35 }
0x1333   : > { %4357 = vmatprep.subr.bf16.mxu0 %v4531_v3 }
0x1339   : > { %4348 = vmatmul.mubr.msk.bf16.vlgmr.msra.gmra.mxu0 %vm1025_vm2, %v2642_v38  ;;  %v3940_v38 = vld [vmem:[%s5531_s14 + $0x2] ss:$0 sm:$0xff] }
0x133a   : > { %4359 = vmatprep.mubr.msk.bf16.mxu0 %vm4532_vm0, %v4531_v3  ;;  %4358 = vmatpush3.bf16.msra.mxu0 %v2759_v5 }
0x133b   : > { %4369 = vmatprep.subr.bf16.mxu0 %v4531_v3 }
0x13f9   : > { %v2684_v47 = vpop.f32.mrf.mxu0 }
0x13fa   : > { %v2690_v48 = vmul.f32 0.35355338, %v2684_v47 }
0x13fb   : > { %v4349_v49 = vpop.f32.mrf.mxu0 }
0x13fc   : > { %v2691_v50 = vsel %vm853_vm8, %v2690_v48, -1e+09 }
0x13fd   : > { %v2687_v52 = vpop.f32.mrf.mxu0  ;;  %v2692_v53 = vsel %vm1025_vm2, %v2691_v50, -inf }
0x13fe   : > { %2693 = vmax.xlane.f32.xlu1 %v2692_v53  ;;  %v3933_v53 = vld [vmem:[%s5529_s12 + $0x2] ss:$0 sm:$0xff] }
0x13ff   : > { %v4350_v54 = vpop.f32.mrf.mxu0 }
0x1487   : > { %v2694_v62 = vpop.xlane.xlu1 %2693 }
0x1488   : > { %v2695_v63 = vsub.f32 %v2691_v50, %v2694_v62  ;;  %v2963_v62 = vpack.c.bf16 %v3945_v13, %v3944_v55 }
0x148a   : > { %v2696_v0 = vmul.f32 1.442695, %v2695_v63  ;;  %v3943_v63 = vld [vmem:[%s5530_s13 + $0xc8] sm:$0xff] }
0x148c   : > { %4507 = vpow2.f32 %v2696_v0  ;;  %v2962_v0 = vpack.c.bf16 %v3943_v63, %v3942_v61  ;;  %v3965_v61 = vld [vmem:[%s5531_s14 + $0x3] ss:$0 sm:$0xff] }
0x1499   : > { %v4508_v1 = vpop.eup %4507 }
0x149a   : > { %v2698_v46 = vsel %vm1025_vm2, %v4508_v1, 0.0 }
0x149b   : > { %2699 = vadd.xlane.f32.xlu1 %v2698_v46 }
0x1524   : > { %v2700_v6 = vpop.xlane.xlu1 %2699 }
0x1525   : > { %4509 = vrcp.f32 %v2700_v6 }
0x1532   : > { %v4510_v9 = vpop.eup %4509 }
0x1533   : > { %v2702_v10 = vmul.f32 %v4510_v9, %v4508_v1 }
0x1535   : > { %v2703_v11 = vpack.c.bf16 %v2702_v10, %v2702_v10 }
0x1537   : > { %4354 = vmatmul.mubr.msk.bf16.vlgmr.msra.gmra.mxu1 %vm1025_vm2, %v2703_v11 }
0x1538   : > { %4364 = vmatpush3.bf16.msra.mxu1 %v2805_v12  ;;  %4365 = vmatprep.mubr.msk.bf16.mxu1 %vm4532_vm0, %v4531_v3 }
0x1539   : > { %4377 = vmatprep.subr.bf16.mxu1 %v4531_v3 }
0x153f   : > { %4366 = vmatmul.mubr.msk.bf16.vlgmr.msra.gmra.mxu1 %vm1025_vm2, %v2474_v20 }
0x1540   : > { %4378 = vmatpush3.bf16.msra.mxu1 %v2908_v17  ;;  %4381 = vmatprep.mubr.msk.bf16.mxu1 %vm4532_vm0, %v4531_v3 }
0x1541   : > { %4379 = vmatprep.subr.bf16.mxu1 %v4531_v3 }
0x1544   : > { %4380 = vmatpush3.bf16.msra.mxu1 %v2907_v23 }
0x1545   : > { %4393 = vmatprep.subr.bf16.mxu1 %v4531_v3 }
0x1547   : > { %4382 = vmatmul.mubr.msk.bf16.vlgmr.msra.gmra.mxu1 %vm869_vm1, %v5077_v33 }
0x1548   : > { %4395 = vmatprep.mubr.msk.bf16.mxu1 %vm4532_vm0, %v4531_v3 }
0x15f7   : > { %v2745_v25 = vpop.f32.mrf.mxu1 }
0x15f8   : > { %v2751_v26 = vpack.c.bf16 %v2745_v25, %v2745_v25  ;;  %v3124_v25 = vpack.c.bf16 %v3951_v24, %v3951_v24 }
0x15f9   : > { %v4355_v29 = vpop.f32.mrf.mxu1 }
0x15fa   : > { %4360 = vmatmul.mubr.msk.bf16.vlgmr.msra.gmra.mxu0 %vm1025_vm2, %v2751_v26 }
0x15fb   : > { %v2748_v30 = vpop.f32.mrf.mxu1  ;;  %4370 = vmatpush3.bf16.msra.mxu0 %v2853_v45  ;;  %4373 = vmatprep.mubr.msk.bf16.mxu0 %vm4532_vm0, %v4531_v3  ;;  %v3129_v45 = vsel %vm1090_vm7, %v3124_v25, 0 }
0x15fc   : > { %4371 = vmatprep.subr.bf16.mxu0 %v4531_v3 }
0x15fd   : > { %v4356_v32 = vpop.f32.mrf.mxu1 }
0x15ff   : > { %v5294_v34 = vpop.f32.mrf.mxu1  ;;  %4372 = vmatpush3.bf16.msra.mxu0 %v2852_v31  ;;  %v3178_v31 = vpack.c.bf16 %v3956_v28, %v3955_v27 }
0x1600   : > { %4385 = vmatprep.subr.bf16.mxu0 %v4531_v3 }
0x1601   : > { %v4367_v35 = vpop.f32.mrf.mxu1 }
0x1602   : > { %4374 = vmatmul.mubr.msk.bf16.vlgmr.msra.gmra.mxu0 %vm869_vm1, %v5108_v19  ;;  %v3953_v35 = vld [vmem:[%s5528_s11 + $0x60] sm:$0xff] }
0x1603   : > { %v2844_v36 = vpop.f32.mrf.mxu1  ;;  %4389 = vmatprep.mubr.msk.bf16.mxu0 %vm4532_vm0, %v4531_v3  ;;  %4386 = vmatpush3.bf16.msra.mxu0 %v2963_v62 }
0x1604   : > { %4387 = vmatprep.subr.bf16.mxu0 %v4531_v3  ;;  %v3954_v36 = vld [vmem:[%s5528_s11 + $0x68] sm:$0xff] }
0x1605   : > { %v4368_v37 = vpop.f32.mrf.mxu1 }
0x1606   : > { %v3177_v37 = vpack.c.bf16 %v3954_v36, %v3953_v35 }
0x1607   : > { %v2951_v39 = vpop.f32.mrf.mxu1  ;;  %4388 = vmatpush3.bf16.msra.mxu0 %v2962_v0 }
0x1608   : > { %v2952_v40 = vadd.f32 %v3940_v38, %v2951_v39  ;;  %4399 = vmatprep.subr.bf16.mxu0 %v4531_v3  ;;  %v3962_v38 = vld [vmem:[%s5530_s13 + $0x70] sm:$0xff]  ;;  %v3963_v39 = vld [vmem:[%s5530_s13 + $0x78] sm:$0xff] }
0x1609   : > { %v4383_v41 = vpop.f32.mrf.mxu1 }
0x160a   : > { %v3013_v42 = vpack.c.bf16 %v2952_v40, %v2952_v40  ;;  %4390 = vmatmul.mubr.msk.bf16.vlgmr.msra.gmra.mxu0 %vm869_vm1, %v5077_v33  ;;  %v3233_v41 = vpack.c.bf16 %v3963_v39, %v3962_v38 }
0x160b   : > { %v2954_v43 = vpop.f32.mrf.mxu1  ;;  %4401 = vmatprep.mubr.msk.bf16.mxu0 %vm4532_vm0, %v4531_v3 }
0x160c   : > { %v3018_v44 = vsel %vm1025_vm2, %v3013_v42, 0  ;;  %v3960_v43 = vld [vmem:[%s5530_s13 + $0x60] sm:$0xff] }
0x160d   : > { %v4384_v47 = vpop.f32.mrf.mxu1  ;;  %4394 = vmatpush3.bf16.xpose.msra.mxu1 %v3018_v44 }
0x160e   : > { %4405 = vmatprep.subr.bf16.mxu1 %v4531_v3 }
0x16ba   : > { %v5306_v48 = vpop.f32.mrf.mxu0 }
0x16bc   : > { %v4361_v49 = vpop.f32.mrf.mxu0 }
0x16be   : > { %v2798_v50 = vpop.f32.mrf.mxu0 }
0x16c0   : > { %v4362_v52 = vpop.f32.mrf.mxu0 }
0x16c2   : > { %v2896_v54 = vpop.f32.mrf.mxu0 }
0x16c3   : > { %v2897_v56 = vadd.f32 %v3933_v53, %v2896_v54 }
0x16c4   : > { %v4375_v57 = vpop.f32.mrf.mxu0 }
0x16c5   : > { %v3012_v58 = vpack.c.bf16 %v2897_v56, %v2897_v56  ;;  %v2842_v57 = vadd.f32 %v5294_v34, %v5306_v48 }
0x16c6   : > { %v2899_v59 = vpop.f32.mrf.mxu0 }
0x16c7   : > { %4396 = vmatmul.mubr.msk.bf16.vlgmr.msra.gmra.mxu1 %vm1025_vm2, %v3012_v58 }
0x16c8   : > { %v4376_v60 = vpop.f32.mrf.mxu0  ;;  %4407 = vmatprep.mubr.msk.bf16.mxu1 %vm4532_vm0, %v4531_v3  ;;  %4406 = vmatpush3.bf16.msra.mxu1 %v3129_v45  ;;  %v3972_v45 = vld [vmem:[%s5531_s14 + $0x7] ss:$0 sm:$0xff] }
0x16c9   : > { %4419 = vmatprep.subr.bf16.mxu1 %v4531_v3 }
0x16ca   : > { %v3006_v16 = vpop.f32.mrf.mxu0 }
0x16cb   : > { %v3007_v17 = vadd.f32 %v3947_v15, %v3006_v16 }
0x16cc   : > { %v4391_v20 = vpop.f32.mrf.mxu0 }
0x16cd   : > { %v3074_v21 = vpack.c.bf16 %v3007_v17, %v3007_v17 }
0x16ce   : > { %v3009_v22 = vpop.f32.mrf.mxu0 }
0x16cf   : > { %v3079_v23 = vsel %vm1090_vm7, %v3074_v21, 0 }
0x16d0   : > { %v4392_v14 = vpop.f32.mrf.mxu0  ;;  %4400 = vmatpush3.bf16.msra.mxu0 %v3079_v23 }
0x16d1   : > { %4411 = vmatprep.subr.bf16.mxu0 %v4531_v3 }
0x1787   : > { %v3054_v1 = vpop.f32.mrf.mxu1 }
0x1788   : > { %v3060_v46 = vmul.f32 0.35355338, %v3054_v1 }
0x1789   : > { %v4397_v2 = vpop.f32.mrf.mxu1 }
0x178a   : > { %v3061_v4 = vsel %vm853_vm8, %v3060_v46, -1e+09  ;;  %v3958_v46 = vld [vmem:[%s5529_s12 + $0x3] ss:$0 sm:$0xff] }
0x178b   : > { %v3057_v5 = vpop.f32.mrf.mxu1  ;;  %v3062_v6 = vsel %vm1025_vm2, %v3061_v4, -inf }
0x178c   : > { %3063 = vmax.xlane.f32.xlu1 %v3062_v6  ;;  %v3969_v6 = vld [vmem:[%s5530_s13 + $0xf0] sm:$0xff] }
0x178d   : > { %v4398_v7 = vpop.f32.mrf.mxu1 }
0x178e   : > { %v3970_v7 = vld [vmem:[%s5530_s13 + $0xf8] sm:$0xff] }
0x1815   : > { %v3064_v8 = vpop.xlane.xlu1 %3063 }
0x1816   : > { %v3065_v9 = vsub.f32 %v3061_v4, %v3064_v8  ;;  %v3967_v8 = vld [vmem:[%s5530_s13 + $0xe0] sm:$0xff] }
0x1818   : > { %v3066_v10 = vmul.f32 1.442695, %v3065_v9  ;;  %v3288_v9 = vpack.c.bf16 %v3970_v7, %v3969_v6 }
0x181a   : > { %4511 = vpow2.f32 %v3066_v10  ;;  %v3968_v10 = vld [vmem:[%s5530_s13 + $0xe8] sm:$0xff] }
0x1827   : > { %v4512_v11 = vpop.eup %4511 }
0x1828   : > { %v3068_v12 = vsel %vm1025_vm2, %v4512_v11, 0.0 }
0x1829   : > { %3069 = vadd.xlane.f32.xlu1 %v3068_v12 }
0x18b2   : > { %v3070_v26 = vpop.xlane.xlu1 %3069 }
0x18b3   : > { %4513 = vrcp.f32 %v3070_v26 }
0x18c0   : > { %v4514_v29 = vpop.eup %4513 }
0x18c1   : > { %v3072_v30 = vmul.f32 %v4514_v29, %v4512_v11  ;;  %v3287_v11 = vpack.c.bf16 %v3968_v10, %v3967_v8 }
0x18c3   : > { %v3073_v32 = vpack.c.bf16 %v3072_v30, %v3072_v30 }
0x18c5   : > { %4402 = vmatmul.mubr.msk.bf16.vlgmr.msra.gmra.mxu0 %vm1025_vm2, %v3073_v32  ;;  %v3976_v32 = vld [vmem:[%s5532_s15 + $0x18] sm:$0xff] }
0x18c6   : > { %4412 = vmatpush3.bf16.msra.mxu0 %v3178_v31  ;;  %4415 = vmatprep.mubr.msk.bf16.mxu0 %vm4532_vm0, %v4531_v3  ;;  %v3449_v35 = vpack.c.bf16 %v3976_v32, %v3976_v32 }
0x18c7   : > { %4413 = vmatprep.subr.bf16.mxu0 %v4531_v3 }
0x18c8   : > { %v3454_v36 = vsel %vm1090_vm7, %v3449_v35, 0 }
0x18ca   : > { %4414 = vmatpush3.bf16.msra.mxu0 %v3177_v37 }
0x18cb   : > { %4427 = vmatprep.subr.bf16.mxu0 %v4531_v3 }
0x18cd   : > { %4416 = vmatmul.mubr.msk.bf16.vlgmr.msra.gmra.mxu0 %vm869_vm1, %v5108_v19  ;;  %v3961_v19 = vld [vmem:[%s5530_s13 + $0x68] sm:$0xff] }
0x18ce   : > { %4431 = vmatprep.mubr.msk.bf16.mxu0 %vm4532_vm0, %v4531_v3  ;;  %v3232_v49 = vpack.c.bf16 %v3961_v19, %v3960_v43  ;;  %4428 = vmatpush3.bf16.msra.mxu0 %v3288_v9 }
0x18cf   : > { %4429 = vmatprep.subr.bf16.mxu0 %v4531_v3 }
0x18d2   : > { %4430 = vmatpush3.bf16.msra.mxu0 %v3287_v11  ;;  %v3979_v11 = vld [vmem:[%s5534_s17] ss:$0 sm:$0xff] }
0x18d3   : > { %4441 = vmatprep.subr.bf16.mxu0 %v4531_v3 }
0x18d5   : > { %4432 = vmatmul.mubr.msk.bf16.vlgmr.msra.gmra.mxu0 %vm869_vm1, %v5077_v33 }
0x18d6   : > { %4443 = vmatprep.mubr.msk.bf16.mxu0 %vm4532_vm0, %v4531_v3 }
0x1985   : > { %v3115_v40 = vpop.f32.mrf.mxu0 }
0x1986   : > { %v3121_v42 = vpack.c.bf16 %v3115_v40, %v3115_v40 }
0x1987   : > { %v4403_v44 = vpop.f32.mrf.mxu0 }
0x1988   : > { %4408 = vmatmul.mubr.msk.bf16.vlgmr.msra.gmra.mxu1 %vm1025_vm2, %v3121_v42 }
0x1989   : > { %v3118_v47 = vpop.f32.mrf.mxu0  ;;  %4420 = vmatpush3.bf16.msra.mxu1 %v3233_v41  ;;  %4423 = vmatprep.mubr.msk.bf16.mxu1 %vm4532_vm0, %v4531_v3 }
0x198a   : > { %4421 = vmatprep.subr.bf16.mxu1 %v4531_v3  ;;  %v3978_v47 = vld [vmem:[%s5533_s16] ss:$0 sm:$0xff] }
0x198b   : > { %v4404_v50 = vpop.f32.mrf.mxu0 }
0x198d   : > { %v3221_v52 = vpop.f32.mrf.mxu0  ;;  %4422 = vmatpush3.bf16.msra.mxu1 %v3232_v49 }
0x198e   : > { %4435 = vmatprep.subr.bf16.mxu1 %v4531_v3  ;;  %v3222_v4 = vadd.f32 %v3958_v46, %v3221_v52 }
0x198f   : > { %v4417_v53 = vpop.f32.mrf.mxu0 }
0x1990   : > { %4424 = vmatmul.mubr.msk.bf16.vlgmr.msra.gmra.mxu1 %vm869_vm1, %v5077_v33  ;;  %v3337_v5 = vpack.c.bf16 %v3222_v4, %v3222_v4 }
0x1991   : > { %v3224_v54 = vpop.f32.mrf.mxu0  ;;  %4437 = vmatprep.mubr.msk.bf16.mxu1 %vm4532_vm0, %v4531_v3 }
0x1993   : > { %v4418_v56 = vpop.f32.mrf.mxu0 }
0x1995   : > { %v3331_v26 = vpop.f32.mrf.mxu0 }
0x1996   : > { %v3332_v51 = vadd.f32 %v3972_v45, %v3331_v26 }
0x1997   : > { %v4433_v27 = vpop.f32.mrf.mxu0 }
0x1998   : > { %v3399_v28 = vpack.c.bf16 %v3332_v51, %v3332_v51 }
0x1999   : > { %v3334_v29 = vpop.f32.mrf.mxu0 }
0x199a   : > { %v3404_v30 = vsel %vm1090_vm7, %v3399_v28, 0 }
0x199b   : > { %v4434_v31 = vpop.f32.mrf.mxu0  ;;  %4442 = vmatpush3.bf16.msra.mxu0 %v3404_v30  ;;  %v3983_v30 = vld [vmem:[%s5539_s22] ss:$0 sm:$0xff] }
0x199c   : > { %4453 = vmatprep.subr.bf16.mxu0 %v4531_v3 }
0x1a48   : > { %v3165_v58 = vpop.f32.mrf.mxu1 }
0x1a49   : > { %v5390_v59 = vadd.f32 %v3165_v58, %v2842_v57 }
0x1a4a   : > { %v4409_v60 = vpop.f32.mrf.mxu1 }
0x1a4c   : > { %v3168_v55 = vpop.f32.mrf.mxu1 }
0x1a4e   : > { %v4410_v13 = vpop.f32.mrf.mxu1 }
0x1a50   : > { %v3276_v62 = vpop.f32.mrf.mxu1 }
0x1a51   : > { %v3277_v63 = vadd.f32 %v3965_v61, %v3276_v62 }
0x1a52   : > { %v4425_v0 = vpop.f32.mrf.mxu1 }
0x1a53   : > { %v3338_v1 = vpack.c.bf16 %v3277_v63, %v3277_v63  ;;  %v3538_v63 = vld [vmem:[%s5536_s19 + $0x18] sm:$0xff]  ;;  %v3535_v0 = vld [vmem:[%s5536_s19] sm:$0xff] }
0x1a54   : > { %v3279_v2 = vpop.f32.mrf.mxu1 }
0x1a55   : > { %v3343_v34 = vsel %vm1025_vm2, %v3338_v1, 0  ;;  %v3536_v1 = vld [vmem:[%s5536_s19 + $0x8] sm:$0xff]  ;;  %v3599_v2 = vld [vmem:[%s5538_s21 + $0x30] sm:$0xff] }
0x1a56   : > { %v4426_v48 = vpop.f32.mrf.mxu1  ;;  %4436 = vmatpush3.bf16.xpose.msra.mxu1 %v3343_v34  ;;  %v3539_v46 = vpack.c.bf16 %v3536_v1, %v3535_v0  ;;  %v3600_v34 = vld [vmem:[%s5538_s21 + $0x38] sm:$0xff] }
0x1a57   : > { %4447 = vmatprep.subr.bf16.mxu1 %v4531_v3  ;;  %v3597_v48 = vld [vmem:[%s5538_s21 + $0x20] sm:$0xff]  ;;  %v3604_v4 = vpack.c.bf16 %v3600_v34, %v3599_v2 }
0x1a5d   : > { %4438 = vmatmul.mubr.msk.bf16.vlgmr.msra.gmra.mxu1 %vm1025_vm2, %v3337_v5  ;;  %v3598_v5 = vld [vmem:[%s5538_s21 + $0x28] sm:$0xff] }
0x1a5e   : > { %4449 = vmatprep.mubr.msk.bf16.mxu1 %vm4532_vm0, %v4531_v3  ;;  %4448 = vmatpush3.bf16.msra.mxu1 %v3454_v36  ;;  %v3603_v6 = vpack.c.bf16 %v3598_v5, %v3597_v48 }
0x1a5f   : > { %4461 = vmatprep.subr.bf16.mxu1 %v4531_v3 }
0x1b1d   : > { %v3379_v12 = vpop.f32.mrf.mxu1 }
0x1b1e   : > { %v3385_v15 = vmul.f32 0.35355338, %v3379_v12 }
0x1b1f   : > { %v4439_v16 = vpop.f32.mrf.mxu1 }
0x1b20   : > { %v3386_v17 = vsel %vm853_vm8, %v3385_v15, -1e+09  ;;  %v3980_v15 = vld [vmem:[%s5535_s18] ss:$0 sm:$0xff] }
0x1b21   : > { %v3382_v20 = vpop.f32.mrf.mxu1  ;;  %v3387_v21 = vsel %vm1025_vm2, %v3386_v17, -inf }
0x1b22   : > { %3388 = vmax.xlane.f32.xlu1 %v3387_v21  ;;  %v3595_v21 = vld [vmem:[%s5538_s21 + $0x10] sm:$0xff] }
0x1b23   : > { %v4440_v22 = vpop.f32.mrf.mxu1 }
0x1b24   : > { %v3596_v22 = vld [vmem:[%s5538_s21 + $0x18] sm:$0xff] }
0x1bab   : > { %v3389_v23 = vpop.xlane.xlu1 %3388 }
0x1bac   : > { %v3390_v14 = vsub.f32 %v3386_v17, %v3389_v23  ;;  %v3602_v23 = vpack.c.bf16 %v3596_v22, %v3595_v21 }
0x1bae   : > { %v3391_v24 = vmul.f32 1.442695, %v3390_v14  ;;  %v3593_v14 = vld [vmem:[%s5538_s21] sm:$0xff] }
0x1bb0   : > { %4515 = vpow2.f32 %v3391_v24  ;;  %v3594_v24 = vld [vmem:[%s5538_s21 + $0x8] sm:$0xff] }
0x1bbd   : > { %v4516_v25 = vpop.eup %4515 }
0x1bbe   : > { %v3393_v33 = vsel %vm1025_vm2, %v4516_v25, 0.0 }
0x1bbf   : > { %3394 = vadd.xlane.f32.xlu1 %v3393_v33  ;;  %v3981_v33 = vld [vmem:[%s5537_s20] ss:$0 sm:$0xff] }
0x1c48   : > { %v3395_v37 = vpop.xlane.xlu1 %3394 }
0x1c49   : > { %4517 = vrcp.f32 %v3395_v37 }
0x1c56   : > { %v4518_v38 = vpop.eup %4517 }
0x1c57   : > { %v3397_v39 = vmul.f32 %v4518_v38, %v4516_v25  ;;  %v3601_v25 = vpack.c.bf16 %v3594_v24, %v3593_v14 }
0x1c59   : > { %v3398_v40 = vpack.c.bf16 %v3397_v39, %v3397_v39 }
0x1c5b   : > { %4444 = vmatmul.mubr.msk.bf16.vlgmr.msra.gmra.mxu0 %vm1025_vm2, %v3398_v40 }
0x1c5c   : > { %4457 = vmatprep.mubr.msk.bf16.mxu0 %vm4532_vm0, %v4531_v3 }
0x1d1b   : > { %v3440_v41 = vpop.f32.mrf.mxu0 }
0x1d1c   : > { %v3446_v42 = vpack.c.bf16 %v3440_v41, %v3440_v41 }
0x1d1d   : > { %v4445_v43 = vpop.f32.mrf.mxu0 }
0x1d1e   : > { %4450 = vmatmul.mubr.msk.bf16.vlgmr.msra.gmra.mxu1 %vm1025_vm2, %v3446_v42 }
0x1d1f   : > { %v3443_v19 = vpop.f32.mrf.mxu0  ;;  %4469 = vmatprep.mubr.msk.bf16.mxu1 %vm4532_vm0, %v4531_v3  ;;  %4462 = vmatpush3.bf16.msra.mxu1 %v3604_v4 }
0x1d20   : > { %4463 = vmatprep.subr.bf16.mxu1 %v4531_v3 }
0x1d21   : > { %v4446_v44 = vpop.f32.mrf.mxu0 }
0x1d23   : > { %4464 = vmatpush3.bf16.msra.mxu1 %v3603_v6 }
0x1d24   : > { %4465 = vmatprep.subr.bf16.mxu1 %v4531_v3 }
0x1d27   : > { %4466 = vmatpush3.bf16.msra.mxu1 %v3602_v23 }
0x1d28   : > { %4467 = vmatprep.subr.bf16.mxu1 %v4531_v3 }
0x1d2b   : > { %4468 = vmatpush3.bf16.msra.mxu1 %v3601_v25 }
0x1dde   : > { %v3490_v49 = vpop.f32.mrf.mxu1 }
0x1ddf   : > { %v3496_v50 = vadd.f32 %v3490_v49, %v5390_v59  ;;  %v3537_v59 = vld [vmem:[%s5536_s19 + $0x10] sm:$0xff] }
0x1de0   : > { %v4451_v52 = vpop.f32.mrf.mxu1 }
0x1de1   : > { %v3503_v53 = vadd.f32 %v3978_v47, %v3496_v50  ;;  %v3985_v52 = vld [vmem:[%s5540_s23] ss:$0 sm:$0xff] }
0x1de2   : > { %v3493_v54 = vpop.f32.mrf.mxu1 }
0x1de3   : > { %v3504_v56 = vadd.f32 %v3503_v53, %v5104_v18  ;;  %v3540_v18 = vpack.c.bf16 %v3538_v63, %v3537_v59  ;;  %v3986_v54 = vld [vmem:[%s5541_s24] ss:$0 sm:$0xff] }
0x1de4   : > { %v4452_v57 = vpop.f32.mrf.mxu1 }
0x1de5   : > { %v3507_v58 = vsel %vm869_vm1, %v3504_v56, 0.0  ;;  %4454 = vmatpush3.bf16.msra.mxu0 %v3540_v18 }
0x1de6   : > { %3508 = vadd.xlane.f32.xlu1 %v3507_v58  ;;  %4455 = vmatprep.subr.bf16.mxu0 %v4531_v3 }
0x1de9   : > { %4456 = vmatpush3.bf16.msra.mxu0 %v3539_v46 }
0x1e6f   : > { %v3509_v60 = vpop.xlane.xlu1 %3508 }
0x1e70   : > { %v3510_v55 = vmul.f32 0.03125, %v3509_v60 }
0x1e72   : > { %v3511_v13 = vsub.f32 %v3504_v56, %v3510_v55 }
0x1e74   : > { %v3512_v61 = vmul.f32 %v3511_v13, %v3511_v13 }
0x1e76   : > { %v3513_v62 = vsel %vm869_vm1, %v3512_v61, 0.0 }
0x1e77   : > { %3514 = vadd.xlane.f32.xlu1 %v3513_v62 }
0x1f00   : > { %v3515_v7 = vpop.xlane.xlu1 %3514 }
0x1f01   : > { %v3516_v8 = vmul.f32 0.03125, %v3515_v7 }
0x1f03   : > { %v3517_v9 = vadd.f32 1e-05, %v3516_v8 }
0x1f05   : > { %4519 = vrsqrt.f32 %v3517_v9 }
0x1f12   : > { %v4520_v10 = vpop.eup %4519 }
0x1f13   : > { %v3519_v12 = vmul.f32 %v4520_v10, %v3511_v13 }
0x1f15   : > { %v3526_v16 = vmul.f32 %v3979_v11, %v3519_v12 }
0x1f17   : > { %v3533_v17 = vadd.f32 %v3980_v15, %v3526_v16 }
0x1f19   : > { %v3534_v20 = vpack.c.bf16 %v3533_v17, %v3533_v17 }
0x1f1b   : > { %4458 = vmatmul.mubr.msk.bf16.vlgmr.msra.gmra.mxu0 %vm869_vm1, %v3534_v20 }
0x1fdb   : > { %v3585_v45 = vpop.f32.mrf.mxu0 }
0x1fdc   : > { %v3586_v26 = vadd.f32 %v3981_v33, %v3585_v45 }
0x1fdd   : > { %v4459_v51 = vpop.f32.mrf.mxu0 }
0x1fde   : > { %v3591_v27 = vmax.f32 %v3586_v26, 0.0 }
0x1fdf   : > { %v3588_v28 = vpop.f32.mrf.mxu0 }
0x1fe0   : > { %v3592_v3 = vpack.c.bf16 %v3591_v27, %v3591_v27 }
0x1fe1   : > { %v4460_v29 = vpop.f32.mrf.mxu0 }
0x1fe2   : > { %4470 = vmatmul.mubr.msk.bf16.vlgmr.msra.gmra.mxu1 %vm3612_vm9, %v3592_v3 }
0x20a2   : > { %v3650_v31 = vpop.f32.mrf.mxu1 }
0x20a3   : > { %v3651_v32 = vadd.f32 %v3983_v30, %v3650_v31 }
0x20a4   : > { %v4471_v35 = vpop.f32.mrf.mxu1 }
0x20a5   : > { %v3656_v36 = vadd.f32 %v3651_v32, %v3533_v17 }
0x20a6   : > { %v3653_v37 = vpop.f32.mrf.mxu1 }
0x20a7   : > { %v3659_v38 = vsel %vm869_vm1, %v3656_v36, 0.0 }
0x20a8   : > { %3660 = vadd.xlane.f32.xlu1 %v3659_v38  ;;  %v4472_v39 = vpop.f32.mrf.mxu1 }
0x2131   : > { %v3661_v40 = vpop.xlane.xlu1 %3660 }
0x2132   : > { %v3662_v41 = vmul.f32 0.03125, %v3661_v40 }
0x2134   : > { %v3663_v42 = vsub.f32 %v3656_v36, %v3662_v41 }
0x2136   : > { %v3664_v43 = vmul.f32 %v3663_v42, %v3663_v42 }
0x2138   : > { %v3665_v19 = vsel %vm869_vm1, %v3664_v43, 0.0 }
0x2139   : > { %3666 = vadd.xlane.f32.xlu0 %v3665_v19 }
0x21c2   : > { %v3667_v44 = vpop.xlane.xlu0 %3666 }
0x21c3   : > { %v3668_v47 = vmul.f32 0.03125, %v3667_v44 }
0x21c5   : > { %v3669_v49 = vadd.f32 1e-05, %v3668_v47 }
0x21c7   : > { %4521 = vrsqrt.f32 %v3669_v49 }
0x21d4   : > { %v4522_v50 = vpop.eup %4521 }
0x21d5   : > { %v3671_v53 = vmul.f32 %v4522_v50, %v3663_v42 }
0x21d7   : > { %v3678_v56 = vmul.f32 %v3985_v52, %v3671_v53 }
0x21d9   : > { %v3685_v57 = vadd.f32 %v3986_v54, %v3678_v56 }
0x21db   : > { %3686 = vst.msk [vmem:[%s821_s2] sm:$0xff] %vm869_vm1, %v3685_v57 }
0x21dc PF: > { %s35_s29 = sadd.s32 1, %s4529_s29  }
0x21dd   : > { %p32_p4 = scmp.ge.s32.totalorder %s35_s29, 4  }
0x21df   :  { %34 = sbr.rel (!%p32_p4) target bundleno = 11 (0xb), region = 210 }

</bundles_post_ra>
